<compile_context>
chip_gen: v7x
topology: tpu7x:2x2x1
jax: 0.10.0
libtpu: 0.0.40
codegen_flags: <defaults>
</compile_context>

<pallas_src>
import functools
import math

import jax
import jax.numpy as jnp
from jax.experimental import pallas as pl
from jax.experimental.pallas import tpu as pltpu

LANE = 128  # TPU lane width; matmul N / K dims are padded to this.


def _round_up(x, m):
    return ((x + m - 1) // m) * m


def _pad_last(a, target):
    pad = target - a.shape[-1]
    if pad == 0:
        return a
    return jnp.pad(a, [(0, 0)] * (a.ndim - 1) + [(0, pad)])


# ----------------------------------------------------------------------------
# Kernel 1: conv-as-matmul  (im2col_cols @ wmat + bias), lane-dense N and K
# ----------------------------------------------------------------------------

def _conv_matmul_kernel(cols_ref, w_ref, b_ref, o_ref):
    acc = jnp.dot(cols_ref[...], w_ref[...], preferred_element_type=jnp.float32)
    o_ref[...] = (acc + b_ref[...]).astype(o_ref.dtype)


def pallas_conv_matmul(cols, wmat, bias, n_tiles, rows_per_tile):
    """out[(n, ho, wo), cpad] = cols @ wmat + bias.  Grid = one step per image."""
    M, K = cols.shape
    Kw, Nc = wmat.shape
    assert K == Kw and M == n_tiles * rows_per_tile
    return pl.pallas_call(
        _conv_matmul_kernel,
        out_shape=jax.ShapeDtypeStruct((M, Nc), jnp.float32),
        grid=(n_tiles,),
        in_specs=[
            pl.BlockSpec((rows_per_tile, K), lambda i: (i, 0)),
            pl.BlockSpec((K, Nc), lambda i: (0, 0)),
            pl.BlockSpec((1, Nc), lambda i: (0, 0)),
        ],
        out_specs=pl.BlockSpec((rows_per_tile, Nc), lambda i: (i, 0)),
        compiler_params=pltpu.CompilerParams(dimension_semantics=("parallel",)),
    )(cols, wmat, bias)


# ----------------------------------------------------------------------------
# Kernel 2: relu(max_pool2d(., 2)) on the lane-dense conv-matmul layout
# ----------------------------------------------------------------------------

def _pool_relu_kernel(a_ref, b_ref, c_ref, d_ref, o_ref):
    m = jnp.maximum(jnp.maximum(a_ref[...], b_ref[...]),
                    jnp.maximum(c_ref[...], d_ref[...]))
    o_ref[...] = jnp.maximum(m, 0.0)


def pallas_maxpool2_relu(conv_mat, n, ho, wo, c=LANE):
    """conv_mat: (n*ho*wo, c) with rows ordered (n, ho, wo).  Returns NHWC
    pooled activation (n, ho//2, wo//2, c).  The four 2x2-window planes are
    selected purely by BlockSpec index_maps over a free row-major reshape, so
    the layout change is done by the DMA engine (no XLA transpose)."""
    hp, wp = ho // 2, wo // 2
    xr = conv_mat.reshape(n, hp, 2, wp, 2 * c)   # pure row-major split/merge: free

    def spec(h2, w2):
        return pl.BlockSpec((n, hp, None, wp, c),
                            lambda i, h2=h2, w2=w2: (0, 0, h2, 0, w2))

    return pl.pallas_call(
        _pool_relu_kernel,
        out_shape=jax.ShapeDtypeStruct((n, hp, wp, c), jnp.float32),
        grid=(1,),
        in_specs=[spec(0, 0), spec(0, 1), spec(1, 0), spec(1, 1)],
        out_specs=pl.BlockSpec((n, hp, wp, c), lambda i: (0, 0, 0, 0)),
    )(xr, xr, xr, xr)


# ----------------------------------------------------------------------------
# Kernel 3: fused FC tail  fc1 -> relu -> fc2 -> log_softmax
# ----------------------------------------------------------------------------

def _fc_tail_kernel(x_ref, w1_ref, b1_ref, w2_ref, b2_ref,
                    h1_ref, h2_ref, lp_ref, *, n_classes):
    h1 = jnp.dot(x_ref[...], w1_ref[...], preferred_element_type=jnp.float32)
    h1 = jnp.maximum(h1 + b1_ref[...], 0.0)
    h1_ref[...] = h1
    h2 = jnp.dot(h1, w2_ref[...], preferred_element_type=jnp.float32) + b2_ref[...]
    h2_ref[...] = h2
    # log-softmax over the first n_classes (real) columns only.
    col = jax.lax.broadcasted_iota(jnp.int32, h2.shape, 1)
    hm = jnp.where(col < n_classes, h2, jnp.float32(-1e30))
    m = jnp.max(hm, axis=-1, keepdims=True)
    lse = m + jnp.log(jnp.sum(jnp.exp(hm - m), axis=-1, keepdims=True))
    lp_ref[...] = h2 - lse


def pallas_fc_tail(xf, w1, b1, w2, b2, n_classes):
    M = xf.shape[0]
    Mp = _round_up(max(M, 8), 8)
    if Mp != M:
        xf = jnp.pad(xf, ((0, Mp - M), (0, 0)))
    n_hidden = w1.shape[1]
    n_out = w2.shape[1]
    vmem = pl.BlockSpec(memory_space=pltpu.MemorySpace.VMEM)
    h1, h2, lp = pl.pallas_call(
        functools.partial(_fc_tail_kernel, n_classes=n_classes),
        out_shape=(jax.ShapeDtypeStruct((Mp, n_hidden), jnp.float32),
                   jax.ShapeDtypeStruct((Mp, n_out), jnp.float32),
                   jax.ShapeDtypeStruct((Mp, n_out), jnp.float32)),
        in_specs=[vmem, vmem, vmem, vmem, vmem],
        out_specs=(vmem, vmem, vmem),
    )(xf, w1, b1, w2, b2)
    return h1[:M], h2[:M], lp[:M]


# ----------------------------------------------------------------------------
# Host-side (cheap) data/weight plumbing
# ----------------------------------------------------------------------------

def _im2col_nhwc(x, k, cin):
    """x: (N, H, W, C) -> cols (N*Ho*Wo, k*k*cin), K ordered (di, dj, cin)."""
    n, h, w, _ = x.shape
    ho, wo = h - k + 1, w - k + 1
    pats = [x[:, di:di + ho, dj:dj + wo, :cin]
            for di in range(k) for dj in range(k)]
    cols = jnp.concatenate(pats, axis=-1)
    return cols.reshape(n * ho * wo, k * k * cin), (n, ho, wo)


def _conv_weight_mat(w, k_pad, n_pad):
    """(Cout, Cin, k, k) -> (k_pad, n_pad) matrix, K ordered (di, dj, cin)."""
    w = w.astype(jnp.float32)
    cout, cin, kh, kw = w.shape
    wmat = jnp.transpose(w, (2, 3, 1, 0)).reshape(kh * kw * cin, cout)
    return jnp.pad(wmat, ((0, k_pad - kh * kw * cin), (0, n_pad - cout)))


def _fc1_weight_mat(w, cin, hp, wp, c_pad, n_pad):
    """PyTorch flattens (N, cin, hp, wp) in (c, h, w) order; our pooled
    activation is (N, hp, wp, c_pad).  Permute + pad the *weight* so the
    kernel input stays lane-dense with zero activation-side glue."""
    w = w.astype(jnp.float32)
    nout, _ = w.shape
    w4 = w.reshape(nout, cin, hp, wp)
    w4 = jnp.transpose(w4, (2, 3, 1, 0))                     # (hp, wp, cin, nout)
    w4 = jnp.pad(w4, ((0, 0), (0, 0), (0, c_pad - cin), (0, 0)))
    wmat = w4.reshape(hp * wp * c_pad, nout)
    return jnp.pad(wmat, ((0, 0), (0, n_pad - nout)))


# ----------------------------------------------------------------------------
# Net forward (RobustSum(norm='L2') == plain matmul; dropout == identity)
# ----------------------------------------------------------------------------

def net_forward(params, x):
    n, _, h, w = x.shape
    zs = [x]

    # ---- conv1: 1 -> 10, k=5, valid ------------------------------------
    x_nhwc = x.reshape(n, h, w, 1)                          # Cin == 1: free
    cols1, (_, ho1, wo1) = _im2col_nhwc(x_nhwc, 5, 1)       # (n*576, 25)
    cols1 = _pad_last(cols1, LANE)                          # K 25 -> 128
    w1 = _conv_weight_mat(params["conv1_w"], LANE, LANE)    # (128, 128)
    b1 = _pad_last(params["conv1_b"].reshape(1, -1).astype(jnp.float32), LANE)
    c1 = pallas_conv_matmul(cols1, w1, b1, n, ho1 * wo1)    # (n*576, 128) lane-dense
    zs.append(jnp.transpose(c1.reshape(n, ho1, wo1, LANE)[..., :10], (0, 3, 1, 2)))

    # ---- relu(max_pool2d(conv1, 2)) -------------------------------------
    p1 = pallas_maxpool2_relu(c1, n, ho1, wo1)              # (n, 12, 12, 128)

    # ---- conv2: 10 -> 20, k=5, valid  (Dropout2d == identity, eval) -----
    cols2, (_, ho2, wo2) = _im2col_nhwc(p1, 5, 10)          # (n*64, 250)
    kp2 = _round_up(cols2.shape[1], LANE)                   # 256
    cols2 = _pad_last(cols2, kp2)
    w2 = _conv_weight_mat(params["conv2_w"], kp2, LANE)     # (256, 128)
    b2 = _pad_last(params["conv2_b"].reshape(1, -1).astype(jnp.float32), LANE)
    c2 = pallas_conv_matmul(cols2, w2, b2, n, ho2 * wo2)    # (n*64, 128)
    zs.append(jnp.transpose(c2.reshape(n, ho2, wo2, LANE)[..., :20], (0, 3, 1, 2)))

    # ---- relu(max_pool2d(conv2, 2)) -------------------------------------
    p2 = pallas_maxpool2_relu(c2, n, ho2, wo2)              # (n, 4, 4, 128)

    # ---- fused fc1 -> relu -> fc2 -> log_softmax ------------------------
    xf = p2.reshape(n, 4 * 4 * LANE)                        # (n, 2048), free
    w1fc = _fc1_weight_mat(params["fc1_w"], 20, 4, 4, LANE, LANE)   # (2048, 128)
    b1fc = _pad_last(params["fc1_b"].reshape(1, -1).astype(jnp.float32), LANE)
    w2fc = params["fc2_w"].T.astype(jnp.float32)            # (50, 10)
    w2fc = jnp.pad(w2fc, ((0, LANE - w2fc.shape[0]), (0, LANE - w2fc.shape[1])))
    b2fc = _pad_last(params["fc2_b"].reshape(1, -1).astype(jnp.float32), LANE)
    h1, h2, lp = pallas_fc_tail(xf, w1fc, b1fc, w2fc, b2fc, n_classes=10)
    zs.append(h1[:, :50])        # F.dropout == identity in eval mode
    zs.append(h2[:, :10])
    return lp[:, :10], zs


# ----------------------------------------------------------------------------
# Deterministic parameter init (shapes follow the PyTorch module)
# ----------------------------------------------------------------------------

def init_params(key):
    ks = jax.random.split(key, 8)

    def u(k, shape, fan_in):
        bound = 1.0 / math.sqrt(fan_in)
        return jax.random.uniform(k, shape, jnp.float32, -bound, bound)

    return {
        "conv1_w": u(ks[0], (10, 1, 5, 5), 1 * 5 * 5),
        "conv1_b": u(ks[1], (10,), 1 * 5 * 5),
        "conv2_w": u(ks[2], (20, 10, 5, 5), 10 * 5 * 5),
        "conv2_b": u(ks[3], (20,), 10 * 5 * 5),
        "fc1_w":   u(ks[4], (50, 320), 320),
        "fc1_b":   u(ks[5], (50,), 320),
        "fc2_w":   u(ks[6], (10, 50), 50),
        "fc2_b":   u(ks[7], (10,), 50),
    }


if __name__ == "__main__":
    key = jax.random.PRNGKey(0)
    kx, kp = jax.random.split(key)
    params = init_params(kp)
    # MNIST-shaped input: the flatten to 320 = 20*4*4 implies 1x28x28 images.
    x = jax.random.normal(kx, (2, 1, 28, 28), jnp.float32)

    fwd = jax.jit(net_forward)
    logp, zs = fwd(params, x)
    jax.block_until_ready((logp, zs))

    assert logp.shape == (2, 10)
    assert [z.shape for z in zs] == [(2, 1, 28, 28), (2, 10, 24, 24),
                                     (2, 20, 8, 8), (2, 50), (2, 10)]
    # log_softmax rows must sum to ~1 in prob space
    assert bool(jnp.allclose(jnp.sum(jnp.exp(logp), axis=1), 1.0, atol=1e-4))
    print("KERNEL_OK")
</pallas_src>

<mosaic_0001>
module attributes {stable_mosaic.version = 11 : i64} {
  func.func @_conv_matmul_kernel(%arg0: i32, %arg1: memref<576x128xf32, #tpu.memory_space<vmem>>, %arg2: memref<128x128xf32, #tpu.memory_space<vmem>>, %arg3: memref<1x128xf32, #tpu.memory_space<vmem>>, %arg4: memref<576x128xf32, #tpu.memory_space<vmem>>) attributes {dimension_semantics = [#tpu.dimension_semantics<parallel>], iteration_bounds = array<i64: 2>, scalar_prefetch = 0 : i64, scratch_operands = 0 : i64, tpu.core_type = #tpu.core_type<tc>, window_params = [{transform_indices = @transform_0, window_bounds = array<i64: 576, 128>}, {pipeline_mode = #tpu.pipeline_mode<synchronous>, transform_indices = @transform_1, window_bounds = array<i64: 128, 128>}, {pipeline_mode = #tpu.pipeline_mode<synchronous>, transform_indices = @transform_2, window_bounds = array<i64: 1, 128>}, {transform_indices = @transform_3, window_bounds = array<i64: 576, 128>}]} {
    %c0 = arith.constant 0 : index
    %c0_0 = arith.constant 0 : index
    %0 = vector.load %arg1[%c0, %c0_0] : memref<576x128xf32, #tpu.memory_space<vmem>>, vector<576x128xf32>
    %c0_1 = arith.constant 0 : index
    %c0_2 = arith.constant 0 : index
    %1 = vector.load %arg2[%c0_1, %c0_2] : memref<128x128xf32, #tpu.memory_space<vmem>>, vector<128x128xf32>
    %cst = arith.constant dense<0.000000e+00> : vector<576x128xf32>
    %2 = tpu.matmul %0, %1, %cst {dimension_numbers = #tpu.dot_dimension_numbers<[1], [0], [0], [1], [0, 0, 1, 1], [], []>} : vector<576x128xf32>, vector<128x128xf32>, vector<576x128xf32> -> vector<576x128xf32>
    %c0_3 = arith.constant 0 : index
    %c0_4 = arith.constant 0 : index
    %3 = vector.load %arg3[%c0_3, %c0_4] : memref<1x128xf32, #tpu.memory_space<vmem>>, vector<1x128xf32>
    %4 = vector.broadcast %3 : vector<1x128xf32> to vector<576x128xf32>
    %5 = arith.addf %2, %4 : vector<576x128xf32>
    %c0_5 = arith.constant 0 : index
    %c0_6 = arith.constant 0 : index
    %6 = vector.load %arg4[%c0_5, %c0_6] : memref<576x128xf32, #tpu.memory_space<vmem>>, vector<576x128xf32>
    tpu.vector_store %arg4[%c0_5, %c0_6], %5 {strides = array<i32>} : memref<576x128xf32, #tpu.memory_space<vmem>>, vector<576x128xf32>,
    return
  }
  func.func @transform_0(%arg0: i32) -> (i32, i32) {
    %c0_i32 = arith.constant 0 : i32
    %c0_i32_0 = arith.constant 0 : i32
    return %arg0, %c0_i32 : i32, i32
  }
  func.func @transform_1(%arg0: i32) -> (i32, i32) {
    %c0_i32 = arith.constant 0 : i32
    %c0_i32_0 = arith.constant 0 : i32
    %c0_i32_1 = arith.constant 0 : i32
    return %c0_i32, %c0_i32_0 : i32, i32
  }
  func.func @transform_2(%arg0: i32) -> (i32, i32) {
    %c0_i32 = arith.constant 0 : i32
    %c0_i32_0 = arith.constant 0 : i32
    %c0_i32_1 = arith.constant 0 : i32
    return %c0_i32, %c0_i32_0 : i32, i32
  }
  func.func @transform_3(%arg0: i32) -> (i32, i32) {
    %c0_i32 = arith.constant 0 : i32
    %c0_i32_0 = arith.constant 0 : i32
    return %arg0, %c0_i32 : i32, i32
  }
}

module attributes {stable_mosaic.version = 11 : i64} {
  func.func @_pool_relu_kernel(%arg0: i32, %arg1: memref<2x12x1x12x128xf32, #tpu.memory_space<vmem>>, %arg2: memref<2x12x1x12x128xf32, #tpu.memory_space<vmem>>, %arg3: memref<2x12x1x12x128xf32, #tpu.memory_space<vmem>>, %arg4: memref<2x12x1x12x128xf32, #tpu.memory_space<vmem>>, %arg5: memref<2x12x12x128xf32, #tpu.memory_space<vmem>>) attributes {dimension_semantics = [#tpu.dimension_semantics<arbitrary>], iteration_bounds = array<i64: 1>, scalar_prefetch = 0 : i64, scratch_operands = 0 : i64, tpu.core_type = #tpu.core_type<tc>, window_params = [{transform_indices = @transform_0, window_bounds = array<i64: 2, 12, 1, 12, 128>}, {transform_indices = @transform_1, window_bounds = array<i64: 2, 12, 1, 12, 128>}, {transform_indices = @transform_2, window_bounds = array<i64: 2, 12, 1, 12, 128>}, {transform_indices = @transform_3, window_bounds = array<i64: 2, 12, 1, 12, 128>}, {pipeline_mode = #tpu.pipeline_mode<synchronous>, transform_indices = @transform_4, window_bounds = array<i64: 2, 12, 12, 128>}]} {
    %c0 = arith.constant 0 : index
    %c0_0 = arith.constant 0 : index
    %c0_1 = arith.constant 0 : index
    %c0_2 = arith.constant 0 : index
    %c0_3 = arith.constant 0 : index
    %0 = vector.load %arg1[%c0, %c0_0, %c0_1, %c0_2, %c0_3] : memref<2x12x1x12x128xf32, #tpu.memory_space<vmem>>, vector<2x12x1x12x128xf32>
    %1 = vector.shape_cast %0 : vector<2x12x1x12x128xf32> to vector<2x12x12x128xf32>
    %c0_4 = arith.constant 0 : index
    %c0_5 = arith.constant 0 : index
    %c0_6 = arith.constant 0 : index
    %c0_7 = arith.constant 0 : index
    %c0_8 = arith.constant 0 : index
    %2 = vector.load %arg2[%c0_4, %c0_5, %c0_6, %c0_7, %c0_8] : memref<2x12x1x12x128xf32, #tpu.memory_space<vmem>>, vector<2x12x1x12x128xf32>
    %3 = vector.shape_cast %2 : vector<2x12x1x12x128xf32> to vector<2x12x12x128xf32>
    %4 = arith.maximumf %1, %3 : vector<2x12x12x128xf32>
    %c0_9 = arith.constant 0 : index
    %c0_10 = arith.constant 0 : index
    %c0_11 = arith.constant 0 : index
    %c0_12 = arith.constant 0 : index
    %c0_13 = arith.constant 0 : index
    %5 = vector.load %arg3[%c0_9, %c0_10, %c0_11, %c0_12, %c0_13] : memref<2x12x1x12x128xf32, #tpu.memory_space<vmem>>, vector<2x12x1x12x128xf32>
    %6 = vector.shape_cast %5 : vector<2x12x1x12x128xf32> to vector<2x12x12x128xf32>
    %c0_14 = arith.constant 0 : index
    %c0_15 = arith.constant 0 : index
    %c0_16 = arith.constant 0 : index
    %c0_17 = arith.constant 0 : index
    %c0_18 = arith.constant 0 : index
    %7 = vector.load %arg4[%c0_14, %c0_15, %c0_16, %c0_17, %c0_18] : memref<2x12x1x12x128xf32, #tpu.memory_space<vmem>>, vector<2x12x1x12x128xf32>
    %8 = vector.shape_cast %7 : vector<2x12x1x12x128xf32> to vector<2x12x12x128xf32>
    %9 = arith.maximumf %6, %8 : vector<2x12x12x128xf32>
    %10 = arith.maximumf %4, %9 : vector<2x12x12x128xf32>
    %cst = arith.constant 0.000000e+00 : f32
    %11 = vector.broadcast %cst : f32 to vector<2x12x12x128xf32>
    %12 = arith.maximumf %10, %11 : vector<2x12x12x128xf32>
    %c0_19 = arith.constant 0 : index
    %c0_20 = arith.constant 0 : index
    %c0_21 = arith.constant 0 : index
    %c0_22 = arith.constant 0 : index
    %13 = vector.load %arg5[%c0_19, %c0_20, %c0_21, %c0_22] : memref<2x12x12x128xf32, #tpu.memory_space<vmem>>, vector<2x12x12x128xf32>
    tpu.vector_store %arg5[%c0_19, %c0_20, %c0_21, %c0_22], %12 {strides = array<i32>} : memref<2x12x12x128xf32, #tpu.memory_space<vmem>>, vector<2x12x12x128xf32>,
    return
  }
  func.func @transform_0(%arg0: i32) -> (i32, i32, i32, i32, i32) {
    %c0_i32 = arith.constant 0 : i32
    %c0_i32_0 = arith.constant 0 : i32
    %c0_i32_1 = arith.constant 0 : i32
    %c0_i32_2 = arith.constant 0 : i32
    %c0_i32_3 = arith.constant 0 : i32
    %c0_i32_4 = arith.constant 0 : i32
    return %c0_i32, %c0_i32_0, %c0_i32_1, %c0_i32_2, %c0_i32_3 : i32, i32, i32, i32, i32
  }
  func.func @transform_1(%arg0: i32) -> (i32, i32, i32, i32, i32) {
    %c0_i32 = arith.constant 0 : i32
    %c0_i32_0 = arith.constant 0 : i32
    %c0_i32_1 = arith.constant 0 : i32
    %c0_i32_2 = arith.constant 0 : i32
    %c1_i32 = arith.constant 1 : i32
    %c0_i32_3 = arith.constant 0 : i32
    return %c0_i32, %c0_i32_0, %c0_i32_1, %c0_i32_2, %c1_i32 : i32, i32, i32, i32, i32
  }
  func.func @transform_2(%arg0: i32) -> (i32, i32, i32, i32, i32) {
    %c0_i32 = arith.constant 0 : i32
    %c0_i32_0 = arith.constant 0 : i32
    %c1_i32 = arith.constant 1 : i32
    %c0_i32_1 = arith.constant 0 : i32
    %c0_i32_2 = arith.constant 0 : i32
    %c0_i32_3 = arith.constant 0 : i32
    return %c0_i32, %c0_i32_0, %c1_i32, %c0_i32_1, %c0_i32_2 : i32, i32, i32, i32, i32
  }
  func.func @transform_3(%arg0: i32) -> (i32, i32, i32, i32, i32) {
    %c0_i32 = arith.constant 0 : i32
    %c0_i32_0 = arith.constant 0 : i32
    %c1_i32 = arith.constant 1 : i32
    %c0_i32_1 = arith.constant 0 : i32
    %c1_i32_2 = arith.constant 1 : i32
    %c0_i32_3 = arith.constant 0 : i32
    return %c0_i32, %c0_i32_0, %c1_i32, %c0_i32_1, %c1_i32_2 : i32, i32, i32, i32, i32
  }
  func.func @transform_4(%arg0: i32) -> (i32, i32, i32, i32) {
    %c0_i32 = arith.constant 0 : i32
    %c0_i32_0 = arith.constant 0 : i32
    %c0_i32_1 = arith.constant 0 : i32
    %c0_i32_2 = arith.constant 0 : i32
    %c0_i32_3 = arith.constant 0 : i32
    return %c0_i32, %c0_i32_0, %c0_i32_1, %c0_i32_2 : i32, i32, i32, i32
  }
}

module attributes {stable_mosaic.version = 11 : i64} {
  func.func @_conv_matmul_kernel(%arg0: i32, %arg1: memref<64x256xf32, #tpu.memory_space<vmem>>, %arg2: memref<256x128xf32, #tpu.memory_space<vmem>>, %arg3: memref<1x128xf32, #tpu.memory_space<vmem>>, %arg4: memref<64x128xf32, #tpu.memory_space<vmem>>) attributes {dimension_semantics = [#tpu.dimension_semantics<parallel>], iteration_bounds = array<i64: 2>, scalar_prefetch = 0 : i64, scratch_operands = 0 : i64, tpu.core_type = #tpu.core_type<tc>, window_params = [{transform_indices = @transform_0, window_bounds = array<i64: 64, 256>}, {pipeline_mode = #tpu.pipeline_mode<synchronous>, transform_indices = @transform_1, window_bounds = array<i64: 256, 128>}, {pipeline_mode = #tpu.pipeline_mode<synchronous>, transform_indices = @transform_2, window_bounds = array<i64: 1, 128>}, {transform_indices = @transform_3, window_bounds = array<i64: 64, 128>}]} {
    %c0 = arith.constant 0 : index
    %c0_0 = arith.constant 0 : index
    %0 = vector.load %arg1[%c0, %c0_0] : memref<64x256xf32, #tpu.memory_space<vmem>>, vector<64x256xf32>
    %c0_1 = arith.constant 0 : index
    %c0_2 = arith.constant 0 : index
    %1 = vector.load %arg2[%c0_1, %c0_2] : memref<256x128xf32, #tpu.memory_space<vmem>>, vector<256x128xf32>
    %cst = arith.constant dense<0.000000e+00> : vector<64x128xf32>
    %2 = tpu.matmul %0, %1, %cst {dimension_numbers = #tpu.dot_dimension_numbers<[1], [0], [0], [1], [0, 0, 1, 1], [], []>} : vector<64x256xf32>, vector<256x128xf32>, vector<64x128xf32> -> vector<64x128xf32>
    %c0_3 = arith.constant 0 : index
    %c0_4 = arith.constant 0 : index
    %3 = vector.load %arg3[%c0_3, %c0_4] : memref<1x128xf32, #tpu.memory_space<vmem>>, vector<1x128xf32>
    %4 = vector.broadcast %3 : vector<1x128xf32> to vector<64x128xf32>
    %5 = arith.addf %2, %4 : vector<64x128xf32>
    %c0_5 = arith.constant 0 : index
    %c0_6 = arith.constant 0 : index
    %6 = vector.load %arg4[%c0_5, %c0_6] : memref<64x128xf32, #tpu.memory_space<vmem>>, vector<64x128xf32>
    tpu.vector_store %arg4[%c0_5, %c0_6], %5 {strides = array<i32>} : memref<64x128xf32, #tpu.memory_space<vmem>>, vector<64x128xf32>,
    return
  }
  func.func @transform_0(%arg0: i32) -> (i32, i32) {
    %c0_i32 = arith.constant 0 : i32
    %c0_i32_0 = arith.constant 0 : i32
    return %arg0, %c0_i32 : i32, i32
  }
  func.func @transform_1(%arg0: i32) -> (i32, i32) {
    %c0_i32 = arith.constant 0 : i32
    %c0_i32_0 = arith.constant 0 : i32
    %c0_i32_1 = arith.constant 0 : i32
    return %c0_i32, %c0_i32_0 : i32, i32
  }
  func.func @transform_2(%arg0: i32) -> (i32, i32) {
    %c0_i32 = arith.constant 0 : i32
    %c0_i32_0 = arith.constant 0 : i32
    %c0_i32_1 = arith.constant 0 : i32
    return %c0_i32, %c0_i32_0 : i32, i32
  }
  func.func @transform_3(%arg0: i32) -> (i32, i32) {
    %c0_i32 = arith.constant 0 : i32
    %c0_i32_0 = arith.constant 0 : i32
    return %arg0, %c0_i32 : i32, i32
  }
}

module attributes {stable_mosaic.version = 11 : i64} {
  func.func @_pool_relu_kernel(%arg0: i32, %arg1: memref<2x4x1x4x128xf32, #tpu.memory_space<vmem>>, %arg2: memref<2x4x1x4x128xf32, #tpu.memory_space<vmem>>, %arg3: memref<2x4x1x4x128xf32, #tpu.memory_space<vmem>>, %arg4: memref<2x4x1x4x128xf32, #tpu.memory_space<vmem>>, %arg5: memref<2x4x4x128xf32, #tpu.memory_space<vmem>>) attributes {dimension_semantics = [#tpu.dimension_semantics<arbitrary>], iteration_bounds = array<i64: 1>, scalar_prefetch = 0 : i64, scratch_operands = 0 : i64, tpu.core_type = #tpu.core_type<tc>, window_params = [{transform_indices = @transform_0, window_bounds = array<i64: 2, 4, 1, 4, 128>}, {transform_indices = @transform_1, window_bounds = array<i64: 2, 4, 1, 4, 128>}, {transform_indices = @transform_2, window_bounds = array<i64: 2, 4, 1, 4, 128>}, {transform_indices = @transform_3, window_bounds = array<i64: 2, 4, 1, 4, 128>}, {pipeline_mode = #tpu.pipeline_mode<synchronous>, transform_indices = @transform_4, window_bounds = array<i64: 2, 4, 4, 128>}]} {
    %c0 = arith.constant 0 : index
    %c0_0 = arith.constant 0 : index
    %c0_1 = arith.constant 0 : index
    %c0_2 = arith.constant 0 : index
    %c0_3 = arith.constant 0 : index
    %0 = vector.load %arg1[%c0, %c0_0, %c0_1, %c0_2, %c0_3] : memref<2x4x1x4x128xf32, #tpu.memory_space<vmem>>, vector<2x4x1x4x128xf32>
    %1 = vector.shape_cast %0 : vector<2x4x1x4x128xf32> to vector<2x4x4x128xf32>
    %c0_4 = arith.constant 0 : index
    %c0_5 = arith.constant 0 : index
    %c0_6 = arith.constant 0 : index
    %c0_7 = arith.constant 0 : index
    %c0_8 = arith.constant 0 : index
    %2 = vector.load %arg2[%c0_4, %c0_5, %c0_6, %c0_7, %c0_8] : memref<2x4x1x4x128xf32, #tpu.memory_space<vmem>>, vector<2x4x1x4x128xf32>
    %3 = vector.shape_cast %2 : vector<2x4x1x4x128xf32> to vector<2x4x4x128xf32>
    %4 = arith.maximumf %1, %3 : vector<2x4x4x128xf32>
    %c0_9 = arith.constant 0 : index
    %c0_10 = arith.constant 0 : index
    %c0_11 = arith.constant 0 : index
    %c0_12 = arith.constant 0 : index
    %c0_13 = arith.constant 0 : index
    %5 = vector.load %arg3[%c0_9, %c0_10, %c0_11, %c0_12, %c0_13] : memref<2x4x1x4x128xf32, #tpu.memory_space<vmem>>, vector<2x4x1x4x128xf32>
    %6 = vector.shape_cast %5 : vector<2x4x1x4x128xf32> to vector<2x4x4x128xf32>
    %c0_14 = arith.constant 0 : index
    %c0_15 = arith.constant 0 : index
    %c0_16 = arith.constant 0 : index
    %c0_17 = arith.constant 0 : index
    %c0_18 = arith.constant 0 : index
    %7 = vector.load %arg4[%c0_14, %c0_15, %c0_16, %c0_17, %c0_18] : memref<2x4x1x4x128xf32, #tpu.memory_space<vmem>>, vector<2x4x1x4x128xf32>
    %8 = vector.shape_cast %7 : vector<2x4x1x4x128xf32> to vector<2x4x4x128xf32>
    %9 = arith.maximumf %6, %8 : vector<2x4x4x128xf32>
    %10 = arith.maximumf %4, %9 : vector<2x4x4x128xf32>
    %cst = arith.constant 0.000000e+00 : f32
    %11 = vector.broadcast %cst : f32 to vector<2x4x4x128xf32>
    %12 = arith.maximumf %10, %11 : vector<2x4x4x128xf32>
    %c0_19 = arith.constant 0 : index
    %c0_20 = arith.constant 0 : index
    %c0_21 = arith.constant 0 : index
    %c0_22 = arith.constant 0 : index
    %13 = vector.load %arg5[%c0_19, %c0_20, %c0_21, %c0_22] : memref<2x4x4x128xf32, #tpu.memory_space<vmem>>, vector<2x4x4x128xf32>
    tpu.vector_store %arg5[%c0_19, %c0_20, %c0_21, %c0_22], %12 {strides = array<i32>} : memref<2x4x4x128xf32, #tpu.memory_space<vmem>>, vector<2x4x4x128xf32>,
    return
  }
  func.func @transform_0(%arg0: i32) -> (i32, i32, i32, i32, i32) {
    %c0_i32 = arith.constant 0 : i32
    %c0_i32_0 = arith.constant 0 : i32
    %c0_i32_1 = arith.constant 0 : i32
    %c0_i32_2 = arith.constant 0 : i32
    %c0_i32_3 = arith.constant 0 : i32
    %c0_i32_4 = arith.constant 0 : i32
    return %c0_i32, %c0_i32_0, %c0_i32_1, %c0_i32_2, %c0_i32_3 : i32, i32, i32, i32, i32
  }
  func.func @transform_1(%arg0: i32) -> (i32, i32, i32, i32, i32) {
    %c0_i32 = arith.constant 0 : i32
    %c0_i32_0 = arith.constant 0 : i32
    %c0_i32_1 = arith.constant 0 : i32
    %c0_i32_2 = arith.constant 0 : i32
    %c1_i32 = arith.constant 1 : i32
    %c0_i32_3 = arith.constant 0 : i32
    return %c0_i32, %c0_i32_0, %c0_i32_1, %c0_i32_2, %c1_i32 : i32, i32, i32, i32, i32
  }
  func.func @transform_2(%arg0: i32) -> (i32, i32, i32, i32, i32) {
    %c0_i32 = arith.constant 0 : i32
    %c0_i32_0 = arith.constant 0 : i32
    %c1_i32 = arith.constant 1 : i32
    %c0_i32_1 = arith.constant 0 : i32
    %c0_i32_2 = arith.constant 0 : i32
    %c0_i32_3 = arith.constant 0 : i32
    return %c0_i32, %c0_i32_0, %c1_i32, %c0_i32_1, %c0_i32_2 : i32, i32, i32, i32, i32
  }
  func.func @transform_3(%arg0: i32) -> (i32, i32, i32, i32, i32) {
    %c0_i32 = arith.constant 0 : i32
    %c0_i32_0 = arith.constant 0 : i32
    %c1_i32 = arith.constant 1 : i32
    %c0_i32_1 = arith.constant 0 : i32
    %c1_i32_2 = arith.constant 1 : i32
    %c0_i32_3 = arith.constant 0 : i32
    return %c0_i32, %c0_i32_0, %c1_i32, %c0_i32_1, %c1_i32_2 : i32, i32, i32, i32, i32
  }
  func.func @transform_4(%arg0: i32) -> (i32, i32, i32, i32) {
    %c0_i32 = arith.constant 0 : i32
    %c0_i32_0 = arith.constant 0 : i32
    %c0_i32_1 = arith.constant 0 : i32
    %c0_i32_2 = arith.constant 0 : i32
    %c0_i32_3 = arith.constant 0 : i32
    return %c0_i32, %c0_i32_0, %c0_i32_1, %c0_i32_2 : i32, i32, i32, i32
  }
}

module attributes {stable_mosaic.version = 11 : i64} {
  func.func @_fc_tail_kernel(%arg0: memref<8x2048xf32, #tpu.memory_space<vmem>>, %arg1: memref<2048x128xf32, #tpu.memory_space<vmem>>, %arg2: memref<1x128xf32, #tpu.memory_space<vmem>>, %arg3: memref<128x128xf32, #tpu.memory_space<vmem>>, %arg4: memref<1x128xf32, #tpu.memory_space<vmem>>, %arg5: memref<8x128xf32, #tpu.memory_space<vmem>>, %arg6: memref<8x128xf32, #tpu.memory_space<vmem>>, %arg7: memref<8x128xf32, #tpu.memory_space<vmem>>) attributes {dimension_semantics = [], scalar_prefetch = 0 : i64, scratch_operands = 0 : i64, tpu.core_type = #tpu.core_type<tc>} {
    %c0 = arith.constant 0 : index
    %c0_0 = arith.constant 0 : index
    %0 = vector.load %arg0[%c0, %c0_0] : memref<8x2048xf32, #tpu.memory_space<vmem>>, vector<8x2048xf32>
    %c0_1 = arith.constant 0 : index
    %c0_2 = arith.constant 0 : index
    %1 = vector.load %arg1[%c0_1, %c0_2] : memref<2048x128xf32, #tpu.memory_space<vmem>>, vector<2048x128xf32>
    %cst = arith.constant dense<0.000000e+00> : vector<8x128xf32>
    %2 = tpu.matmul %0, %1, %cst {dimension_numbers = #tpu.dot_dimension_numbers<[1], [0], [0], [1], [0, 0, 1, 1], [], []>} : vector<8x2048xf32>, vector<2048x128xf32>, vector<8x128xf32> -> vector<8x128xf32>
    %c0_3 = arith.constant 0 : index
    %c0_4 = arith.constant 0 : index
    %3 = vector.load %arg2[%c0_3, %c0_4] : memref<1x128xf32, #tpu.memory_space<vmem>>, vector<1x128xf32>
    %4 = vector.broadcast %3 : vector<1x128xf32> to vector<8x128xf32>
    %5 = arith.addf %2, %4 : vector<8x128xf32>
    %cst_5 = arith.constant 0.000000e+00 : f32
    %6 = vector.broadcast %cst_5 : f32 to vector<8x128xf32>
    %7 = arith.maximumf %5, %6 : vector<8x128xf32>
    %c0_6 = arith.constant 0 : index
    %c0_7 = arith.constant 0 : index
    %8 = vector.load %arg5[%c0_6, %c0_7] : memref<8x128xf32, #tpu.memory_space<vmem>>, vector<8x128xf32>
    tpu.vector_store %arg5[%c0_6, %c0_7], %7 {strides = array<i32>} : memref<8x128xf32, #tpu.memory_space<vmem>>, vector<8x128xf32>,
    %c0_8 = arith.constant 0 : index
    %c0_9 = arith.constant 0 : index
    %9 = vector.load %arg3[%c0_8, %c0_9] : memref<128x128xf32, #tpu.memory_space<vmem>>, vector<128x128xf32>
    %cst_10 = arith.constant dense<0.000000e+00> : vector<8x128xf32>
    %10 = tpu.matmul %7, %9, %cst_10 {dimension_numbers = #tpu.dot_dimension_numbers<[1], [0], [0], [1], [0, 0, 1, 1], [], []>} : vector<8x128xf32>, vector<128x128xf32>, vector<8x128xf32> -> vector<8x128xf32>
    %c0_11 = arith.constant 0 : index
    %c0_12 = arith.constant 0 : index
    %11 = vector.load %arg4[%c0_11, %c0_12] : memref<1x128xf32, #tpu.memory_space<vmem>>, vector<1x128xf32>
    %12 = vector.broadcast %11 : vector<1x128xf32> to vector<8x128xf32>
    %13 = arith.addf %10, %12 : vector<8x128xf32>
    %c0_13 = arith.constant 0 : index
    %c0_14 = arith.constant 0 : index
    %14 = vector.load %arg6[%c0_13, %c0_14] : memref<8x128xf32, #tpu.memory_space<vmem>>, vector<8x128xf32>
    tpu.vector_store %arg6[%c0_13, %c0_14], %13 {strides = array<i32>} : memref<8x128xf32, #tpu.memory_space<vmem>>, vector<8x128xf32>,
    %15 = tpu.iota {dimensions = array<i32: 1>} : vector<8x128xi32>
    %c10_i32 = arith.constant 10 : i32
    %16 = vector.broadcast %c10_i32 : i32 to vector<8x128xi32>
    %17 = arith.cmpi slt, %15, %16 : vector<8x128xi32>
    %cst_15 = arith.constant -1.000000e+30 : f32
    %18 = vector.broadcast %cst_15 : f32 to vector<8x128xf32>
    %19 = arith.select %17, %13, %18 : vector<8x128xi1>, vector<8x128xf32>
    %cst_16 = arith.constant dense<0xFF800000> : vector<8xf32>
    %20 = vector.multi_reduction <maximumf>, %19, %cst_16 [1] : vector<8x128xf32> to vector<8xf32>
    %21 = vector.shape_cast %20 : vector<8xf32> to vector<8x1xf32>
    %22 = vector.broadcast %21 : vector<8x1xf32> to vector<8x128xf32>
    %23 = arith.subf %19, %22 : vector<8x128xf32>
    %24 = math.exp %23 : vector<8x128xf32>
    %cst_17 = arith.constant dense<0.000000e+00> : vector<8xf32>
    %25 = vector.multi_reduction <add>, %24, %cst_17 [1] : vector<8x128xf32> to vector<8xf32>
    %26 = vector.shape_cast %25 : vector<8xf32> to vector<8x1xf32>
    %27 = math.log %26 : vector<8x1xf32>
    %28 = arith.addf %21, %27 : vector<8x1xf32>
    %29 = vector.broadcast %28 : vector<8x1xf32> to vector<8x128xf32>
    %30 = arith.subf %13, %29 : vector<8x128xf32>
    %c0_18 = arith.constant 0 : index
    %c0_19 = arith.constant 0 : index
    %31 = vector.load %arg7[%c0_18, %c0_19] : memref<8x128xf32, #tpu.memory_space<vmem>>, vector<8x128xf32>
    tpu.vector_store %arg7[%c0_18, %c0_19], %30 {strides = array<i32>} : memref<8x128xf32, #tpu.memory_space<vmem>>, vector<8x128xf32>,
    return
  }
}

</mosaic_0001>

<bundles_post_ra>
// kernel: net_forward.5
= control target key start
LH: loop header
LB: loop body
LE: loop exit
PB: predicated region body
PF: predicated region fallthrough
CT: control target
= control target key end

     0   :  { %s1144_s12 = smov 0   ;;  %s1441_s0 = inlined_call_operand.vmem [shape: f32[1152,128], index: 0, kind: input, shape index: {}]   ;;  %s1442_s1 = inlined_call_operand.vmem [shape: f32[128,128], index: 1, kind: input, shape index: {}]   ;;  %s1443_s2 = inlined_call_operand.vmem [shape: f32[1,128], index: 2, kind: input, shape index: {}]   ;;  %s1444_s3 = inlined_call_operand.vmem [shape: f32[1152,128], index: 3, kind: output, shape index: {}]  }
   0x1 LB: > { %s822_s13 = sadd.s32 4294967295, %s1122_s12   ;;  %p826_p0 = scmp.ge.s32.totalorder %s1122_s12, 1  ;;  %s1122_s12 = sphi %s1144_s12, %s13_s12  }
   0x2   : > { %p138_p1 = scmp.lt.s32.totalorder %s1122_s12, 3 }
   0x4   : > { %p139_p2 = pnand %p826_p0, %p138_p1 }
   0x5   : > { %v246_v0 = vld [vmem:[%s1442_s1] sm:$0xff] (!%p139_p2)  ;;  %v247_v1 = vld [vmem:[%s1442_s1 + $0x8] sm:$0xff] (!%p139_p2)  ;;  %v248_v2 = vld [vmem:[%s1442_s1 + $0x10] sm:$0xff] (!%p139_p2)  ;;  %s162_s20 = smul.u32 (!%p139_p2), 72, %s822_s13 }
   0x6   : > { %142 = sbr.rel (%p139_p2) target bundleno = 325 (0x145), region = 32  ;;  %v1060_v3 = vpack.c.bf16 (!%p139_p2), %v247_v1, %v246_v0  ;;  %v249_v4 = vld [vmem:[%s1442_s1 + $0x18] sm:$0xff] (!%p139_p2)  ;;  %v250_v6 = vld [vmem:[%s1442_s1 + $0x20] sm:$0xff] (!%p139_p2)  ;;  %v251_v7 = vld [vmem:[%s1442_s1 + $0x28] sm:$0xff] (!%p139_p2) }
   0x7   : > { %v1064_v5 = vpack.c.bf16 (!%p139_p2), %v249_v4, %v248_v2  ;;  %p163_p3 = scmp.lt.s32.totalorder (!%p139_p2), %s162_s20, 143  ;;  %v1068_v8 = vpack.c.bf16 (!%p139_p2), %v251_v7, %v250_v6  ;;  %v252_v9 = vld [vmem:[%s1442_s1 + $0x30] sm:$0xff] (!%p139_p2)  ;;  %v253_v10 = vld [vmem:[%s1442_s1 + $0x38] sm:$0xff] (!%p139_p2)  ;;  %v254_v14 = vld [vmem:[%s1442_s1 + $0x40] sm:$0xff] (!%p139_p2) }
   0x8   : > { %1061 = vmatprep.subr.bf16.mxu0 (!%p139_p2), %v1060_v3  ;;  %1092 = vmatprep.subr.bf16.mxu1 (!%p139_p2), %v1060_v3  ;;  %v1072_v13 = vpack.c.bf16 (!%p139_p2), %v253_v10, %v252_v9  ;;  %v255_v15 = vld [vmem:[%s1442_s1 + $0x48] sm:$0xff] (!%p139_p2)  ;;  %v256_v17 = vld [vmem:[%s1442_s1 + $0x50] sm:$0xff] (!%p139_p2)  ;;  %v257_v18 = vld [vmem:[%s1442_s1 + $0x58] sm:$0xff] (!%p139_p2) }
   0x9   : > { %1063 = vmatpush3.bf16.msra.mxu0 (!%p139_p2), %v1060_v3  ;;  %1100 = vmatpush3.bf16.msra.mxu1 (!%p139_p2), %v1060_v3  ;;  %v1076_v16 = vpack.c.bf16 (!%p139_p2), %v255_v15, %v254_v14  ;;  %v1080_v19 = vpack.c.bf16 (!%p139_p2), %v257_v18, %v256_v17  ;;  %v258_v20 = vld [vmem:[%s1442_s1 + $0x60] sm:$0xff] (!%p139_p2)  ;;  %v259_v21 = vld [vmem:[%s1442_s1 + $0x68] sm:$0xff] (!%p139_p2)  ;;  %v260_v23 = vld [vmem:[%s1442_s1 + $0x70] sm:$0xff] (!%p139_p2) }
   0xa   : > { %1065 = vmatprep.subr.bf16.mxu0 (!%p139_p2), %v1064_v5  ;;  %1093 = vmatprep.subr.bf16.mxu1 (!%p139_p2), %v1064_v5  ;;  %v1084_v22 = vpack.c.bf16 (!%p139_p2), %v259_v21, %v258_v20  ;;  %v261_v24 = vld [vmem:[%s1442_s1 + $0x78] sm:$0xff] (!%p139_p2) }
   0xb   : > { %v1088_v25 = vpack.c.bf16 (!%p139_p2), %v261_v24, %v260_v23 }
   0xd   : > { %s1446_s20 = smov (!%p163_p3, %s162_s20), 143  ;;  %1067 = vmatpush3.bf16.msra.mxu0 %v1064_v5  ;;  %1101 = vmatpush3.bf16.msra.mxu1 %v1064_v5 }
   0xe   : > { %s827_s4 = sshll.u32 %s1446_s20, 3  ;;  %1069 = vmatprep.subr.bf16.mxu0 %v1068_v8  ;;  %1094 = vmatprep.subr.bf16.mxu1 %v1068_v8 }
   0xf   : > { %s1184_s7 = scalar_lea.vmem %s1441_s0, %s827_s4  ;;  %s1292_s30 = scalar_lea.vmem %s1444_s3, %s827_s4 }
  0x10   : > { %v174_v11 = vld [vmem:[%s1184_s7] sm:$0xff]  ;;  %v175_v26 = vld [vmem:[%s1184_s7 + $0x8] sm:$0xff]  ;;  %v176_v28 = vld [vmem:[%s1184_s7 + $0x10] sm:$0xff] }
  0x11   : > { %v210_v12 = vld [vmem:[%s1184_s7 + $0x120] sm:$0xff]  ;;  %952 = vmatprep.mubr.f32.mxu0 %v174_v11  ;;  %1071 = vmatpush3.bf16.msra.mxu0 %v1068_v8  ;;  %v211_v27 = vld [vmem:[%s1184_s7 + $0x128] sm:$0xff]  ;;  %v212_v29 = vld [vmem:[%s1184_s7 + $0x130] sm:$0xff] }
  0x12   : > { %1006 = vmatprep.mubr.f32.mxu1 %v210_v12  ;;  %1102 = vmatpush3.bf16.msra.mxu1 %v1068_v8  ;;  %v177_v30 = vld [vmem:[%s1184_s7 + $0x18] sm:$0xff]  ;;  %v178_v32 = vld [vmem:[%s1184_s7 + $0x20] sm:$0xff]  ;;  %v179_v34 = vld [vmem:[%s1184_s7 + $0x28] sm:$0xff] }
  0x13   : > { %1073 = vmatprep.subr.bf16.mxu0 %v1072_v13  ;;  %1095 = vmatprep.subr.bf16.mxu1 %v1072_v13  ;;  %v213_v31 = vld [vmem:[%s1184_s7 + $0x138] sm:$0xff]  ;;  %v214_v33 = vld [vmem:[%s1184_s7 + $0x140] sm:$0xff]  ;;  %v215_v35 = vld [vmem:[%s1184_s7 + $0x148] sm:$0xff] }
  0x14   : > { %v180_v36 = vld [vmem:[%s1184_s7 + $0x30] sm:$0xff]  ;;  %v181_v38 = vld [vmem:[%s1184_s7 + $0x38] sm:$0xff]  ;;  %v182_v40 = vld [vmem:[%s1184_s7 + $0x40] sm:$0xff] }
  0x15   : > { %1075 = vmatpush3.bf16.msra.mxu0 %v1072_v13  ;;  %v216_v37 = vld [vmem:[%s1184_s7 + $0x150] sm:$0xff]  ;;  %v217_v39 = vld [vmem:[%s1184_s7 + $0x158] sm:$0xff]  ;;  %v218_v41 = vld [vmem:[%s1184_s7 + $0x160] sm:$0xff] }
  0x16   : > { %1103 = vmatpush3.bf16.msra.mxu1 %v1072_v13  ;;  %1077 = vmatprep.subr.bf16.mxu0 %v1076_v16  ;;  %v183_v42 = vld [vmem:[%s1184_s7 + $0x48] sm:$0xff]  ;;  %v184_v44 = vld [vmem:[%s1184_s7 + $0x50] sm:$0xff]  ;;  %v185_v46 = vld [vmem:[%s1184_s7 + $0x58] sm:$0xff] }
  0x17   : > { %1096 = vmatprep.subr.bf16.mxu1 %v1076_v16  ;;  %v219_v43 = vld [vmem:[%s1184_s7 + $0x168] sm:$0xff]  ;;  %v220_v45 = vld [vmem:[%s1184_s7 + $0x170] sm:$0xff]  ;;  %v221_v47 = vld [vmem:[%s1184_s7 + $0x178] sm:$0xff] }
  0x18   : > { %v186_v48 = vld [vmem:[%s1184_s7 + $0x60] sm:$0xff]  ;;  %v187_v50 = vld [vmem:[%s1184_s7 + $0x68] sm:$0xff]  ;;  %v188_v52 = vld [vmem:[%s1184_s7 + $0x70] sm:$0xff] }
  0x19   : > { %1079 = vmatpush3.bf16.msra.mxu0 %v1076_v16  ;;  %v222_v49 = vld [vmem:[%s1184_s7 + $0x180] sm:$0xff]  ;;  %v223_v51 = vld [vmem:[%s1184_s7 + $0x188] sm:$0xff]  ;;  %v224_v53 = vld [vmem:[%s1184_s7 + $0x190] sm:$0xff] }
  0x1a   : > { %1104 = vmatpush3.bf16.msra.mxu1 %v1076_v16  ;;  %1081 = vmatprep.subr.bf16.mxu0 %v1080_v19  ;;  %v189_v54 = vld [vmem:[%s1184_s7 + $0x78] sm:$0xff]  ;;  %v190_v56 = vld [vmem:[%s1184_s7 + $0x80] sm:$0xff]  ;;  %v191_v58 = vld [vmem:[%s1184_s7 + $0x88] sm:$0xff] }
  0x1b   : > { %1097 = vmatprep.subr.bf16.mxu1 %v1080_v19  ;;  %v225_v55 = vld [vmem:[%s1184_s7 + $0x198] sm:$0xff]  ;;  %v226_v57 = vld [vmem:[%s1184_s7 + $0x1a0] sm:$0xff]  ;;  %v227_v59 = vld [vmem:[%s1184_s7 + $0x1a8] sm:$0xff] }
  0x1c   : > { %v192_v60 = vld [vmem:[%s1184_s7 + $0x90] sm:$0xff]  ;;  %v193_v62 = vld [vmem:[%s1184_s7 + $0x98] sm:$0xff]  ;;  %v194_v0 = vld [vmem:[%s1184_s7 + $0xa0] sm:$0xff] }
  0x1d   : > { %1083 = vmatpush3.bf16.msra.mxu0 %v1080_v19  ;;  %v228_v61 = vld [vmem:[%s1184_s7 + $0x1b0] sm:$0xff]  ;;  %v229_v63 = vld [vmem:[%s1184_s7 + $0x1b8] sm:$0xff]  ;;  %v230_v1 = vld [vmem:[%s1184_s7 + $0x1c0] sm:$0xff] }
  0x1e   : > { %1105 = vmatpush3.bf16.msra.mxu1 %v1080_v19  ;;  %1085 = vmatprep.subr.bf16.mxu0 %v1084_v22  ;;  %v195_v2 = vld [vmem:[%s1184_s7 + $0xa8] sm:$0xff]  ;;  %v196_v4 = vld [vmem:[%s1184_s7 + $0xb0] sm:$0xff]  ;;  %v197_v6 = vld [vmem:[%s1184_s7 + $0xb8] sm:$0xff] }
  0x1f   : > { %1098 = vmatprep.subr.bf16.mxu1 %v1084_v22  ;;  %v231_v3 = vld [vmem:[%s1184_s7 + $0x1c8] sm:$0xff]  ;;  %v232_v5 = vld [vmem:[%s1184_s7 + $0x1d0] sm:$0xff]  ;;  %v233_v7 = vld [vmem:[%s1184_s7 + $0x1d8] sm:$0xff] }
  0x20   : > { %v198_v8 = vld [vmem:[%s1184_s7 + $0xc0] sm:$0xff]  ;;  %v199_v10 = vld [vmem:[%s1184_s7 + $0xc8] sm:$0xff]  ;;  %v200_v12 = vld [vmem:[%s1184_s7 + $0xd0] sm:$0xff] }
  0x21   : > { %1087 = vmatpush3.bf16.msra.mxu0 %v1084_v22  ;;  %v234_v9 = vld [vmem:[%s1184_s7 + $0x1e0] sm:$0xff]  ;;  %v235_v11 = vld [vmem:[%s1184_s7 + $0x1e8] sm:$0xff]  ;;  %v236_v13 = vld [vmem:[%s1184_s7 + $0x1f0] sm:$0xff] }
  0x22   : > { %1106 = vmatpush3.bf16.msra.mxu1 %v1084_v22  ;;  %1089 = vmatprep.subr.bf16.mxu0 %v1088_v25  ;;  %v201_v14 = vld [vmem:[%s1184_s7 + $0xd8] sm:$0xff]  ;;  %v202_v16 = vld [vmem:[%s1184_s7 + $0xe0] sm:$0xff]  ;;  %v203_v18 = vld [vmem:[%s1184_s7 + $0xe8] sm:$0xff] }
  0x23   : > { %1099 = vmatprep.subr.bf16.mxu1 %v1088_v25  ;;  %v237_v15 = vld [vmem:[%s1184_s7 + $0x1f8] sm:$0xff]  ;;  %v238_v17 = vld [vmem:[%s1184_s7 + $0x200] sm:$0xff]  ;;  %v239_v19 = vld [vmem:[%s1184_s7 + $0x208] sm:$0xff] }
  0x24   : > { %v204_v20 = vld [vmem:[%s1184_s7 + $0xf0] sm:$0xff]  ;;  %v205_v22 = vld [vmem:[%s1184_s7 + $0xf8] sm:$0xff]  ;;  %v206_v24 = vld [vmem:[%s1184_s7 + $0x100] sm:$0xff] }
  0x25   : > { %1091 = vmatpush3.bf16.msra.mxu0 %v1088_v25  ;;  %v240_v21 = vld [vmem:[%s1184_s7 + $0x210] sm:$0xff]  ;;  %v241_v23 = vld [vmem:[%s1184_s7 + $0x218] sm:$0xff] }
  0x26   : > { %1107 = vmatpush3.bf16.msra.mxu1 %v1088_v25  ;;  %v242_v25 = vld [vmem:[%s1184_s7 + $0x220] sm:$0xff] }
  0x28   : > { %953 = vmatmul.mubr.f32.vlgmr.msra.gmra.mrb[0].mxu0 %v175_v26  ;;  %v207_v26 = vld [vmem:[%s1184_s7 + $0x108] sm:$0xff] }
  0x29   : > { %1007 = vmatmul.mubr.f32.vlgmr.msra.gmra.mrb[0].mxu1 %v211_v27  ;;  %955 = vmatprep.mubr.f32.mxu0 %v176_v28  ;;  %v243_v27 = vld [vmem:[%s1184_s7 + $0x228] sm:$0xff]  ;;  %v208_v28 = vld [vmem:[%s1184_s7 + $0x110] sm:$0xff] }
  0x2a   : > { %1009 = vmatprep.mubr.f32.mxu1 %v212_v29  ;;  %v244_v29 = vld [vmem:[%s1184_s7 + $0x230] sm:$0xff] }
  0x2c   : > { %956 = vmatmul.mubr.f32.gmra.mrb[2].mxu0 %v177_v30  ;;  %v209_v30 = vld [vmem:[%s1184_s7 + $0x118] sm:$0xff] }
  0x2d   : > { %1010 = vmatmul.mubr.f32.gmra.mrb[2].mxu1 %v213_v31  ;;  %958 = vmatprep.mubr.f32.mxu0 %v178_v32  ;;  %v245_v31 = vld [vmem:[%s1184_s7 + $0x238] sm:$0xff]  ;;  %v1285_v32 = vld [vmem:[%s1443_s2] ss:$0 sm:$0xff] }
  0x2e   : > { %1012 = vmatprep.mubr.f32.mxu1 %v214_v33 }
  0x30   : > { %959 = vmatmul.mubr.f32.gmra.mrb[4].mxu0 %v179_v34 }
  0x31   : > { %1013 = vmatmul.mubr.f32.gmra.mrb[4].mxu1 %v215_v35  ;;  %961 = vmatprep.mubr.f32.mxu0 %v180_v36 }
  0x32   : > { %1015 = vmatprep.mubr.f32.mxu1 %v216_v37 }
  0x34   : > { %962 = vmatmul.mubr.f32.gmra.mrb[6].mxu0 %v181_v38 }
  0x35   : > { %1016 = vmatmul.mubr.f32.gmra.mrb[6].mxu1 %v217_v39  ;;  %964 = vmatprep.mubr.f32.mxu0 %v182_v40 }
  0x36   : > { %1018 = vmatprep.mubr.f32.mxu1 %v218_v41 }
  0x38   : > { %965 = vmatmul.mubr.f32.gmra.mrb[8].mxu0 %v183_v42 }
  0x39   : > { %1019 = vmatmul.mubr.f32.gmra.mrb[8].mxu1 %v219_v43  ;;  %967 = vmatprep.mubr.f32.mxu0 %v184_v44 }
  0x3a   : > { %1021 = vmatprep.mubr.f32.mxu1 %v220_v45 }
  0x3c   : > { %968 = vmatmul.mubr.f32.gmra.mrb[10].mxu0 %v185_v46 }
  0x3d   : > { %1022 = vmatmul.mubr.f32.gmra.mrb[10].mxu1 %v221_v47  ;;  %970 = vmatprep.mubr.f32.mxu0 %v186_v48 }
  0x3e   : > { %1024 = vmatprep.mubr.f32.mxu1 %v222_v49 }
  0x40   : > { %971 = vmatmul.mubr.f32.gmra.mrb[12].mxu0 %v187_v50 }
  0x41   : > { %1025 = vmatmul.mubr.f32.gmra.mrb[12].mxu1 %v223_v51  ;;  %973 = vmatprep.mubr.f32.mxu0 %v188_v52 }
  0x42   : > { %1027 = vmatprep.mubr.f32.mxu1 %v224_v53 }
  0x44   : > { %974 = vmatmul.mubr.f32.gmra.mrb[14].mxu0 %v189_v54 }
  0x45   : > { %1028 = vmatmul.mubr.f32.gmra.mrb[14].mxu1 %v225_v55  ;;  %976 = vmatprep.mubr.f32.mxu0 %v190_v56 }
  0x46   : > { %1030 = vmatprep.mubr.f32.mxu1 %v226_v57 }
  0x48   : > { %977 = vmatmul.mubr.f32.gmra.mrb[16].mxu0 %v191_v58 }
  0x49   : > { %1031 = vmatmul.mubr.f32.gmra.mrb[16].mxu1 %v227_v59  ;;  %979 = vmatprep.mubr.f32.mxu0 %v192_v60 }
  0x4a   : > { %1033 = vmatprep.mubr.f32.mxu1 %v228_v61 }
  0x4c   : > { %980 = vmatmul.mubr.f32.gmra.mrb[18].mxu0 %v193_v62 }
  0x4d   : > { %1034 = vmatmul.mubr.f32.gmra.mrb[18].mxu1 %v229_v63  ;;  %982 = vmatprep.mubr.f32.mxu0 %v194_v0 }
  0x4e   : > { %1036 = vmatprep.mubr.f32.mxu1 %v230_v1 }
  0x50   : > { %983 = vmatmul.mubr.f32.gmra.mrb[20].mxu0 %v195_v2 }
  0x51   : > { %1037 = vmatmul.mubr.f32.gmra.mrb[20].mxu1 %v231_v3  ;;  %985 = vmatprep.mubr.f32.mxu0 %v196_v4 }
  0x52   : > { %1039 = vmatprep.mubr.f32.mxu1 %v232_v5 }
  0x54   : > { %986 = vmatmul.mubr.f32.gmra.mrb[22].mxu0 %v197_v6 }
  0x55   : > { %1040 = vmatmul.mubr.f32.gmra.mrb[22].mxu1 %v233_v7  ;;  %988 = vmatprep.mubr.f32.mxu0 %v198_v8 }
  0x56   : > { %1042 = vmatprep.mubr.f32.mxu1 %v234_v9 }
  0x58   : > { %989 = vmatmul.mubr.f32.gmra.mrb[24].mxu0 %v199_v10 }
  0x59   : > { %1043 = vmatmul.mubr.f32.gmra.mrb[24].mxu1 %v235_v11  ;;  %991 = vmatprep.mubr.f32.mxu0 %v200_v12 }
  0x5a   : > { %1045 = vmatprep.mubr.f32.mxu1 %v236_v13 }
  0x5c   : > { %992 = vmatmul.mubr.f32.gmra.mrb[26].mxu0 %v201_v14 }
  0x5d   : > { %1046 = vmatmul.mubr.f32.gmra.mrb[26].mxu1 %v237_v15  ;;  %994 = vmatprep.mubr.f32.mxu0 %v202_v16 }
  0x5e   : > { %1048 = vmatprep.mubr.f32.mxu1 %v238_v17 }
  0x60   : > { %995 = vmatmul.mubr.f32.gmra.mrb[28].mxu0 %v203_v18 }
  0x61   : > { %1049 = vmatmul.mubr.f32.gmra.mrb[28].mxu1 %v239_v19  ;;  %997 = vmatprep.mubr.f32.mxu0 %v204_v20 }
  0x62   : > { %1051 = vmatprep.mubr.f32.mxu1 %v240_v21 }
  0x64   : > { %998 = vmatmul.mubr.f32.gmra.mrb[30].mxu0 %v205_v22 }
  0x65   : > { %1052 = vmatmul.mubr.f32.gmra.mrb[30].mxu1 %v241_v23  ;;  %1000 = vmatprep.mubr.f32.mxu0 %v206_v24 }
  0x66   : > { %1054 = vmatprep.mubr.f32.mxu1 %v242_v25 }
  0x68   : > { %1001 = vmatmul.mubr.f32.gmra.mrb[32].mxu0 %v207_v26 }
  0x69   : > { %1055 = vmatmul.mubr.f32.gmra.mrb[32].mxu1 %v243_v27  ;;  %1003 = vmatprep.mubr.f32.mxu0 %v208_v28 }
  0x6a   : > { %1057 = vmatprep.mubr.f32.mxu1 %v244_v29 }
  0x6c   : > { %1004 = vmatmul.mubr.f32.gmra.mrb[34].mxu0 %v209_v30 }
  0x6d   : > { %1058 = vmatmul.mubr.f32.gmra.mrb[34].mxu1 %v245_v31 }
  0xfb   : > { %v954_v33 = vpop.f32.mrb[0].mxu0 }
  0xfc   : > { %v1008_v34 = vpop.f32.mrb[0].mxu1  ;;  %v341_v35 = vadd.f32 %v954_v33, %v1285_v32  ;;  %v335_v37 = vpop.f32.mrb[1].mxu0 }
  0xfd   : > { %v521_v36 = vadd.f32 %v1008_v34, %v1285_v32  ;;  %v515_v38 = vpop.f32.mrb[1].mxu1  ;;  %v336_v39 = vadd.f32 %v1285_v32, %v335_v37 }
  0xfe   : > { %v516_v40 = vadd.f32 %v1285_v32, %v515_v38  ;;  %695 = vst [vmem:[%s1292_s30 + $0x8] sm:$0xff] %v341_v35 }
  0xff   : > { %731 = vst [vmem:[%s1292_s30 + $0x128] sm:$0xff] %v521_v36  ;;  %694 = vst [vmem:[%s1292_s30] sm:$0xff] %v336_v39  ;;  %v957_v41 = vpop.f32.mrb[2].mxu0 }
 0x100   : > { %730 = vst [vmem:[%s1292_s30 + $0x120] sm:$0xff] %v516_v40  ;;  %v1011_v42 = vpop.f32.mrb[2].mxu1  ;;  %v351_v43 = vadd.f32 %v957_v41, %v1285_v32  ;;  %v345_v45 = vpop.f32.mrb[3].mxu0 }
 0x101   : > { %v531_v44 = vadd.f32 %v1011_v42, %v1285_v32  ;;  %v525_v46 = vpop.f32.mrb[3].mxu1  ;;  %v346_v47 = vadd.f32 %v1285_v32, %v345_v45 }
 0x102   : > { %v526_v48 = vadd.f32 %v1285_v32, %v525_v46  ;;  %697 = vst [vmem:[%s1292_s30 + $0x18] sm:$0xff] %v351_v43 }
 0x103   : > { %733 = vst [vmem:[%s1292_s30 + $0x138] sm:$0xff] %v531_v44  ;;  %696 = vst [vmem:[%s1292_s30 + $0x10] sm:$0xff] %v346_v47  ;;  %v960_v49 = vpop.f32.mrb[4].mxu0 }
 0x104   : > { %732 = vst [vmem:[%s1292_s30 + $0x130] sm:$0xff] %v526_v48  ;;  %v1014_v50 = vpop.f32.mrb[4].mxu1  ;;  %v361_v51 = vadd.f32 %v960_v49, %v1285_v32  ;;  %v355_v53 = vpop.f32.mrb[5].mxu0 }
 0x105   : > { %v541_v52 = vadd.f32 %v1014_v50, %v1285_v32  ;;  %v535_v54 = vpop.f32.mrb[5].mxu1  ;;  %v356_v55 = vadd.f32 %v1285_v32, %v355_v53 }
 0x106   : > { %v536_v56 = vadd.f32 %v1285_v32, %v535_v54  ;;  %699 = vst [vmem:[%s1292_s30 + $0x28] sm:$0xff] %v361_v51 }
 0x107   : > { %735 = vst [vmem:[%s1292_s30 + $0x148] sm:$0xff] %v541_v52  ;;  %698 = vst [vmem:[%s1292_s30 + $0x20] sm:$0xff] %v356_v55  ;;  %v963_v57 = vpop.f32.mrb[6].mxu0 }
 0x108   : > { %734 = vst [vmem:[%s1292_s30 + $0x140] sm:$0xff] %v536_v56  ;;  %v1017_v58 = vpop.f32.mrb[6].mxu1  ;;  %v371_v59 = vadd.f32 %v963_v57, %v1285_v32  ;;  %v365_v61 = vpop.f32.mrb[7].mxu0 }
 0x109   : > { %v551_v60 = vadd.f32 %v1017_v58, %v1285_v32  ;;  %v545_v62 = vpop.f32.mrb[7].mxu1  ;;  %v366_v63 = vadd.f32 %v1285_v32, %v365_v61 }
 0x10a   : > { %v546_v0 = vadd.f32 %v1285_v32, %v545_v62  ;;  %701 = vst [vmem:[%s1292_s30 + $0x38] sm:$0xff] %v371_v59 }
 0x10b   : > { %737 = vst [vmem:[%s1292_s30 + $0x158] sm:$0xff] %v551_v60  ;;  %700 = vst [vmem:[%s1292_s30 + $0x30] sm:$0xff] %v366_v63  ;;  %v966_v1 = vpop.f32.mrb[8].mxu0 }
 0x10c   : > { %736 = vst [vmem:[%s1292_s30 + $0x150] sm:$0xff] %v546_v0  ;;  %v1020_v2 = vpop.f32.mrb[8].mxu1  ;;  %v381_v3 = vadd.f32 %v966_v1, %v1285_v32  ;;  %v375_v5 = vpop.f32.mrb[9].mxu0 }
 0x10d   : > { %v561_v4 = vadd.f32 %v1020_v2, %v1285_v32  ;;  %v555_v6 = vpop.f32.mrb[9].mxu1  ;;  %v376_v7 = vadd.f32 %v1285_v32, %v375_v5 }
 0x10e   : > { %v556_v8 = vadd.f32 %v1285_v32, %v555_v6  ;;  %703 = vst [vmem:[%s1292_s30 + $0x48] sm:$0xff] %v381_v3 }
 0x10f   : > { %739 = vst [vmem:[%s1292_s30 + $0x168] sm:$0xff] %v561_v4  ;;  %702 = vst [vmem:[%s1292_s30 + $0x40] sm:$0xff] %v376_v7  ;;  %v969_v9 = vpop.f32.mrb[10].mxu0 }
 0x110   : > { %738 = vst [vmem:[%s1292_s30 + $0x160] sm:$0xff] %v556_v8  ;;  %v1023_v10 = vpop.f32.mrb[10].mxu1  ;;  %v391_v11 = vadd.f32 %v969_v9, %v1285_v32  ;;  %v385_v13 = vpop.f32.mrb[11].mxu0 }
 0x111   : > { %v571_v12 = vadd.f32 %v1023_v10, %v1285_v32  ;;  %v565_v14 = vpop.f32.mrb[11].mxu1  ;;  %v386_v15 = vadd.f32 %v1285_v32, %v385_v13 }
 0x112   : > { %v566_v16 = vadd.f32 %v1285_v32, %v565_v14  ;;  %705 = vst [vmem:[%s1292_s30 + $0x58] sm:$0xff] %v391_v11 }
 0x113   : > { %741 = vst [vmem:[%s1292_s30 + $0x178] sm:$0xff] %v571_v12  ;;  %704 = vst [vmem:[%s1292_s30 + $0x50] sm:$0xff] %v386_v15  ;;  %v972_v17 = vpop.f32.mrb[12].mxu0 }
 0x114   : > { %740 = vst [vmem:[%s1292_s30 + $0x170] sm:$0xff] %v566_v16  ;;  %v1026_v18 = vpop.f32.mrb[12].mxu1  ;;  %v401_v19 = vadd.f32 %v972_v17, %v1285_v32  ;;  %v395_v21 = vpop.f32.mrb[13].mxu0 }
 0x115   : > { %v581_v20 = vadd.f32 %v1026_v18, %v1285_v32  ;;  %v575_v22 = vpop.f32.mrb[13].mxu1  ;;  %v396_v23 = vadd.f32 %v1285_v32, %v395_v21 }
 0x116   : > { %v576_v24 = vadd.f32 %v1285_v32, %v575_v22  ;;  %707 = vst [vmem:[%s1292_s30 + $0x68] sm:$0xff] %v401_v19 }
 0x117   : > { %743 = vst [vmem:[%s1292_s30 + $0x188] sm:$0xff] %v581_v20  ;;  %706 = vst [vmem:[%s1292_s30 + $0x60] sm:$0xff] %v396_v23  ;;  %v975_v25 = vpop.f32.mrb[14].mxu0 }
 0x118   : > { %742 = vst [vmem:[%s1292_s30 + $0x180] sm:$0xff] %v576_v24  ;;  %v1029_v26 = vpop.f32.mrb[14].mxu1  ;;  %v411_v27 = vadd.f32 %v975_v25, %v1285_v32  ;;  %v405_v29 = vpop.f32.mrb[15].mxu0 }
 0x119   : > { %v591_v28 = vadd.f32 %v1029_v26, %v1285_v32  ;;  %v585_v30 = vpop.f32.mrb[15].mxu1  ;;  %v406_v31 = vadd.f32 %v1285_v32, %v405_v29 }
 0x11a   : > { %v586_v33 = vadd.f32 %v1285_v32, %v585_v30  ;;  %709 = vst [vmem:[%s1292_s30 + $0x78] sm:$0xff] %v411_v27 }
 0x11b   : > { %745 = vst [vmem:[%s1292_s30 + $0x198] sm:$0xff] %v591_v28  ;;  %708 = vst [vmem:[%s1292_s30 + $0x70] sm:$0xff] %v406_v31  ;;  %v978_v34 = vpop.f32.mrb[16].mxu0 }
 0x11c   : > { %744 = vst [vmem:[%s1292_s30 + $0x190] sm:$0xff] %v586_v33  ;;  %v1032_v35 = vpop.f32.mrb[16].mxu1  ;;  %v421_v36 = vadd.f32 %v978_v34, %v1285_v32  ;;  %v415_v38 = vpop.f32.mrb[17].mxu0 }
 0x11d   : > { %v601_v37 = vadd.f32 %v1032_v35, %v1285_v32  ;;  %v595_v39 = vpop.f32.mrb[17].mxu1  ;;  %v416_v40 = vadd.f32 %v1285_v32, %v415_v38 }
 0x11e   : > { %v596_v41 = vadd.f32 %v1285_v32, %v595_v39  ;;  %711 = vst [vmem:[%s1292_s30 + $0x88] sm:$0xff] %v421_v36 }
 0x11f   : > { %747 = vst [vmem:[%s1292_s30 + $0x1a8] sm:$0xff] %v601_v37  ;;  %710 = vst [vmem:[%s1292_s30 + $0x80] sm:$0xff] %v416_v40  ;;  %v981_v42 = vpop.f32.mrb[18].mxu0 }
 0x120   : > { %746 = vst [vmem:[%s1292_s30 + $0x1a0] sm:$0xff] %v596_v41  ;;  %v1035_v43 = vpop.f32.mrb[18].mxu1  ;;  %v431_v44 = vadd.f32 %v981_v42, %v1285_v32  ;;  %v425_v46 = vpop.f32.mrb[19].mxu0 }
 0x121   : > { %v611_v45 = vadd.f32 %v1035_v43, %v1285_v32  ;;  %v605_v47 = vpop.f32.mrb[19].mxu1  ;;  %v426_v48 = vadd.f32 %v1285_v32, %v425_v46 }
 0x122   : > { %v606_v49 = vadd.f32 %v1285_v32, %v605_v47  ;;  %713 = vst [vmem:[%s1292_s30 + $0x98] sm:$0xff] %v431_v44 }
 0x123   : > { %749 = vst [vmem:[%s1292_s30 + $0x1b8] sm:$0xff] %v611_v45  ;;  %712 = vst [vmem:[%s1292_s30 + $0x90] sm:$0xff] %v426_v48  ;;  %v984_v50 = vpop.f32.mrb[20].mxu0 }
 0x124   : > { %748 = vst [vmem:[%s1292_s30 + $0x1b0] sm:$0xff] %v606_v49  ;;  %v1038_v51 = vpop.f32.mrb[20].mxu1  ;;  %v441_v52 = vadd.f32 %v984_v50, %v1285_v32  ;;  %v435_v54 = vpop.f32.mrb[21].mxu0 }
 0x125   : > { %v621_v53 = vadd.f32 %v1038_v51, %v1285_v32  ;;  %v615_v55 = vpop.f32.mrb[21].mxu1  ;;  %v436_v56 = vadd.f32 %v1285_v32, %v435_v54 }
 0x126   : > { %v616_v57 = vadd.f32 %v1285_v32, %v615_v55  ;;  %715 = vst [vmem:[%s1292_s30 + $0xa8] sm:$0xff] %v441_v52 }
 0x127   : > { %751 = vst [vmem:[%s1292_s30 + $0x1c8] sm:$0xff] %v621_v53  ;;  %714 = vst [vmem:[%s1292_s30 + $0xa0] sm:$0xff] %v436_v56  ;;  %v987_v58 = vpop.f32.mrb[22].mxu0 }
 0x128   : > { %750 = vst [vmem:[%s1292_s30 + $0x1c0] sm:$0xff] %v616_v57  ;;  %v1041_v59 = vpop.f32.mrb[22].mxu1  ;;  %v451_v60 = vadd.f32 %v987_v58, %v1285_v32  ;;  %v445_v62 = vpop.f32.mrb[23].mxu0 }
 0x129   : > { %v631_v61 = vadd.f32 %v1041_v59, %v1285_v32  ;;  %v625_v63 = vpop.f32.mrb[23].mxu1  ;;  %v446_v0 = vadd.f32 %v1285_v32, %v445_v62 }
 0x12a   : > { %v626_v1 = vadd.f32 %v1285_v32, %v625_v63  ;;  %717 = vst [vmem:[%s1292_s30 + $0xb8] sm:$0xff] %v451_v60 }
 0x12b   : > { %753 = vst [vmem:[%s1292_s30 + $0x1d8] sm:$0xff] %v631_v61  ;;  %716 = vst [vmem:[%s1292_s30 + $0xb0] sm:$0xff] %v446_v0  ;;  %v990_v2 = vpop.f32.mrb[24].mxu0 }
 0x12c   : > { %752 = vst [vmem:[%s1292_s30 + $0x1d0] sm:$0xff] %v626_v1  ;;  %v1044_v3 = vpop.f32.mrb[24].mxu1  ;;  %v461_v4 = vadd.f32 %v990_v2, %v1285_v32  ;;  %v455_v6 = vpop.f32.mrb[25].mxu0 }
 0x12d   : > { %v641_v5 = vadd.f32 %v1044_v3, %v1285_v32  ;;  %v635_v7 = vpop.f32.mrb[25].mxu1  ;;  %v456_v8 = vadd.f32 %v1285_v32, %v455_v6 }
 0x12e   : > { %v636_v9 = vadd.f32 %v1285_v32, %v635_v7  ;;  %719 = vst [vmem:[%s1292_s30 + $0xc8] sm:$0xff] %v461_v4 }
 0x12f   : > { %755 = vst [vmem:[%s1292_s30 + $0x1e8] sm:$0xff] %v641_v5  ;;  %718 = vst [vmem:[%s1292_s30 + $0xc0] sm:$0xff] %v456_v8  ;;  %v993_v10 = vpop.f32.mrb[26].mxu0 }
 0x130   : > { %754 = vst [vmem:[%s1292_s30 + $0x1e0] sm:$0xff] %v636_v9  ;;  %v1047_v11 = vpop.f32.mrb[26].mxu1  ;;  %v471_v12 = vadd.f32 %v993_v10, %v1285_v32  ;;  %v465_v14 = vpop.f32.mrb[27].mxu0 }
 0x131   : > { %v651_v13 = vadd.f32 %v1047_v11, %v1285_v32  ;;  %v645_v15 = vpop.f32.mrb[27].mxu1  ;;  %v466_v16 = vadd.f32 %v1285_v32, %v465_v14 }
 0x132   : > { %v646_v17 = vadd.f32 %v1285_v32, %v645_v15  ;;  %721 = vst [vmem:[%s1292_s30 + $0xd8] sm:$0xff] %v471_v12 }
 0x133   : > { %757 = vst [vmem:[%s1292_s30 + $0x1f8] sm:$0xff] %v651_v13  ;;  %720 = vst [vmem:[%s1292_s30 + $0xd0] sm:$0xff] %v466_v16  ;;  %v996_v18 = vpop.f32.mrb[28].mxu0 }
 0x134   : > { %756 = vst [vmem:[%s1292_s30 + $0x1f0] sm:$0xff] %v646_v17  ;;  %v1050_v19 = vpop.f32.mrb[28].mxu1  ;;  %v481_v20 = vadd.f32 %v996_v18, %v1285_v32  ;;  %v475_v22 = vpop.f32.mrb[29].mxu0 }
 0x135   : > { %v661_v21 = vadd.f32 %v1050_v19, %v1285_v32  ;;  %v655_v23 = vpop.f32.mrb[29].mxu1  ;;  %v476_v24 = vadd.f32 %v1285_v32, %v475_v22 }
 0x136   : > { %v656_v25 = vadd.f32 %v1285_v32, %v655_v23  ;;  %723 = vst [vmem:[%s1292_s30 + $0xe8] sm:$0xff] %v481_v20 }
 0x137   : > { %759 = vst [vmem:[%s1292_s30 + $0x208] sm:$0xff] %v661_v21  ;;  %722 = vst [vmem:[%s1292_s30 + $0xe0] sm:$0xff] %v476_v24  ;;  %v999_v26 = vpop.f32.mrb[30].mxu0 }
 0x138   : > { %758 = vst [vmem:[%s1292_s30 + $0x200] sm:$0xff] %v656_v25  ;;  %v1053_v27 = vpop.f32.mrb[30].mxu1  ;;  %v491_v28 = vadd.f32 %v999_v26, %v1285_v32  ;;  %v485_v30 = vpop.f32.mrb[31].mxu0 }
 0x139   : > { %v671_v29 = vadd.f32 %v1053_v27, %v1285_v32  ;;  %v665_v31 = vpop.f32.mrb[31].mxu1  ;;  %v486_v33 = vadd.f32 %v1285_v32, %v485_v30 }
 0x13a   : > { %v666_v34 = vadd.f32 %v1285_v32, %v665_v31  ;;  %725 = vst [vmem:[%s1292_s30 + $0xf8] sm:$0xff] %v491_v28 }
 0x13b   : > { %761 = vst [vmem:[%s1292_s30 + $0x218] sm:$0xff] %v671_v29  ;;  %724 = vst [vmem:[%s1292_s30 + $0xf0] sm:$0xff] %v486_v33  ;;  %v1002_v35 = vpop.f32.mrb[32].mxu0 }
 0x13c   : > { %760 = vst [vmem:[%s1292_s30 + $0x210] sm:$0xff] %v666_v34  ;;  %v1056_v36 = vpop.f32.mrb[32].mxu1  ;;  %v501_v37 = vadd.f32 %v1002_v35, %v1285_v32  ;;  %v495_v39 = vpop.f32.mrb[33].mxu0 }
 0x13d   : > { %v681_v38 = vadd.f32 %v1056_v36, %v1285_v32  ;;  %v675_v40 = vpop.f32.mrb[33].mxu1  ;;  %v496_v41 = vadd.f32 %v1285_v32, %v495_v39 }
 0x13e   : > { %v676_v42 = vadd.f32 %v1285_v32, %v675_v40  ;;  %727 = vst [vmem:[%s1292_s30 + $0x108] sm:$0xff] %v501_v37 }
 0x13f   : > { %763 = vst [vmem:[%s1292_s30 + $0x228] sm:$0xff] %v681_v38  ;;  %726 = vst [vmem:[%s1292_s30 + $0x100] sm:$0xff] %v496_v41  ;;  %v1005_v43 = vpop.f32.mrb[34].mxu0 }
 0x140   : > { %762 = vst [vmem:[%s1292_s30 + $0x220] sm:$0xff] %v676_v42  ;;  %v1059_v44 = vpop.f32.mrb[34].mxu1  ;;  %v511_v45 = vadd.f32 %v1005_v43, %v1285_v32  ;;  %v505_v47 = vpop.f32.mrb[35].mxu0 }
 0x141   : > { %v691_v46 = vadd.f32 %v1059_v44, %v1285_v32  ;;  %v685_v48 = vpop.f32.mrb[35].mxu1  ;;  %v506_v49 = vadd.f32 %v1285_v32, %v505_v47 }
 0x142   : > { %v686_v50 = vadd.f32 %v1285_v32, %v685_v48  ;;  %729 = vst [vmem:[%s1292_s30 + $0x118] sm:$0xff] %v511_v45 }
 0x143   : > { %765 = vst [vmem:[%s1292_s30 + $0x238] sm:$0xff] %v691_v46  ;;  %728 = vst [vmem:[%s1292_s30 + $0x110] sm:$0xff] %v506_v49 }
 0x144   : > { %764 = vst [vmem:[%s1292_s30 + $0x230] sm:$0xff] %v686_v50 }
 0x145 PF: > { %s13_s12 = sadd.s32 1, %s1122_s12  }
 0x146   : > { %p10_p4 = scmp.ge.s32.totalorder %s13_s12, 4  }
 0x148   :  { %12 = sbr.rel (!%p10_p4) target bundleno = 1 (0x1), region = 62 }

// kernel: net_forward.6
= control target key start
LH: loop header
LB: loop body
LE: loop exit
PB: predicated region body
PF: predicated region fallthrough
CT: control target
= control target key end

     0   :  { %s2441_s0 = inlined_call_operand.vmem [shape: f32[2,12,2,12,256], index: 0, kind: input, shape index: {}, may-alias: {0,1,2,3}]   ;;  %s2442_s1 = inlined_call_operand.vmem [shape: f32[2,12,2,12,256], index: 1, kind: input, shape index: {}, may-alias: {0,1,2,3}]   ;;  %s2443_s2 = inlined_call_operand.vmem [shape: f32[2,12,2,12,256], index: 2, kind: input, shape index: {}, may-alias: {0,1,2,3}]   ;;  %s2444_s3 = inlined_call_operand.vmem [shape: f32[2,12,2,12,256], index: 3, kind: input, shape index: {}, may-alias: {0,1,2,3}]   ;;  %s2445_s4 = inlined_call_operand.vmem [shape: f32[2,12,12,128], index: 4, kind: output, shape index: {}]  }
   0x1   :  { %v1532_v0 = vld [vmem:[%s2441_s0] sm:$0xff]  ;;  %v134_v1 = vld [vmem:[%s2441_s0 + $0x10] sm:$0xff]  ;;  %v1696_v48 = vld [vmem:[%s2442_s1 + $0x8] sm:$0xff] }
   0x2   :  { %v1540_v2 = vld [vmem:[%s2441_s0 + $0x40] sm:$0xff]  ;;  %135 = vst [vmem:[#allocation2 + $0x8] sm:$0xff] %v134_v1  ;;  %v138_v3 = vld [vmem:[%s2441_s0 + $0x50] sm:$0xff]  ;;  %v1361_v49 = vld [vmem:[%s2442_s1 + $0x18] sm:$0xff] }
   0x3   :  { %v1548_v4 = vld [vmem:[%s2441_s0 + $0x80] sm:$0xff]  ;;  %v142_v5 = vld [vmem:[%s2441_s0 + $0x90] sm:$0xff]  ;;  %139 = vst [vmem:[#allocation2 + $0x18] sm:$0xff] %v138_v3  ;;  %v1704_v50 = vld [vmem:[%s2442_s1 + $0x48] sm:$0xff] }
   0x4   :  { %143 = vst [vmem:[#allocation2 + $0x28] sm:$0xff] %v142_v5  ;;  %v1556_v6 = vld [vmem:[%s2441_s0 + $0xc0] sm:$0xff]  ;;  %v146_v7 = vld [vmem:[%s2441_s0 + $0xd0] sm:$0xff]  ;;  %358 = vst [vmem:[#allocation3 + $0x8] sm:$0xff] %v1361_v49 }
   0x5   :  { %v1564_v8 = vld [vmem:[%s2441_s0 + $0x100] sm:$0xff]  ;;  %147 = vst [vmem:[#allocation2 + $0x38] sm:$0xff] %v146_v7  ;;  %v150_v9 = vld [vmem:[%s2441_s0 + $0x110] sm:$0xff]  ;;  %v1363_v51 = vld [vmem:[%s2442_s1 + $0x58] sm:$0xff] }
   0x6   :  { %v1572_v10 = vld [vmem:[%s2441_s0 + $0x140] sm:$0xff]  ;;  %v154_v11 = vld [vmem:[%s2441_s0 + $0x150] sm:$0xff]  ;;  %151 = vst [vmem:[#allocation2 + $0x48] sm:$0xff] %v150_v9  ;;  %v1712_v52 = vld [vmem:[%s2442_s1 + $0x88] sm:$0xff] }
   0x7   :  { %155 = vst [vmem:[#allocation2 + $0x58] sm:$0xff] %v154_v11  ;;  %v1580_v12 = vld [vmem:[%s2441_s0 + $0x180] sm:$0xff]  ;;  %v158_v13 = vld [vmem:[%s2441_s0 + $0x190] sm:$0xff]  ;;  %v1365_v53 = vld [vmem:[%s2442_s1 + $0x98] sm:$0xff] }
   0x8   :  { %v1588_v14 = vld [vmem:[%s2441_s0 + $0x1c0] sm:$0xff]  ;;  %159 = vst [vmem:[#allocation2 + $0x68] sm:$0xff] %v158_v13  ;;  %v162_v15 = vld [vmem:[%s2441_s0 + $0x1d0] sm:$0xff]  ;;  %362 = vst [vmem:[#allocation3 + $0x18] sm:$0xff] %v1363_v51 }
   0x9   :  { %v1596_v16 = vld [vmem:[%s2441_s0 + $0x200] sm:$0xff]  ;;  %v166_v17 = vld [vmem:[%s2441_s0 + $0x210] sm:$0xff]  ;;  %163 = vst [vmem:[#allocation2 + $0x78] sm:$0xff] %v162_v15  ;;  %366 = vst [vmem:[#allocation3 + $0x28] sm:$0xff] %v1365_v53 }
   0xa   :  { %167 = vst [vmem:[#allocation2 + $0x88] sm:$0xff] %v166_v17  ;;  %v1604_v18 = vld [vmem:[%s2441_s0 + $0x240] sm:$0xff]  ;;  %v170_v19 = vld [vmem:[%s2441_s0 + $0x250] sm:$0xff]  ;;  %v1720_v54 = vld [vmem:[%s2442_s1 + $0xc8] sm:$0xff] }
   0xb   :  { %v172_v20 = vld [vmem:[%s2441_s0 + $0x280] sm:$0xff]  ;;  %171 = vst [vmem:[#allocation2 + $0x98] sm:$0xff] %v170_v19  ;;  %v174_v21 = vld [vmem:[%s2441_s0 + $0x290] sm:$0xff]  ;;  %v1367_v55 = vld [vmem:[%s2442_s1 + $0xd8] sm:$0xff] }
   0xc   :  { %173 = vst [vmem:[#allocation2 + $0xa0] sm:$0xff] %v172_v20  ;;  %v176_v22 = vld [vmem:[%s2441_s0 + $0x2c0] sm:$0xff]  ;;  %v178_v23 = vld [vmem:[%s2441_s0 + $0x2d0] sm:$0xff]  ;;  %175 = vst [vmem:[#allocation2 + $0xa8] sm:$0xff] %v174_v21 }
   0xd   :  { %177 = vst [vmem:[#allocation2 + $0xb0] sm:$0xff] %v176_v22  ;;  %179 = vst [vmem:[#allocation2 + $0xb8] sm:$0xff] %v178_v23  ;;  %v180_v24 = vld [vmem:[%s2441_s0 + $0x300] sm:$0xff]  ;;  %v182_v25 = vld [vmem:[%s2441_s0 + $0x310] sm:$0xff] }
   0xe   :  { %v184_v26 = vld [vmem:[%s2441_s0 + $0x340] sm:$0xff]  ;;  %181 = vst [vmem:[#allocation2 + $0xc0] sm:$0xff] %v180_v24  ;;  %183 = vst [vmem:[#allocation2 + $0xc8] sm:$0xff] %v182_v25  ;;  %v186_v27 = vld [vmem:[%s2441_s0 + $0x350] sm:$0xff] }
   0xf   :  { %185 = vst [vmem:[#allocation2 + $0xd0] sm:$0xff] %v184_v26  ;;  %v188_v28 = vld [vmem:[%s2441_s0 + $0x380] sm:$0xff]  ;;  %v190_v29 = vld [vmem:[%s2441_s0 + $0x390] sm:$0xff]  ;;  %187 = vst [vmem:[#allocation2 + $0xd8] sm:$0xff] %v186_v27 }
  0x10   :  { %189 = vst [vmem:[#allocation2 + $0xe0] sm:$0xff] %v188_v28  ;;  %191 = vst [vmem:[#allocation2 + $0xe8] sm:$0xff] %v190_v29  ;;  %v192_v30 = vld [vmem:[%s2441_s0 + $0x3c0] sm:$0xff]  ;;  %v194_v31 = vld [vmem:[%s2441_s0 + $0x3d0] sm:$0xff] }
  0x11   :  { %v196_v32 = vld [vmem:[%s2441_s0 + $0x400] sm:$0xff]  ;;  %193 = vst [vmem:[#allocation2 + $0xf0] sm:$0xff] %v192_v30  ;;  %195 = vst [vmem:[#allocation2 + $0xf8] sm:$0xff] %v194_v31  ;;  %v198_v33 = vld [vmem:[%s2441_s0 + $0x410] sm:$0xff] }
  0x12   :  { %197 = vst [vmem:[#allocation2 + $0x100] sm:$0xff] %v196_v32  ;;  %v200_v34 = vld [vmem:[%s2441_s0 + $0x440] sm:$0xff]  ;;  %v202_v35 = vld [vmem:[%s2441_s0 + $0x450] sm:$0xff]  ;;  %199 = vst [vmem:[#allocation2 + $0x108] sm:$0xff] %v198_v33 }
  0x13   :  { %201 = vst [vmem:[#allocation2 + $0x110] sm:$0xff] %v200_v34  ;;  %203 = vst [vmem:[#allocation2 + $0x118] sm:$0xff] %v202_v35  ;;  %v204_v36 = vld [vmem:[%s2441_s0 + $0x480] sm:$0xff]  ;;  %v206_v37 = vld [vmem:[%s2441_s0 + $0x490] sm:$0xff] }
  0x14   :  { %v208_v38 = vld [vmem:[%s2441_s0 + $0x4c0] sm:$0xff]  ;;  %205 = vst [vmem:[#allocation2 + $0x120] sm:$0xff] %v204_v36  ;;  %207 = vst [vmem:[#allocation2 + $0x128] sm:$0xff] %v206_v37  ;;  %v210_v39 = vld [vmem:[%s2441_s0 + $0x4d0] sm:$0xff] }
  0x15   :  { %209 = vst [vmem:[#allocation2 + $0x130] sm:$0xff] %v208_v38  ;;  %v212_v40 = vld [vmem:[%s2441_s0 + $0x500] sm:$0xff]  ;;  %v214_v41 = vld [vmem:[%s2441_s0 + $0x510] sm:$0xff]  ;;  %211 = vst [vmem:[#allocation2 + $0x138] sm:$0xff] %v210_v39 }
  0x16   :  { %213 = vst [vmem:[#allocation2 + $0x140] sm:$0xff] %v212_v40  ;;  %215 = vst [vmem:[#allocation2 + $0x148] sm:$0xff] %v214_v41  ;;  %v216_v42 = vld [vmem:[%s2441_s0 + $0x540] sm:$0xff]  ;;  %v218_v43 = vld [vmem:[%s2441_s0 + $0x550] sm:$0xff] }
  0x17   :  { %v220_v44 = vld [vmem:[%s2441_s0 + $0x580] sm:$0xff]  ;;  %217 = vst [vmem:[#allocation2 + $0x150] sm:$0xff] %v216_v42  ;;  %219 = vst [vmem:[#allocation2 + $0x158] sm:$0xff] %v218_v43  ;;  %v222_v45 = vld [vmem:[%s2441_s0 + $0x590] sm:$0xff] }
  0x18   :  { %221 = vst [vmem:[#allocation2 + $0x160] sm:$0xff] %v220_v44  ;;  %v224_v46 = vld [vmem:[%s2441_s0 + $0x5c0] sm:$0xff]  ;;  %v226_v47 = vld [vmem:[%s2441_s0 + $0x5d0] sm:$0xff]  ;;  %223 = vst [vmem:[#allocation2 + $0x168] sm:$0xff] %v222_v45 }
  0x19   :  { %225 = vst [vmem:[#allocation2 + $0x170] sm:$0xff] %v224_v46  ;;  %227 = vst [vmem:[#allocation2 + $0x178] sm:$0xff] %v226_v47  ;;  %v1728_v56 = vld [vmem:[%s2442_s1 + $0x108] sm:$0xff]  ;;  %v1369_v57 = vld [vmem:[%s2442_s1 + $0x118] sm:$0xff] }
  0x1a   :  { %370 = vst [vmem:[#allocation3 + $0x38] sm:$0xff] %v1367_v55  ;;  %v1736_v58 = vld [vmem:[%s2442_s1 + $0x148] sm:$0xff]  ;;  %v1371_v59 = vld [vmem:[%s2442_s1 + $0x158] sm:$0xff]  ;;  %374 = vst [vmem:[#allocation3 + $0x48] sm:$0xff] %v1369_v57 }
  0x1b   :  { %378 = vst [vmem:[#allocation3 + $0x58] sm:$0xff] %v1371_v59  ;;  %v1744_v60 = vld [vmem:[%s2442_s1 + $0x188] sm:$0xff]  ;;  %v1373_v61 = vld [vmem:[%s2442_s1 + $0x198] sm:$0xff]  ;;  %v1874_v42 = vld [vmem:[%s2443_s2 + $0x20] sm:$0xff] }
  0x1c   :  { %v1752_v62 = vld [vmem:[%s2442_s1 + $0x1c8] sm:$0xff]  ;;  %382 = vst [vmem:[#allocation3 + $0x68] sm:$0xff] %v1373_v61  ;;  %v1375_v63 = vld [vmem:[%s2442_s1 + $0x1d8] sm:$0xff]  ;;  %v1409_v43 = vld [vmem:[%s2443_s2 + $0x30] sm:$0xff] }
  0x1d   :  { %v1760_v1 = vld [vmem:[%s2442_s1 + $0x208] sm:$0xff]  ;;  %v1377_v3 = vld [vmem:[%s2442_s1 + $0x218] sm:$0xff]  ;;  %386 = vst [vmem:[#allocation3 + $0x78] sm:$0xff] %v1375_v63  ;;  %v1882_v44 = vld [vmem:[%s2443_s2 + $0x60] sm:$0xff] }
  0x1e   :  { %390 = vst [vmem:[#allocation3 + $0x88] sm:$0xff] %v1377_v3  ;;  %v1768_v5 = vld [vmem:[%s2442_s1 + $0x248] sm:$0xff]  ;;  %v1379_v7 = vld [vmem:[%s2442_s1 + $0x258] sm:$0xff]  ;;  %581 = vst [vmem:[#allocation4 + $0x8] sm:$0xff] %v1409_v43 }
  0x1f   :  { %v1776_v9 = vld [vmem:[%s2442_s1 + $0x288] sm:$0xff]  ;;  %394 = vst [vmem:[#allocation3 + $0x98] sm:$0xff] %v1379_v7  ;;  %v1381_v11 = vld [vmem:[%s2442_s1 + $0x298] sm:$0xff]  ;;  %v1411_v45 = vld [vmem:[%s2443_s2 + $0x70] sm:$0xff] }
  0x20   :  { %v1784_v13 = vld [vmem:[%s2442_s1 + $0x2c8] sm:$0xff]  ;;  %v1383_v15 = vld [vmem:[%s2442_s1 + $0x2d8] sm:$0xff]  ;;  %398 = vst [vmem:[#allocation3 + $0xa8] sm:$0xff] %v1381_v11  ;;  %v1890_v46 = vld [vmem:[%s2443_s2 + $0xa0] sm:$0xff] }
  0x21   :  { %402 = vst [vmem:[#allocation3 + $0xb8] sm:$0xff] %v1383_v15  ;;  %v1792_v17 = vld [vmem:[%s2442_s1 + $0x308] sm:$0xff]  ;;  %v1385_v19 = vld [vmem:[%s2442_s1 + $0x318] sm:$0xff]  ;;  %v1413_v47 = vld [vmem:[%s2443_s2 + $0xb0] sm:$0xff] }
  0x22   :  { %v1800_v20 = vld [vmem:[%s2442_s1 + $0x348] sm:$0xff]  ;;  %406 = vst [vmem:[#allocation3 + $0xc8] sm:$0xff] %v1385_v19  ;;  %v1387_v21 = vld [vmem:[%s2442_s1 + $0x358] sm:$0xff]  ;;  %585 = vst [vmem:[#allocation4 + $0x18] sm:$0xff] %v1411_v45 }
  0x23   :  { %v1808_v22 = vld [vmem:[%s2442_s1 + $0x388] sm:$0xff]  ;;  %v1389_v23 = vld [vmem:[%s2442_s1 + $0x398] sm:$0xff]  ;;  %410 = vst [vmem:[#allocation3 + $0xd8] sm:$0xff] %v1387_v21  ;;  %589 = vst [vmem:[#allocation4 + $0x28] sm:$0xff] %v1413_v47 }
  0x24   :  { %414 = vst [vmem:[#allocation3 + $0xe8] sm:$0xff] %v1389_v23  ;;  %v1816_v24 = vld [vmem:[%s2442_s1 + $0x3c8] sm:$0xff]  ;;  %v1391_v25 = vld [vmem:[%s2442_s1 + $0x3d8] sm:$0xff]  ;;  %v1898_v49 = vld [vmem:[%s2443_s2 + $0xe0] sm:$0xff] }
  0x25   :  { %v1824_v26 = vld [vmem:[%s2442_s1 + $0x408] sm:$0xff]  ;;  %418 = vst [vmem:[#allocation3 + $0xf8] sm:$0xff] %v1391_v25  ;;  %v1393_v27 = vld [vmem:[%s2442_s1 + $0x418] sm:$0xff]  ;;  %v1415_v51 = vld [vmem:[%s2443_s2 + $0xf0] sm:$0xff] }
  0x26   :  { %v1394_v28 = vld [vmem:[%s2442_s1 + $0x448] sm:$0xff]  ;;  %v1395_v29 = vld [vmem:[%s2442_s1 + $0x458] sm:$0xff]  ;;  %422 = vst [vmem:[#allocation3 + $0x108] sm:$0xff] %v1393_v27  ;;  %v1906_v53 = vld [vmem:[%s2443_s2 + $0x120] sm:$0xff] }
  0x27   :  { %424 = vst [vmem:[#allocation3 + $0x110] sm:$0xff] %v1394_v28  ;;  %426 = vst [vmem:[#allocation3 + $0x118] sm:$0xff] %v1395_v29  ;;  %v1396_v30 = vld [vmem:[%s2442_s1 + $0x488] sm:$0xff]  ;;  %v1397_v31 = vld [vmem:[%s2442_s1 + $0x498] sm:$0xff] }
  0x28   :  { %v1398_v32 = vld [vmem:[%s2442_s1 + $0x4c8] sm:$0xff]  ;;  %428 = vst [vmem:[#allocation3 + $0x120] sm:$0xff] %v1396_v30  ;;  %430 = vst [vmem:[#allocation3 + $0x128] sm:$0xff] %v1397_v31  ;;  %v1399_v33 = vld [vmem:[%s2442_s1 + $0x4d8] sm:$0xff] }
  0x29   :  { %432 = vst [vmem:[#allocation3 + $0x130] sm:$0xff] %v1398_v32  ;;  %v1400_v34 = vld [vmem:[%s2442_s1 + $0x508] sm:$0xff]  ;;  %v1401_v35 = vld [vmem:[%s2442_s1 + $0x518] sm:$0xff]  ;;  %434 = vst [vmem:[#allocation3 + $0x138] sm:$0xff] %v1399_v33 }
  0x2a   :  { %436 = vst [vmem:[#allocation3 + $0x140] sm:$0xff] %v1400_v34  ;;  %438 = vst [vmem:[#allocation3 + $0x148] sm:$0xff] %v1401_v35  ;;  %v1402_v36 = vld [vmem:[%s2442_s1 + $0x548] sm:$0xff]  ;;  %v1403_v37 = vld [vmem:[%s2442_s1 + $0x558] sm:$0xff] }
  0x2b   :  { %v1404_v38 = vld [vmem:[%s2442_s1 + $0x588] sm:$0xff]  ;;  %440 = vst [vmem:[#allocation3 + $0x150] sm:$0xff] %v1402_v36  ;;  %442 = vst [vmem:[#allocation3 + $0x158] sm:$0xff] %v1403_v37  ;;  %v1405_v39 = vld [vmem:[%s2442_s1 + $0x598] sm:$0xff] }
  0x2c   :  { %444 = vst [vmem:[#allocation3 + $0x160] sm:$0xff] %v1404_v38  ;;  %v1406_v40 = vld [vmem:[%s2442_s1 + $0x5c8] sm:$0xff]  ;;  %v1407_v41 = vld [vmem:[%s2442_s1 + $0x5d8] sm:$0xff]  ;;  %446 = vst [vmem:[#allocation3 + $0x168] sm:$0xff] %v1405_v39 }
  0x2d   :  { %448 = vst [vmem:[#allocation3 + $0x170] sm:$0xff] %v1406_v40  ;;  %450 = vst [vmem:[#allocation3 + $0x178] sm:$0xff] %v1407_v41  ;;  %v1417_v55 = vld [vmem:[%s2443_s2 + $0x130] sm:$0xff]  ;;  %v1914_v57 = vld [vmem:[%s2443_s2 + $0x160] sm:$0xff] }
  0x2e   :  { %593 = vst [vmem:[#allocation4 + $0x38] sm:$0xff] %v1415_v51  ;;  %v1419_v59 = vld [vmem:[%s2443_s2 + $0x170] sm:$0xff]  ;;  %597 = vst [vmem:[#allocation4 + $0x48] sm:$0xff] %v1417_v55  ;;  %v1922_v61 = vld [vmem:[%s2443_s2 + $0x1a0] sm:$0xff] }
  0x2f   :  { %601 = vst [vmem:[#allocation4 + $0x58] sm:$0xff] %v1419_v59  ;;  %v1421_v63 = vld [vmem:[%s2443_s2 + $0x1b0] sm:$0xff]  ;;  %v1930_v3 = vld [vmem:[%s2443_s2 + $0x1e0] sm:$0xff] }
  0x30   :  { %605 = vst [vmem:[#allocation4 + $0x68] sm:$0xff] %v1421_v63  ;;  %v1423_v7 = vld [vmem:[%s2443_s2 + $0x1f0] sm:$0xff]  ;;  %v1938_v11 = vld [vmem:[%s2443_s2 + $0x220] sm:$0xff] }
  0x31   :  { %v1425_v15 = vld [vmem:[%s2443_s2 + $0x230] sm:$0xff]  ;;  %609 = vst [vmem:[#allocation4 + $0x78] sm:$0xff] %v1423_v7  ;;  %v1946_v19 = vld [vmem:[%s2443_s2 + $0x260] sm:$0xff] }
  0x32   :  { %613 = vst [vmem:[#allocation4 + $0x88] sm:$0xff] %v1425_v15  ;;  %v1427_v21 = vld [vmem:[%s2443_s2 + $0x270] sm:$0xff]  ;;  %v1954_v23 = vld [vmem:[%s2443_s2 + $0x2a0] sm:$0xff] }
  0x33   :  { %617 = vst [vmem:[#allocation4 + $0x98] sm:$0xff] %v1427_v21  ;;  %v1429_v25 = vld [vmem:[%s2443_s2 + $0x2b0] sm:$0xff]  ;;  %v1962_v27 = vld [vmem:[%s2443_s2 + $0x2e0] sm:$0xff] }
  0x34   :  { %v1431_v28 = vld [vmem:[%s2443_s2 + $0x2f0] sm:$0xff]  ;;  %621 = vst [vmem:[#allocation4 + $0xa8] sm:$0xff] %v1429_v25  ;;  %v1970_v29 = vld [vmem:[%s2443_s2 + $0x320] sm:$0xff] }
  0x35   :  { %625 = vst [vmem:[#allocation4 + $0xb8] sm:$0xff] %v1431_v28  ;;  %v1433_v30 = vld [vmem:[%s2443_s2 + $0x330] sm:$0xff]  ;;  %v1978_v31 = vld [vmem:[%s2443_s2 + $0x360] sm:$0xff]  ;;  %v1004_v28 = vmax.f32 %v1532_v0, %v1696_v48  ;;  %v1008_v0 = vmax.f32 %v1548_v4, %v1712_v52  ;;  %v1460_v48 = vld [vmem:[%s2444_s3 + $0xa8] sm:$0xff]  ;;  %v1010_v4 = vmax.f32 %v1556_v6, %v1720_v54  ;;  %v1012_v52 = vmax.f32 %v1564_v8, %v1728_v56 }
  0x36   :  { %629 = vst [vmem:[#allocation4 + $0xc8] sm:$0xff] %v1433_v30  ;;  %v1435_v32 = vld [vmem:[%s2443_s2 + $0x370] sm:$0xff]  ;;  %v1986_v33 = vld [vmem:[%s2443_s2 + $0x3a0] sm:$0xff]  ;;  %v1006_v30 = vmax.f32 %v1540_v2, %v1704_v50  ;;  %v1459_v2 = vld [vmem:[%s2444_s3 + $0x78] sm:$0xff]  ;;  %v1014_v6 = vmax.f32 %v1572_v10, %v1736_v58  ;;  %v1016_v8 = vmax.f32 %v1580_v12, %v1744_v60  ;;  %v1018_v54 = vmax.f32 %v1588_v14, %v1752_v62 }
  0x37   :  { %v1437_v34 = vld [vmem:[%s2443_s2 + $0x3b0] sm:$0xff]  ;;  %633 = vst [vmem:[#allocation4 + $0xd8] sm:$0xff] %v1435_v32  ;;  %v1994_v35 = vld [vmem:[%s2443_s2 + $0x3e0] sm:$0xff]  ;;  %v1456_v32 = vld [vmem:[%s2444_s3 + $0x28] sm:$0xff] }
  0x38   :  { %637 = vst [vmem:[#allocation4 + $0xe8] sm:$0xff] %v1437_v34  ;;  %v1439_v36 = vld [vmem:[%s2443_s2 + $0x3f0] sm:$0xff]  ;;  %v2002_v37 = vld [vmem:[%s2443_s2 + $0x420] sm:$0xff]  ;;  %v1457_v34 = vld [vmem:[%s2444_s3 + $0x38] sm:$0xff] }
  0x39   :  { %641 = vst [vmem:[#allocation4 + $0xf8] sm:$0xff] %v1439_v36  ;;  %v1441_v38 = vld [vmem:[%s2443_s2 + $0x430] sm:$0xff]  ;;  %v2010_v39 = vld [vmem:[%s2443_s2 + $0x460] sm:$0xff]  ;;  %v1458_v36 = vld [vmem:[%s2444_s3 + $0x68] sm:$0xff] }
  0x3a   :  { %v1443_v40 = vld [vmem:[%s2443_s2 + $0x470] sm:$0xff]  ;;  %645 = vst [vmem:[#allocation4 + $0x108] sm:$0xff] %v1441_v38  ;;  %v2018_v41 = vld [vmem:[%s2443_s2 + $0x4a0] sm:$0xff]  ;;  %804 = vst [vmem:[#allocation5 + $0x8] sm:$0xff] %v1457_v34  ;;  %v1148_v38 = vmax.f32 %v1874_v42, %v1456_v32 }
  0x3b   :  { %649 = vst [vmem:[#allocation4 + $0x118] sm:$0xff] %v1443_v40  ;;  %v1445_v43 = vld [vmem:[%s2443_s2 + $0x4b0] sm:$0xff]  ;;  %v2026_v45 = vld [vmem:[%s2443_s2 + $0x4e0] sm:$0xff]  ;;  %v1461_v50 = vld [vmem:[%s2444_s3 + $0xb8] sm:$0xff]  ;;  %v1150_v40 = vmax.f32 %v1882_v44, %v1458_v36  ;;  %v1152_v44 = vmax.f32 %v1890_v46, %v1460_v48 }
  0x3c   :  { %653 = vst [vmem:[#allocation4 + $0x128] sm:$0xff] %v1445_v43  ;;  %v1447_v47 = vld [vmem:[%s2443_s2 + $0x4f0] sm:$0xff]  ;;  %v2034_v51 = vld [vmem:[%s2443_s2 + $0x520] sm:$0xff]  ;;  %808 = vst [vmem:[#allocation5 + $0x18] sm:$0xff] %v1459_v2  ;;  %v1196_v10 = vmax.f32 %v1004_v28, %v1148_v38 }
  0x3d   :  { %v1449_v55 = vld [vmem:[%s2443_s2 + $0x530] sm:$0xff]  ;;  %657 = vst [vmem:[#allocation4 + $0x138] sm:$0xff] %v1447_v47  ;;  %v2042_v59 = vld [vmem:[%s2443_s2 + $0x560] sm:$0xff]  ;;  %812 = vst [vmem:[#allocation5 + $0x28] sm:$0xff] %v1461_v50  ;;  %v1198_v58 = vmax.f32 %v1006_v30, %v1150_v40 }
  0x3e   :  { %661 = vst [vmem:[#allocation4 + $0x148] sm:$0xff] %v1449_v55  ;;  %v1451_v63 = vld [vmem:[%s2443_s2 + $0x570] sm:$0xff]  ;;  %v2050_v7 = vld [vmem:[%s2443_s2 + $0x5a0] sm:$0xff]  ;;  %v1462_v43 = vld [vmem:[%s2444_s3 + $0xe8] sm:$0xff] }
  0x3f   :  { %665 = vst [vmem:[#allocation4 + $0x158] sm:$0xff] %v1451_v63  ;;  %v1453_v15 = vld [vmem:[%s2443_s2 + $0x5b0] sm:$0xff]  ;;  %v1454_v21 = vld [vmem:[%s2443_s2 + $0x5e0] sm:$0xff]  ;;  %v1463_v47 = vld [vmem:[%s2444_s3 + $0xf8] sm:$0xff]  ;;  %v1154_v12 = vmax.f32 %v1898_v49, %v1462_v43  ;;  %v1020_v49 = vmax.f32 %v1596_v16, %v1760_v1  ;;  %v1246_v32 = vmax.f32 %v1198_v58, 0.0 }
  0x40   :  { %v1455_v25 = vld [vmem:[%s2443_s2 + $0x5f0] sm:$0xff]  ;;  %669 = vst [vmem:[#allocation4 + $0x168] sm:$0xff] %v1453_v15  ;;  %671 = vst [vmem:[#allocation4 + $0x170] sm:$0xff] %v1454_v21  ;;  %v1464_v42 = vld [vmem:[%s2444_s3 + $0x128] sm:$0xff]  ;;  %v1200_v15 = vmax.f32 %v1008_v0, %v1152_v44 }
  0x41   :  { %673 = vst [vmem:[#allocation4 + $0x178] sm:$0xff] %v1455_v25  ;;  %816 = vst [vmem:[#allocation5 + $0x38] sm:$0xff] %v1463_v47  ;;  %v1465_v56 = vld [vmem:[%s2444_s3 + $0x138] sm:$0xff]  ;;  %v1466_v55 = vld [vmem:[%s2444_s3 + $0x168] sm:$0xff]  ;;  %v1156_v60 = vmax.f32 %v1906_v53, %v1464_v42  ;;  %v1022_v53 = vmax.f32 %v1604_v18, %v1768_v5  ;;  %v1202_v34 = vmax.f32 %v1010_v4, %v1154_v12 }
  0x42   :  { %v1467_v46 = vld [vmem:[%s2444_s3 + $0x178] sm:$0xff]  ;;  %820 = vst [vmem:[#allocation5 + $0x48] sm:$0xff] %v1465_v56  ;;  %v1468_v14 = vld [vmem:[%s2444_s3 + $0x1a8] sm:$0xff]  ;;  %v1158_v21 = vmax.f32 %v1914_v57, %v1466_v55  ;;  %v1244_v57 = vmax.f32 %v1196_v10, 0.0  ;;  %v1248_v36 = vmax.f32 %v1200_v15, 0.0  ;;  %1294 = vst [vmem:[%s2445_s4 + $0x10] sm:$0xff] %v1246_v32 }
  0x43   :  { %824 = vst [vmem:[#allocation5 + $0x58] sm:$0xff] %v1467_v46  ;;  %v1469_v62 = vld [vmem:[%s2444_s3 + $0x1b8] sm:$0xff]  ;;  %v1470_v63 = vld [vmem:[%s2444_s3 + $0x1e8] sm:$0xff]  ;;  %v1204_v16 = vmax.f32 %v1012_v52, %v1156_v60  ;;  %v1160_v2 = vmax.f32 %v1922_v61, %v1468_v14  ;;  %v1250_v61 = vmax.f32 %v1202_v34, 0.0 }
  0x44   :  { %828 = vst [vmem:[#allocation5 + $0x68] sm:$0xff] %v1469_v62  ;;  %v1471_v25 = vld [vmem:[%s2444_s3 + $0x1f8] sm:$0xff]  ;;  %v1472_v28 = vld [vmem:[%s2444_s3 + $0x228] sm:$0xff]  ;;  %v1206_v0 = vmax.f32 %v1014_v6, %v1158_v21  ;;  %v1162_v48 = vmax.f32 %v1930_v3, %v1470_v63  ;;  %1292 = vst [vmem:[%s2445_s4] sm:$0xff] %v1244_v57 }
  0x45   :  { %v1473_v30 = vld [vmem:[%s2444_s3 + $0x238] sm:$0xff]  ;;  %832 = vst [vmem:[#allocation5 + $0x78] sm:$0xff] %v1471_v25  ;;  %v1474_v18 = vld [vmem:[%s2444_s3 + $0x268] sm:$0xff]  ;;  %v1252_v3 = vmax.f32 %v1204_v16, 0.0  ;;  %v1164_v4 = vmax.f32 %v1938_v11, %v1472_v28  ;;  %1296 = vst [vmem:[%s2445_s4 + $0x20] sm:$0xff] %v1248_v36 }
  0x46   :  { %836 = vst [vmem:[#allocation5 + $0x88] sm:$0xff] %v1473_v30  ;;  %v1475_v1 = vld [vmem:[%s2444_s3 + $0x278] sm:$0xff]  ;;  %v2150_v5 = vld [vmem:[%s2444_s3 + $0x2a8] sm:$0xff]  ;;  %v1166_v52 = vmax.f32 %v1946_v19, %v1474_v18  ;;  %v1254_v11 = vmax.f32 %v1206_v0, 0.0  ;;  %v1208_v19 = vmax.f32 %v1016_v8, %v1160_v2  ;;  %v1210_v44 = vmax.f32 %v1018_v54, %v1162_v48  ;;  %1298 = vst [vmem:[%s2445_s4 + $0x30] sm:$0xff] %v1250_v61 }
  0x47   :  { %840 = vst [vmem:[#allocation5 + $0x98] sm:$0xff] %v1475_v1  ;;  %v1477_v50 = vld [vmem:[%s2444_s3 + $0x2b8] sm:$0xff]  ;;  %v2160_v38 = vld [vmem:[%s2444_s3 + $0x2e8] sm:$0xff]  ;;  %1300 = vst [vmem:[%s2445_s4 + $0x40] sm:$0xff] %v1252_v3  ;;  %v1212_v8 = vmax.f32 %v1020_v49, %v1164_v4 }
  0x48   :  { %v1479_v40 = vld [vmem:[%s2444_s3 + $0x2f8] sm:$0xff]  ;;  %844 = vst [vmem:[#allocation5 + $0xa8] sm:$0xff] %v1477_v50  ;;  %v2176_v43 = vld [vmem:[%s2444_s3 + $0x328] sm:$0xff]  ;;  %v1214_v54 = vmax.f32 %v1022_v53, %v1166_v52  ;;  %1302 = vst [vmem:[%s2445_s4 + $0x50] sm:$0xff] %v1254_v11  ;;  %v1256_v12 = vmax.f32 %v1208_v19, 0.0  ;;  %v1258_v60 = vmax.f32 %v1210_v44, 0.0 }
  0x49   :  { %848 = vst [vmem:[#allocation5 + $0xb8] sm:$0xff] %v1479_v40  ;;  %v1481_v47 = vld [vmem:[%s2444_s3 + $0x338] sm:$0xff]  ;;  %v2184_v42 = vld [vmem:[%s2444_s3 + $0x368] sm:$0xff]  ;;  %v1260_v15 = vmax.f32 %v1212_v8, 0.0 }
  0x4a   :  { %852 = vst [vmem:[#allocation5 + $0xc8] sm:$0xff] %v1481_v47  ;;  %v1483_v6 = vld [vmem:[%s2444_s3 + $0x378] sm:$0xff]  ;;  %v2195_v56 = vld [vmem:[%s2444_s3 + $0x3a8] sm:$0xff]  ;;  %v1262_v21 = vmax.f32 %v1214_v54, 0.0  ;;  %1304 = vst [vmem:[%s2445_s4 + $0x60] sm:$0xff] %v1256_v12 }
  0x4b   :  { %v1485_v55 = vld [vmem:[%s2444_s3 + $0x3b8] sm:$0xff]  ;;  %856 = vst [vmem:[#allocation5 + $0xd8] sm:$0xff] %v1483_v6  ;;  %v2209_v46 = vld [vmem:[%s2444_s3 + $0x3e8] sm:$0xff]  ;;  %1306 = vst [vmem:[%s2445_s4 + $0x70] sm:$0xff] %v1258_v60 }
  0x4c   :  { %860 = vst [vmem:[#allocation5 + $0xe8] sm:$0xff] %v1485_v55  ;;  %v1487_v10 = vld [vmem:[%s2444_s3 + $0x3f8] sm:$0xff]  ;;  %v2217_v58 = vld [vmem:[%s2444_s3 + $0x428] sm:$0xff]  ;;  %1308 = vst [vmem:[%s2445_s4 + $0x80] sm:$0xff] %v1260_v15 }
  0x4d   :  { %864 = vst [vmem:[#allocation5 + $0xf8] sm:$0xff] %v1487_v10  ;;  %v1489_v14 = vld [vmem:[%s2444_s3 + $0x438] sm:$0xff]  ;;  %v2228_v62 = vld [vmem:[%s2444_s3 + $0x468] sm:$0xff]  ;;  %1310 = vst [vmem:[%s2445_s4 + $0x90] sm:$0xff] %v1262_v21 }
  0x4e   :  { %v1491_v63 = vld [vmem:[%s2444_s3 + $0x478] sm:$0xff]  ;;  %868 = vst [vmem:[#allocation5 + $0x108] sm:$0xff] %v1489_v14  ;;  %v2236_v49 = vld [vmem:[%s2444_s3 + $0x4a8] sm:$0xff] }
  0x4f   :  { %872 = vst [vmem:[#allocation5 + $0x118] sm:$0xff] %v1491_v63  ;;  %v1493_v53 = vld [vmem:[%s2444_s3 + $0x4b8] sm:$0xff]  ;;  %v2244_v25 = vld [vmem:[%s2444_s3 + $0x4e8] sm:$0xff] }
  0x50   :  { %876 = vst [vmem:[#allocation5 + $0x128] sm:$0xff] %v1493_v53  ;;  %v1495_v28 = vld [vmem:[%s2444_s3 + $0x4f8] sm:$0xff]  ;;  %v2258_v30 = vld [vmem:[%s2444_s3 + $0x528] sm:$0xff] }
  0x51   :  { %v1497_v57 = vld [vmem:[%s2444_s3 + $0x538] sm:$0xff]  ;;  %880 = vst [vmem:[#allocation5 + $0x138] sm:$0xff] %v1495_v28  ;;  %v2272_v32 = vld [vmem:[%s2444_s3 + $0x568] sm:$0xff] }
  0x52   :  { %884 = vst [vmem:[#allocation5 + $0x148] sm:$0xff] %v1497_v57  ;;  %v1499_v34 = vld [vmem:[%s2444_s3 + $0x578] sm:$0xff]  ;;  %v2280_v16 = vld [vmem:[%s2444_s3 + $0x5a8] sm:$0xff] }
  0x53   :  { %888 = vst [vmem:[#allocation5 + $0x158] sm:$0xff] %v1499_v34  ;;  %v1501_v18 = vld [vmem:[%s2444_s3 + $0x5b8] sm:$0xff]  ;;  %v2288_v1 = vld [vmem:[%s2444_s3 + $0x5e8] sm:$0xff]  ;;  %v1168_v34 = vmax.f32 %v1954_v23, %v2150_v5  ;;  %v1172_v23 = vmax.f32 %v1970_v29, %v2176_v43 }
  0x54   :  { %v1503_v36 = vld [vmem:[%s2444_s3 + $0x5f8] sm:$0xff]  ;;  %892 = vst [vmem:[#allocation5 + $0x168] sm:$0xff] %v1501_v18  ;;  %v909_v0 = vld [vmem:[#allocation2 + $0x8] sm:$0xf]  ;;  %v1170_v18 = vmax.f32 %v1962_v27, %v2160_v38 }
  0x55   :  { %896 = vst [vmem:[#allocation5 + $0x178] sm:$0xff] %v1503_v36  ;;  %v957_v2 = vld [vmem:[#allocation3 + $0x8] sm:$0xf]  ;;  %v911_v61 = vld [vmem:[#allocation2 + $0x18] sm:$0xf] }
  0x56   :  { %v1053_v48 = vld [vmem:[#allocation4 + $0x8] sm:$0xf]  ;;  %v1005_v50 = vmax.f32 %v909_v0, %v957_v2  ;;  %v959_v3 = vld [vmem:[#allocation3 + $0x18] sm:$0xf] }
  0x57   :  { %v1101_v40 = vld [vmem:[#allocation5 + $0x8] sm:$0xf]  ;;  %v1007_v52 = vmax.f32 %v911_v61, %v959_v3  ;;  %v1055_v47 = vld [vmem:[#allocation4 + $0x18] sm:$0xf]  ;;  %v928_v61 = vld [vmem:[#allocation2 + $0xa0] sm:$0xff] }
  0x58   :  { %v1149_v4 = vmax.f32 %v1053_v48, %v1101_v40  ;;  %v1103_v11 = vld [vmem:[#allocation5 + $0x18] sm:$0xf]  ;;  %v913_v19 = vld [vmem:[#allocation2 + $0x28] sm:$0xf] }
  0x59   :  { %v1151_v44 = vmax.f32 %v1055_v47, %v1103_v11  ;;  %v961_v6 = vld [vmem:[#allocation3 + $0x28] sm:$0xf]  ;;  %v915_v60 = vld [vmem:[#allocation2 + $0x38] sm:$0xf]  ;;  %v1024_v11 = vmax.f32 %v928_v61, %v1776_v9 }
  0x5a   :  { %v1057_v55 = vld [vmem:[#allocation4 + $0x28] sm:$0xf]  ;;  %v1197_v54 = vmax.f32 %v1005_v50, %v1149_v4  ;;  %v1009_v10 = vmax.f32 %v913_v19, %v961_v6  ;;  %v963_v14 = vld [vmem:[#allocation3 + $0x38] sm:$0xf]  ;;  %v930_v19 = vld [vmem:[#allocation2 + $0xb0] sm:$0xff] }
  0x5b   :  { %v1105_v8 = vld [vmem:[#allocation5 + $0x28] sm:$0xf]  ;;  %v1059_v63 = vld [vmem:[#allocation4 + $0x38] sm:$0xf]  ;;  %v1199_v15 = vmax.f32 %v1007_v52, %v1151_v44  ;;  %v1011_v21 = vmax.f32 %v915_v60, %v963_v14 }
  0x5c   :  { %v1153_v12 = vmax.f32 %v1057_v55, %v1105_v8  ;;  %v1107_v53 = vld [vmem:[#allocation5 + $0x38] sm:$0xf]  ;;  %v917_v28 = vld [vmem:[#allocation2 + $0x48] sm:$0xf]  ;;  %v1245_v36 = vmax.f32 %v1197_v54, 0.0  ;;  %v1026_v55 = vmax.f32 %v930_v19, %v1784_v13  ;;  %v932_v8 = vld [vmem:[#allocation2 + $0xc0] sm:$0xff] }
  0x5d   :  { %v965_v57 = vld [vmem:[#allocation3 + $0x48] sm:$0xf]  ;;  %v1155_v2 = vmax.f32 %v1059_v63, %v1107_v53  ;;  %v1247_v3 = vmax.f32 %v1199_v15, 0.0  ;;  %v919_v52 = vld [vmem:[#allocation2 + $0x58] sm:$0xf]  ;;  %v1028_v60 = vmax.f32 %v932_v8, %v1792_v17  ;;  %v934_v53 = vld [vmem:[#allocation2 + $0xd0] sm:$0xff] }
  0x5e   :  { %v1201_v0 = vmax.f32 %v1009_v10, %v1153_v12  ;;  %v1013_v48 = vmax.f32 %v917_v28, %v965_v57  ;;  %v1061_v50 = vld [vmem:[#allocation4 + $0x48] sm:$0xf]  ;;  %v967_v47 = vld [vmem:[#allocation3 + $0x58] sm:$0xf]  ;;  %1293 = vst [vmem:[%s2445_s4 + $0x8] sm:$0xf] %v1245_v36  ;;  %v1216_v12 = vmax.f32 %v1024_v11, %v1168_v34  ;;  %v1174_v28 = vmax.f32 %v1978_v31, %v2184_v42 }
  0x5f   :  { %v1109_v40 = vld [vmem:[#allocation5 + $0x48] sm:$0xf]  ;;  %v1203_v5 = vmax.f32 %v1011_v21, %v1155_v2  ;;  %v1015_v38 = vmax.f32 %v919_v52, %v967_v47  ;;  %v1063_v44 = vld [vmem:[#allocation4 + $0x58] sm:$0xf]  ;;  %1295 = vst [vmem:[%s2445_s4 + $0x18] sm:$0xf] %v1247_v3  ;;  %v1218_v21 = vmax.f32 %v1026_v55, %v1170_v18  ;;  %v1220_v3 = vmax.f32 %v1028_v60, %v1172_v23 }
  0x60   :  { %v1157_v4 = vmax.f32 %v1061_v50, %v1109_v40  ;;  %v1249_v27 = vmax.f32 %v1201_v0, 0.0  ;;  %v1111_v6 = vld [vmem:[#allocation5 + $0x58] sm:$0xf]  ;;  %v921_v10 = vld [vmem:[#allocation2 + $0x68] sm:$0xf]  ;;  %v1030_v18 = vmax.f32 %v934_v53, %v1800_v20  ;;  %v1176_v31 = vmax.f32 %v1986_v33, %v2195_v56  ;;  %v936_v23 = vld [vmem:[#allocation2 + $0xe0] sm:$0xff] }
  0x61   :  { %v1159_v54 = vmax.f32 %v1063_v44, %v1111_v6  ;;  %v969_v29 = vld [vmem:[#allocation3 + $0x68] sm:$0xf]  ;;  %v1251_v14 = vmax.f32 %v1203_v5, 0.0  ;;  %v923_v15 = vld [vmem:[#allocation2 + $0x78] sm:$0xf]  ;;  %v1032_v56 = vmax.f32 %v936_v23, %v1808_v22 }
  0x62   :  { %v1205_v9 = vmax.f32 %v1013_v48, %v1157_v4  ;;  %v1065_v43 = vld [vmem:[#allocation4 + $0x68] sm:$0xf]  ;;  %1297 = vst [vmem:[%s2445_s4 + $0x28] sm:$0xf] %v1249_v27  ;;  %v1017_v63 = vmax.f32 %v921_v10, %v969_v29  ;;  %v971_v2 = vld [vmem:[#allocation3 + $0x78] sm:$0xf]  ;;  %v1222_v33 = vmax.f32 %v1030_v18, %v1174_v28 }
  0x63   :  { %v1113_v13 = vld [vmem:[#allocation5 + $0x68] sm:$0xf]  ;;  %v1207_v36 = vmax.f32 %v1015_v38, %v1159_v54  ;;  %v1067_v34 = vld [vmem:[#allocation4 + $0x78] sm:$0xf]  ;;  %v1264_v48 = vmax.f32 %v1216_v12, 0.0  ;;  %v1019_v17 = vmax.f32 %v923_v15, %v971_v2  ;;  %v1266_v54 = vmax.f32 %v1218_v21, 0.0 }
  0x64   :  { %v1253_v57 = vmax.f32 %v1205_v9, 0.0  ;;  %v1161_v0 = vmax.f32 %v1065_v43, %v1113_v13  ;;  %1299 = vst [vmem:[%s2445_s4 + $0x38] sm:$0xf] %v1251_v14  ;;  %v1115_v50 = vld [vmem:[#allocation5 + $0x78] sm:$0xf]  ;;  %v1224_v14 = vmax.f32 %v1032_v56, %v1176_v31  ;;  %v1268_v21 = vmax.f32 %v1220_v3, 0.0 }
  0x65   :  { %v925_v40 = vld [vmem:[#allocation2 + $0x88] sm:$0xf]  ;;  %v1255_v42 = vmax.f32 %v1207_v36, 0.0  ;;  %v1163_v52 = vmax.f32 %v1067_v34, %v1115_v50  ;;  %1312 = vst [vmem:[%s2445_s4 + $0xa0] sm:$0xff] %v1264_v48  ;;  %v927_v20 = vld [vmem:[#allocation2 + $0x98] sm:$0xf] }
  0x66   :  { %v973_v61 = vld [vmem:[#allocation3 + $0x88] sm:$0xf]  ;;  %1301 = vst [vmem:[%s2445_s4 + $0x48] sm:$0xf] %v1253_v57  ;;  %v1209_v4 = vmax.f32 %v1017_v63, %v1161_v0  ;;  %v975_v5 = vld [vmem:[#allocation3 + $0x98] sm:$0xf] }
  0x67   :  { %v1021_v47 = vmax.f32 %v925_v40, %v973_v61  ;;  %v1069_v11 = vld [vmem:[#allocation4 + $0x88] sm:$0xf]  ;;  %v1071_v38 = vld [vmem:[#allocation4 + $0x98] sm:$0xf]  ;;  %1303 = vst [vmem:[%s2445_s4 + $0x58] sm:$0xf] %v1255_v42  ;;  %v1211_v6 = vmax.f32 %v1019_v17, %v1163_v52  ;;  %v1023_v55 = vmax.f32 %v927_v20, %v975_v5  ;;  %v1178_v52 = vmax.f32 %v1994_v35, %v2209_v46 }
  0x68   :  { %v1117_v19 = vld [vmem:[#allocation5 + $0x88] sm:$0xf]  ;;  %v1257_v44 = vmax.f32 %v1209_v4, 0.0  ;;  %v1119_v8 = vld [vmem:[#allocation5 + $0x98] sm:$0xf]  ;;  %1314 = vst [vmem:[%s2445_s4 + $0xb0] sm:$0xff] %v1266_v54  ;;  %v1180_v46 = vmax.f32 %v2002_v37, %v2217_v58 }
  0x69   :  { %v1165_v27 = vmax.f32 %v1069_v11, %v1117_v19  ;;  %v929_v9 = vld [vmem:[#allocation2 + $0xa8] sm:$0xf]  ;;  %v1167_v29 = vmax.f32 %v1071_v38, %v1119_v8  ;;  %v1259_v22 = vmax.f32 %v1211_v6, 0.0  ;;  %v931_v15 = vld [vmem:[#allocation2 + $0xb8] sm:$0xf]  ;;  %v1270_v34 = vmax.f32 %v1222_v33, 0.0 }
  0x6a   :  { %v977_v43 = vld [vmem:[#allocation3 + $0xa8] sm:$0xf]  ;;  %1305 = vst [vmem:[%s2445_s4 + $0x68] sm:$0xf] %v1257_v44  ;;  %v979_v53 = vld [vmem:[#allocation3 + $0xb8] sm:$0xf] }
  0x6b   :  { %v1213_v10 = vmax.f32 %v1021_v47, %v1165_v27  ;;  %v1073_v12 = vld [vmem:[#allocation4 + $0xa8] sm:$0xf]  ;;  %v1025_v63 = vmax.f32 %v929_v9, %v977_v43  ;;  %v1215_v57 = vmax.f32 %v1023_v55, %v1167_v29  ;;  %v1027_v36 = vmax.f32 %v931_v15, %v979_v53  ;;  %v1075_v0 = vld [vmem:[#allocation4 + $0xb8] sm:$0xf]  ;;  %1307 = vst [vmem:[%s2445_s4 + $0x78] sm:$0xf] %v1259_v22 }
  0x6c   :  { %v1121_v60 = vld [vmem:[#allocation5 + $0xa8] sm:$0xf]  ;;  %v1123_v2 = vld [vmem:[#allocation5 + $0xb8] sm:$0xf]  ;;  %1316 = vst [vmem:[%s2445_s4 + $0xc0] sm:$0xff] %v1268_v21  ;;  %1318 = vst [vmem:[%s2445_s4 + $0xd0] sm:$0xff] %v1270_v34  ;;  %v1182_v53 = vmax.f32 %v2010_v39, %v2228_v62  ;;  %v1184_v39 = vmax.f32 %v2018_v41, %v2236_v49 }
  0x6d   :  { %v1169_v13 = vmax.f32 %v1073_v12, %v1121_v60  ;;  %v1261_v28 = vmax.f32 %v1213_v10, 0.0  ;;  %v1171_v17 = vmax.f32 %v1075_v0, %v1123_v2  ;;  %v933_v50 = vld [vmem:[#allocation2 + $0xc8] sm:$0xf]  ;;  %v1263_v3 = vmax.f32 %v1215_v57, 0.0  ;;  %v935_v42 = vld [vmem:[#allocation2 + $0xd8] sm:$0xf] }
  0x6e   :  { %v981_v40 = vld [vmem:[#allocation3 + $0xc8] sm:$0xf]  ;;  %v1272_v4 = vmax.f32 %v1224_v14, 0.0  ;;  %v983_v23 = vld [vmem:[#allocation3 + $0xd8] sm:$0xf]  ;;  %v938_v20 = vld [vmem:[#allocation2 + $0xf0] sm:$0xff] }
  0x6f   :  { %v1217_v48 = vmax.f32 %v1025_v63, %v1169_v13  ;;  %v1077_v61 = vld [vmem:[#allocation4 + $0xc8] sm:$0xf]  ;;  %1309 = vst [vmem:[%s2445_s4 + $0x88] sm:$0xf] %v1261_v28  ;;  %v1029_v18 = vmax.f32 %v933_v50, %v981_v40  ;;  %v1219_v11 = vmax.f32 %v1027_v36, %v1171_v17  ;;  %v1079_v27 = vld [vmem:[#allocation4 + $0xd8] sm:$0xf]  ;;  %v1031_v5 = vmax.f32 %v935_v42, %v983_v23 }
  0x70   :  { %v1125_v31 = vld [vmem:[#allocation5 + $0xc8] sm:$0xf]  ;;  %1311 = vst [vmem:[%s2445_s4 + $0x98] sm:$0xf] %v1263_v3  ;;  %v1127_v38 = vld [vmem:[#allocation5 + $0xd8] sm:$0xf]  ;;  %v1034_v35 = vmax.f32 %v938_v20, %v1816_v24 }
  0x71   :  { %v1265_v47 = vmax.f32 %v1217_v48, 0.0  ;;  %v1173_v19 = vmax.f32 %v1077_v61, %v1125_v31  ;;  %1320 = vst [vmem:[%s2445_s4 + $0xe0] sm:$0xff] %v1272_v4  ;;  %v937_v33 = vld [vmem:[#allocation2 + $0xe8] sm:$0xf]  ;;  %v1267_v44 = vmax.f32 %v1219_v11, 0.0  ;;  %v1175_v55 = vmax.f32 %v1079_v27, %v1127_v38  ;;  %v940_v10 = vld [vmem:[#allocation2 + $0x100] sm:$0xff] }
  0x72   :  { %v985_v56 = vld [vmem:[#allocation3 + $0xe8] sm:$0xf]  ;;  %v1226_v43 = vmax.f32 %v1034_v35, %v1178_v52  ;;  %v939_v12 = vld [vmem:[#allocation2 + $0xf8] sm:$0xf]  ;;  %v1036_v24 = vmax.f32 %v940_v10, %v1824_v26  ;;  %v942_v15 = vld [vmem:[#allocation2 + $0x110] sm:$0xff] }
  0x73   :  { %1313 = vst [vmem:[%s2445_s4 + $0xa8] sm:$0xf] %v1265_v47  ;;  %v1221_v6 = vmax.f32 %v1029_v18, %v1173_v19  ;;  %v1033_v8 = vmax.f32 %v937_v33, %v985_v56  ;;  %v1081_v9 = vld [vmem:[#allocation4 + $0xe8] sm:$0xf]  ;;  %v987_v60 = vld [vmem:[#allocation3 + $0xf8] sm:$0xf]  ;;  %v1223_v58 = vmax.f32 %v1031_v5, %v1175_v55 }
  0x74   :  { %v1129_v54 = vld [vmem:[#allocation5 + $0xe8] sm:$0xf]  ;;  %v1083_v14 = vld [vmem:[#allocation4 + $0xf8] sm:$0xf]  ;;  %1315 = vst [vmem:[%s2445_s4 + $0xb8] sm:$0xf] %v1267_v44  ;;  %v1035_v22 = vmax.f32 %v939_v12, %v987_v60  ;;  %v1228_v36 = vmax.f32 %v1036_v24, %v1180_v46 }
  0x75   :  { %v1177_v29 = vmax.f32 %v1081_v9, %v1129_v54  ;;  %v1269_v37 = vmax.f32 %v1221_v6, 0.0  ;;  %v1131_v63 = vld [vmem:[#allocation5 + $0xf8] sm:$0xf]  ;;  %v941_v13 = vld [vmem:[#allocation2 + $0x108] sm:$0xf]  ;;  %v1274_v28 = vmax.f32 %v1226_v43, 0.0  ;;  %v1186_v6 = vmax.f32 %v2026_v45, %v2244_v25 }
  0x76   :  { %v1179_v57 = vmax.f32 %v1083_v14, %v1131_v63  ;;  %v989_v0 = vld [vmem:[#allocation3 + $0x108] sm:$0xf]  ;;  %v990_v26 = vld [vmem:[#allocation3 + $0x110] sm:$0xff]  ;;  %v1271_v34 = vmax.f32 %v1223_v58, 0.0  ;;  %v943_v40 = vld [vmem:[#allocation2 + $0x118] sm:$0xf]  ;;  %v1188_v25 = vmax.f32 %v2034_v51, %v2258_v30  ;;  %v1190_v58 = vmax.f32 %v2042_v59, %v2272_v32 }
  0x77   :  { %v1225_v21 = vmax.f32 %v1033_v8, %v1177_v29  ;;  %v1085_v2 = vld [vmem:[#allocation4 + $0x108] sm:$0xf]  ;;  %1317 = vst [vmem:[%s2445_s4 + $0xc8] sm:$0xf] %v1269_v37  ;;  %v1037_v48 = vmax.f32 %v941_v13, %v989_v0  ;;  %v1038_v50 = vmax.f32 %v942_v15, %v990_v26  ;;  %v944_v61 = vld [vmem:[#allocation2 + $0x120] sm:$0xff]  ;;  %1322 = vst [vmem:[%s2445_s4 + $0xf0] sm:$0xff] %v1274_v28 }
  0x78   :  { %v1133_v17 = vld [vmem:[#allocation5 + $0x108] sm:$0xf]  ;;  %v1227_v3 = vmax.f32 %v1035_v22, %v1179_v57  ;;  %v1276_v18 = vmax.f32 %v1228_v36, 0.0  ;;  %v991_v42 = vld [vmem:[#allocation3 + $0x118] sm:$0xf]  ;;  %v992_v19 = vld [vmem:[#allocation3 + $0x120] sm:$0xff] }
  0x79   :  { %v1273_v62 = vmax.f32 %v1225_v21, 0.0  ;;  %v1181_v31 = vmax.f32 %v1085_v2, %v1133_v17  ;;  %v1087_v4 = vld [vmem:[#allocation4 + $0x118] sm:$0xf]  ;;  %1319 = vst [vmem:[%s2445_s4 + $0xd8] sm:$0xf] %v1271_v34  ;;  %v1230_v52 = vmax.f32 %v1038_v50, %v1182_v53  ;;  %v1039_v47 = vmax.f32 %v943_v40, %v991_v42  ;;  %v946_v33 = vld [vmem:[#allocation2 + $0x130] sm:$0xff] }
  0x7a   :  { %v1135_v11 = vld [vmem:[#allocation5 + $0x118] sm:$0xf]  ;;  %v945_v23 = vld [vmem:[#allocation2 + $0x128] sm:$0xf]  ;;  %v1275_v41 = vmax.f32 %v1227_v3, 0.0  ;;  %1324 = vst [vmem:[%s2445_s4 + $0x100] sm:$0xff] %v1276_v18  ;;  %v1040_v20 = vmax.f32 %v944_v61, %v992_v19  ;;  %v1192_v18 = vmax.f32 %v2050_v7, %v2280_v16 }
  0x7b   :  { %1321 = vst [vmem:[%s2445_s4 + $0xe8] sm:$0xf] %v1273_v62  ;;  %v1229_v49 = vmax.f32 %v1037_v48, %v1181_v31  ;;  %v1183_v27 = vmax.f32 %v1087_v4, %v1135_v11  ;;  %v993_v5 = vld [vmem:[#allocation3 + $0x128] sm:$0xf]  ;;  %v1278_v56 = vmax.f32 %v1230_v52, 0.0  ;;  %v994_v44 = vld [vmem:[#allocation3 + $0x130] sm:$0xff] }
  0x7c   :  { %v1089_v38 = vld [vmem:[#allocation4 + $0x128] sm:$0xf]  ;;  %v1041_v35 = vmax.f32 %v945_v23, %v993_v5  ;;  %v947_v55 = vld [vmem:[#allocation2 + $0x138] sm:$0xf]  ;;  %1323 = vst [vmem:[%s2445_s4 + $0xf8] sm:$0xf] %v1275_v41  ;;  %v1232_v54 = vmax.f32 %v1040_v20, %v1184_v39  ;;  %v1042_v60 = vmax.f32 %v946_v33, %v994_v44 }
  0x7d   :  { %v1137_v46 = vld [vmem:[#allocation5 + $0x128] sm:$0xf]  ;;  %v1277_v8 = vmax.f32 %v1229_v49, 0.0  ;;  %v1231_v9 = vmax.f32 %v1039_v47, %v1183_v27  ;;  %v995_v29 = vld [vmem:[#allocation3 + $0x138] sm:$0xf]  ;;  %v948_v12 = vld [vmem:[#allocation2 + $0x140] sm:$0xff] }
  0x7e   :  { %v1185_v10 = vmax.f32 %v1089_v38, %v1137_v46  ;;  %v1091_v43 = vld [vmem:[#allocation4 + $0x138] sm:$0xf]  ;;  %1326 = vst [vmem:[%s2445_s4 + $0x110] sm:$0xff] %v1278_v56  ;;  %v1043_v14 = vmax.f32 %v947_v55, %v995_v29  ;;  %v996_v45 = vld [vmem:[#allocation3 + $0x140] sm:$0xff]  ;;  %v949_v37 = vld [vmem:[#allocation2 + $0x148] sm:$0xf]  ;;  %v1234_v28 = vmax.f32 %v1042_v60, %v1186_v6 }
  0x7f   :  { %v1139_v24 = vld [vmem:[#allocation5 + $0x138] sm:$0xf]  ;;  %1325 = vst [vmem:[%s2445_s4 + $0x108] sm:$0xf] %v1277_v8  ;;  %v1279_v22 = vmax.f32 %v1231_v9, 0.0  ;;  %v1280_v63 = vmax.f32 %v1232_v54, 0.0  ;;  %v1044_v57 = vmax.f32 %v948_v12, %v996_v45 }
  0x80   :  { %v1233_v13 = vmax.f32 %v1041_v35, %v1185_v10  ;;  %v1187_v15 = vmax.f32 %v1091_v43, %v1139_v24  ;;  %v997_v53 = vld [vmem:[#allocation3 + $0x148] sm:$0xf]  ;;  %v950_v2 = vld [vmem:[#allocation2 + $0x150] sm:$0xff]  ;;  %v951_v34 = vld [vmem:[#allocation2 + $0x158] sm:$0xf]  ;;  %v1282_v50 = vmax.f32 %v1234_v28, 0.0 }
  0x81   :  { %v1093_v21 = vld [vmem:[#allocation4 + $0x148] sm:$0xf]  ;;  %v1045_v36 = vmax.f32 %v949_v37, %v997_v53  ;;  %v998_v51 = vld [vmem:[#allocation3 + $0x150] sm:$0xff]  ;;  %1327 = vst [vmem:[%s2445_s4 + $0x118] sm:$0xf] %v1279_v22  ;;  %1328 = vst [vmem:[%s2445_s4 + $0x120] sm:$0xff] %v1280_v63  ;;  %v1236_v40 = vmax.f32 %v1044_v57, %v1188_v25 }
  0x82   :  { %v1141_v0 = vld [vmem:[#allocation5 + $0x148] sm:$0xf]  ;;  %v1281_v59 = vmax.f32 %v1233_v13, 0.0  ;;  %v1235_v30 = vmax.f32 %v1043_v14, %v1187_v15  ;;  %v1046_v26 = vmax.f32 %v950_v2, %v998_v51  ;;  %v999_v48 = vld [vmem:[#allocation3 + $0x158] sm:$0xf]  ;;  %v952_v17 = vld [vmem:[#allocation2 + $0x160] sm:$0xff] }
  0x83   :  { %v1189_v32 = vmax.f32 %v1093_v21, %v1141_v0  ;;  %v1047_v61 = vmax.f32 %v951_v34, %v999_v48  ;;  %v1095_v39 = vld [vmem:[#allocation4 + $0x158] sm:$0xf]  ;;  %v1000_v3 = vld [vmem:[#allocation3 + $0x160] sm:$0xff]  ;;  %v953_v47 = vld [vmem:[#allocation2 + $0x168] sm:$0xf]  ;;  %1330 = vst [vmem:[%s2445_s4 + $0x130] sm:$0xff] %v1282_v50 }
  0x84   :  { %v1143_v62 = vld [vmem:[#allocation5 + $0x158] sm:$0xf]  ;;  %1329 = vst [vmem:[%s2445_s4 + $0x128] sm:$0xf] %v1281_v59  ;;  %v1283_v31 = vmax.f32 %v1235_v30, 0.0  ;;  %v1238_v4 = vmax.f32 %v1046_v26, %v1190_v58  ;;  %v954_v19 = vld [vmem:[#allocation2 + $0x170] sm:$0xff]  ;;  %v1048_v41 = vmax.f32 %v952_v17, %v1000_v3 }
  0x85   :  { %v1237_v42 = vmax.f32 %v1045_v36, %v1189_v32  ;;  %v1191_v52 = vmax.f32 %v1095_v39, %v1143_v62  ;;  %v1001_v11 = vld [vmem:[#allocation3 + $0x168] sm:$0xf]  ;;  %v1284_v23 = vmax.f32 %v1236_v40, 0.0  ;;  %v1002_v16 = vld [vmem:[#allocation3 + $0x170] sm:$0xff]  ;;  %v955_v35 = vld [vmem:[#allocation2 + $0x178] sm:$0xf] }
  0x86   :  { %v1049_v49 = vmax.f32 %v953_v47, %v1001_v11  ;;  %v1097_v27 = vld [vmem:[#allocation4 + $0x168] sm:$0xf]  ;;  %1331 = vst [vmem:[%s2445_s4 + $0x138] sm:$0xf] %v1283_v31  ;;  %v1286_v5 = vmax.f32 %v1238_v4, 0.0  ;;  %v1098_v56 = vld [vmem:[#allocation4 + $0x170] sm:$0xff]  ;;  %v1240_v46 = vmax.f32 %v1048_v41, %v1192_v18  ;;  %v1050_v44 = vmax.f32 %v954_v19, %v1002_v16 }
  0x87   :  { %v1145_v7 = vld [vmem:[#allocation5 + $0x168] sm:$0xf]  ;;  %v1285_v20 = vmax.f32 %v1237_v42, 0.0  ;;  %v1239_v38 = vmax.f32 %v1047_v61, %v1191_v52  ;;  %1332 = vst [vmem:[%s2445_s4 + $0x140] sm:$0xff] %v1284_v23  ;;  %v1194_v6 = vmax.f32 %v1098_v56, %v2288_v1  ;;  %v1003_v55 = vld [vmem:[#allocation3 + $0x178] sm:$0xf] }
  0x88   :  { %v1193_v33 = vmax.f32 %v1097_v27, %v1145_v7  ;;  %v1099_v8 = vld [vmem:[#allocation4 + $0x178] sm:$0xf]  ;;  %1334 = vst [vmem:[%s2445_s4 + $0x150] sm:$0xff] %v1286_v5  ;;  %v1051_v29 = vmax.f32 %v955_v35, %v1003_v55  ;;  %v1288_v12 = vmax.f32 %v1240_v46, 0.0 }
  0x89   :  { %v1147_v9 = vld [vmem:[#allocation5 + $0x178] sm:$0xf]  ;;  %1333 = vst [vmem:[%s2445_s4 + $0x148] sm:$0xf] %v1285_v20  ;;  %v1287_v54 = vmax.f32 %v1239_v38, 0.0  ;;  %v1242_v60 = vmax.f32 %v1050_v44, %v1194_v6 }
  0x8a   :  { %v1241_v10 = vmax.f32 %v1049_v49, %v1193_v33  ;;  %v1195_v43 = vmax.f32 %v1099_v8, %v1147_v9  ;;  %1336 = vst [vmem:[%s2445_s4 + $0x160] sm:$0xff] %v1288_v12 }
  0x8b   :  { %1335 = vst [vmem:[%s2445_s4 + $0x158] sm:$0xf] %v1287_v54  ;;  %v1290_v24 = vmax.f32 %v1242_v60, 0.0 }
  0x8c   :  { %v1289_v1 = vmax.f32 %v1241_v10, 0.0  ;;  %v1243_v14 = vmax.f32 %v1051_v29, %v1195_v43 }
  0x8d   :  { %1338 = vst [vmem:[%s2445_s4 + $0x170] sm:$0xff] %v1290_v24 }
  0x8e   :  { %1337 = vst [vmem:[%s2445_s4 + $0x168] sm:$0xf] %v1289_v1  ;;  %v1291_v45 = vmax.f32 %v1243_v14, 0.0 }
  0x90   :  { %1339 = vst [vmem:[%s2445_s4 + $0x178] sm:$0xf] %v1291_v45 }

// kernel: net_forward.7
= control target key start
LH: loop header
LB: loop body
LE: loop exit
PB: predicated region body
PF: predicated region fallthrough
CT: control target
= control target key end

     0   :  { %s555_s12 = smov 0   ;;  %s703_s0 = inlined_call_operand.vmem [shape: f32[128,256], index: 0, kind: input, shape index: {}]   ;;  %s704_s1 = inlined_call_operand.vmem [shape: f32[256,128], index: 1, kind: input, shape index: {}]   ;;  %s705_s2 = inlined_call_operand.vmem [shape: f32[1,128], index: 2, kind: input, shape index: {}]   ;;  %s706_s3 = inlined_call_operand.vmem [shape: f32[128,128], index: 3, kind: output, shape index: {}]  }
   0x1 LB: > { %s401_s13 = sadd.s32 4294967295, %s533_s12   ;;  %p405_p0 = scmp.ge.s32.totalorder %s533_s12, 1  ;;  %s533_s12 = sphi %s555_s12, %s13_s12  }
   0x2   : > { %p139_p1 = scmp.lt.s32.totalorder %s533_s12, 3 }
   0x4   : > { %p140_p2 = pnand %p405_p0, %p139_p1 }
   0x5   : > { %v209_v0 = vld [vmem:[%s704_s1 + $0x80] sm:$0xff] (!%p140_p2)  ;;  %v210_v1 = vld [vmem:[%s704_s1 + $0x88] sm:$0xff] (!%p140_p2)  ;;  %s406_s20 = sshll.u32 (!%p140_p2), %s401_s13, 3  ;;  %v211_v5 = vld [vmem:[%s704_s1 + $0x90] sm:$0xff] (!%p140_p2) }
   0x6   : > { %143 = sbr.rel (%p140_p2) target bundleno = 271 (0x10f), region = 32  ;;  %v193_v2 = vld [vmem:[%s704_s1] sm:$0xff] (!%p140_p2)  ;;  %v471_v3 = vpack.c.bf16 (!%p140_p2), %v210_v1, %v209_v0  ;;  %v194_v4 = vld [vmem:[%s704_s1 + $0x8] sm:$0xff] (!%p140_p2)  ;;  %v212_v6 = vld [vmem:[%s704_s1 + $0x98] sm:$0xff] (!%p140_p2)  ;;  %p165_p3 = scmp.lt.s32.totalorder (!%p140_p2), %s406_s20, 15 }
   0x7   : > { %v473_v7 = vpack.c.bf16 (!%p140_p2), %v194_v4, %v193_v2  ;;  %v475_v8 = vpack.c.bf16 (!%p140_p2), %v212_v6, %v211_v5  ;;  %v195_v9 = vld [vmem:[%s704_s1 + $0x10] sm:$0xff] (!%p140_p2)  ;;  %v196_v10 = vld [vmem:[%s704_s1 + $0x18] sm:$0xff] (!%p140_p2)  ;;  %v213_v11 = vld [vmem:[%s704_s1 + $0xa0] sm:$0xff] (!%p140_p2) }
   0x8   : > { %472 = vmatprep.subr.bf16.mxu0 (!%p140_p2), %v471_v3  ;;  %503 = vmatprep.subr.bf16.mxu1 (!%p140_p2), %v471_v3  ;;  %v214_v12 = vld [vmem:[%s704_s1 + $0xa8] sm:$0xff] (!%p140_p2)  ;;  %v477_v13 = vpack.c.bf16 (!%p140_p2), %v196_v10, %v195_v9  ;;  %v197_v15 = vld [vmem:[%s704_s1 + $0x20] sm:$0xff] (!%p140_p2)  ;;  %v215_v17 = vld [vmem:[%s704_s1 + $0xb0] sm:$0xff] (!%p140_p2) }
   0x9   : > { %474 = vmatpush3.bf16.msra.mxu0 (!%p140_p2), %v473_v7  ;;  %511 = vmatpush3.bf16.msra.mxu1 (!%p140_p2), %v473_v7  ;;  %v479_v14 = vpack.c.bf16 (!%p140_p2), %v214_v12, %v213_v11  ;;  %v198_v16 = vld [vmem:[%s704_s1 + $0x28] sm:$0xff] (!%p140_p2)  ;;  %v216_v18 = vld [vmem:[%s704_s1 + $0xb8] sm:$0xff] (!%p140_p2)  ;;  %v199_v21 = vld [vmem:[%s704_s1 + $0x30] sm:$0xff] (!%p140_p2) }
   0xa   : > { %476 = vmatprep.subr.bf16.mxu0 (!%p140_p2), %v475_v8  ;;  %504 = vmatprep.subr.bf16.mxu1 (!%p140_p2), %v475_v8  ;;  %v481_v19 = vpack.c.bf16 (!%p140_p2), %v198_v16, %v197_v15  ;;  %v483_v20 = vpack.c.bf16 (!%p140_p2), %v216_v18, %v215_v17  ;;  %v200_v22 = vld [vmem:[%s704_s1 + $0x38] sm:$0xff] (!%p140_p2)  ;;  %v217_v23 = vld [vmem:[%s704_s1 + $0xc0] sm:$0xff] (!%p140_p2)  ;;  %v218_v24 = vld [vmem:[%s704_s1 + $0xc8] sm:$0xff] (!%p140_p2) }
   0xb   : > { %v485_v27 = vpack.c.bf16 (!%p140_p2), %v200_v22, %v199_v21  ;;  %v487_v28 = vpack.c.bf16 (!%p140_p2), %v218_v24, %v217_v23  ;;  %v201_v29 = vld [vmem:[%s704_s1 + $0x40] sm:$0xff] (!%p140_p2)  ;;  %v202_v30 = vld [vmem:[%s704_s1 + $0x48] sm:$0xff] (!%p140_p2)  ;;  %v219_v31 = vld [vmem:[%s704_s1 + $0xd0] sm:$0xff] (!%p140_p2) }
   0xc   : > { %v220_v32 = vld [vmem:[%s704_s1 + $0xd8] sm:$0xff] (!%p140_p2)  ;;  %v489_v33 = vpack.c.bf16 (!%p140_p2), %v202_v30, %v201_v29  ;;  %v203_v35 = vld [vmem:[%s704_s1 + $0x50] sm:$0xff] (!%p140_p2)  ;;  %v221_v37 = vld [vmem:[%s704_s1 + $0xe0] sm:$0xff] (!%p140_p2) }
   0xd   : > { %s708_s20 = smov (!%p165_p3, %s406_s20), 15  ;;  %478 = vmatpush3.bf16.msra.mxu0 %v477_v13  ;;  %512 = vmatpush3.bf16.msra.mxu1 %v477_v13  ;;  %v491_v34 = vpack.c.bf16 %v220_v32, %v219_v31  ;;  %v204_v36 = vld [vmem:[%s704_s1 + $0x58] sm:$0xff]  ;;  %v222_v38 = vld [vmem:[%s704_s1 + $0xe8] sm:$0xff]  ;;  %v205_v41 = vld [vmem:[%s704_s1 + $0x60] sm:$0xff] }
   0xe   : > { %s414_s13 = sshll.u32 %s708_s20, 4  ;;  %480 = vmatprep.subr.bf16.mxu0 %v479_v14  ;;  %505 = vmatprep.subr.bf16.mxu1 %v479_v14  ;;  %v493_v39 = vpack.c.bf16 %v204_v36, %v203_v35  ;;  %v495_v40 = vpack.c.bf16 %v222_v38, %v221_v37  ;;  %v206_v42 = vld [vmem:[%s704_s1 + $0x68] sm:$0xff]  ;;  %v223_v43 = vld [vmem:[%s704_s1 + $0xf0] sm:$0xff]  ;;  %v224_v44 = vld [vmem:[%s704_s1 + $0xf8] sm:$0xff]  ;;  %s410_s7 = sshll.u32 %s708_s20, 3 }
   0xf   : > { %s611_s21 = scalar_lea.vmem %s703_s0, %s414_s13  ;;  %v497_v45 = vpack.c.bf16 %v206_v42, %v205_v41  ;;  %v499_v46 = vpack.c.bf16 %v224_v44, %v223_v43  ;;  %v207_v47 = vld [vmem:[%s704_s1 + $0x70] sm:$0xff]  ;;  %v208_v48 = vld [vmem:[%s704_s1 + $0x78] sm:$0xff]  ;;  %v411_v2 = vld [vmem:[%s705_s2] ss:$0 sm:$0xff]  ;;  %s690_s13 = scalar_lea.vmem %s706_s3, %s410_s7 }
  0x10   : > { %v178_v25 = vld [vmem:[%s611_s21 + $0x8] sm:$0xff]  ;;  %v501_v49 = vpack.c.bf16 %v208_v48, %v207_v47  ;;  %v177_v50 = vld [vmem:[%s611_s21] sm:$0xff]  ;;  %v180_v52 = vld [vmem:[%s611_s21 + $0x18] sm:$0xff] }
  0x11   : > { %296 = vmatprep.mubr.f32.mxu0 %v178_v25  ;;  %v186_v26 = vld [vmem:[%s611_s21 + $0x48] sm:$0xff]  ;;  %482 = vmatpush3.bf16.msra.mxu0 %v481_v19  ;;  %v185_v51 = vld [vmem:[%s611_s21 + $0x40] sm:$0xff]  ;;  %v188_v53 = vld [vmem:[%s611_s21 + $0x58] sm:$0xff] }
  0x12   : > { %513 = vmatpush3.bf16.msra.mxu1 %v481_v19  ;;  %484 = vmatprep.subr.bf16.mxu0 %v483_v20  ;;  %v179_v54 = vld [vmem:[%s611_s21 + $0x10] sm:$0xff]  ;;  %v182_v56 = vld [vmem:[%s611_s21 + $0x28] sm:$0xff]  ;;  %v181_v58 = vld [vmem:[%s611_s21 + $0x20] sm:$0xff] }
  0x13   : > { %506 = vmatprep.subr.bf16.mxu1 %v483_v20  ;;  %316 = vmatprep.mubr.f32.mxu1 %v186_v26  ;;  %v187_v55 = vld [vmem:[%s611_s21 + $0x50] sm:$0xff]  ;;  %v190_v57 = vld [vmem:[%s611_s21 + $0x68] sm:$0xff]  ;;  %v189_v59 = vld [vmem:[%s611_s21 + $0x60] sm:$0xff] }
  0x14   : > { %v184_v60 = vld [vmem:[%s611_s21 + $0x38] sm:$0xff]  ;;  %v183_v62 = vld [vmem:[%s611_s21 + $0x30] sm:$0xff] }
  0x15   : > { %486 = vmatpush3.bf16.msra.mxu0 %v485_v27  ;;  %v192_v61 = vld [vmem:[%s611_s21 + $0x78] sm:$0xff]  ;;  %v191_v63 = vld [vmem:[%s611_s21 + $0x70] sm:$0xff] }
  0x16   : > { %514 = vmatpush3.bf16.msra.mxu1 %v485_v27  ;;  %488 = vmatprep.subr.bf16.mxu0 %v487_v28 }
  0x17   : > { %507 = vmatprep.subr.bf16.mxu1 %v487_v28 }
  0x19   : > { %490 = vmatpush3.bf16.msra.mxu0 %v489_v33 }
  0x1a   : > { %515 = vmatpush3.bf16.msra.mxu1 %v489_v33  ;;  %492 = vmatprep.subr.bf16.mxu0 %v491_v34 }
  0x1b   : > { %508 = vmatprep.subr.bf16.mxu1 %v491_v34 }
  0x1d   : > { %494 = vmatpush3.bf16.msra.mxu0 %v493_v39 }
  0x1e   : > { %516 = vmatpush3.bf16.msra.mxu1 %v493_v39  ;;  %496 = vmatprep.subr.bf16.mxu0 %v495_v40 }
  0x1f   : > { %509 = vmatprep.subr.bf16.mxu1 %v495_v40 }
  0x21   : > { %498 = vmatpush3.bf16.msra.mxu0 %v497_v45 }
  0x22   : > { %517 = vmatpush3.bf16.msra.mxu1 %v497_v45  ;;  %500 = vmatprep.subr.bf16.mxu0 %v499_v46 }
  0x23   : > { %510 = vmatprep.subr.bf16.mxu1 %v499_v46 }
  0x25   : > { %502 = vmatpush3.bf16.msra.mxu0 %v501_v49 }
  0x26   : > { %518 = vmatpush3.bf16.msra.mxu1 %v501_v49 }
  0x28   : > { %297 = vmatmul.mubr.f32.vlgmr.msra.gmra.mrb[0].mxu0 %v177_v50 }
  0x29   : > { %317 = vmatmul.mubr.f32.vlgmr.msra.gmra.mrb[0].mxu1 %v185_v51  ;;  %301 = vmatprep.mubr.f32.mxu0 %v180_v52 }
  0x2a   : > { %321 = vmatprep.mubr.f32.mxu1 %v188_v53 }
  0x2c   : > { %302 = vmatmul.mubr.f32.gmra.mrb[2].mxu0 %v179_v54 }
  0x2d   : > { %322 = vmatmul.mubr.f32.gmra.mrb[2].mxu1 %v187_v55  ;;  %306 = vmatprep.mubr.f32.mxu0 %v182_v56 }
  0x2e   : > { %326 = vmatprep.mubr.f32.mxu1 %v190_v57 }
  0x30   : > { %307 = vmatmul.mubr.f32.gmra.mrb[4].mxu0 %v181_v58 }
  0x31   : > { %327 = vmatmul.mubr.f32.gmra.mrb[4].mxu1 %v189_v59  ;;  %311 = vmatprep.mubr.f32.mxu0 %v184_v60 }
  0x32   : > { %331 = vmatprep.mubr.f32.mxu1 %v192_v61 }
  0x34   : > { %312 = vmatmul.mubr.f32.gmra.mrb[6].mxu0 %v183_v62 }
  0x35   : > { %332 = vmatmul.mubr.f32.gmra.mrb[6].mxu1 %v191_v63 }
  0xfb   : > { %v447_v0 = vpop.f32.mrb[0].mxu0 }
  0xfc   : > { %v459_v1 = vpop.f32.mrb[0].mxu1  ;;  %v448_v3 = vpop.f32.mrb[1].mxu0 }
  0xfd   : > { %v460_v4 = vpop.f32.mrb[1].mxu1  ;;  %v449_v5 = vadd.f32 %v448_v3, %v447_v0 }
  0xfe   : > { %v461_v6 = vadd.f32 %v460_v4, %v459_v1 }
  0xff   : > { %v299_v7 = vadd.f32 %v449_v5, %v411_v2  ;;  %v450_v9 = vpop.f32.mrb[2].mxu0 }
 0x100   : > { %v319_v8 = vadd.f32 %v461_v6, %v411_v2  ;;  %v462_v10 = vpop.f32.mrb[2].mxu1  ;;  %v451_v11 = vpop.f32.mrb[3].mxu0 }
 0x101   : > { %v463_v12 = vpop.f32.mrb[3].mxu1  ;;  %337 = vst [vmem:[%s690_s13] sm:$0xff] %v299_v7  ;;  %v452_v13 = vadd.f32 %v451_v11, %v450_v9 }
 0x102   : > { %341 = vst [vmem:[%s690_s13 + $0x20] sm:$0xff] %v319_v8  ;;  %v464_v14 = vadd.f32 %v463_v12, %v462_v10 }
 0x103   : > { %v304_v15 = vadd.f32 %v452_v13, %v411_v2  ;;  %v453_v17 = vpop.f32.mrb[4].mxu0 }
 0x104   : > { %v324_v16 = vadd.f32 %v464_v14, %v411_v2  ;;  %v465_v18 = vpop.f32.mrb[4].mxu1  ;;  %v454_v19 = vpop.f32.mrb[5].mxu0 }
 0x105   : > { %v466_v20 = vpop.f32.mrb[5].mxu1  ;;  %338 = vst [vmem:[%s690_s13 + $0x8] sm:$0xff] %v304_v15  ;;  %v455_v21 = vadd.f32 %v454_v19, %v453_v17 }
 0x106   : > { %342 = vst [vmem:[%s690_s13 + $0x28] sm:$0xff] %v324_v16  ;;  %v467_v22 = vadd.f32 %v466_v20, %v465_v18 }
 0x107   : > { %v309_v23 = vadd.f32 %v455_v21, %v411_v2  ;;  %v456_v25 = vpop.f32.mrb[6].mxu0 }
 0x108   : > { %v329_v24 = vadd.f32 %v467_v22, %v411_v2  ;;  %v468_v26 = vpop.f32.mrb[6].mxu1  ;;  %v457_v27 = vpop.f32.mrb[7].mxu0 }
 0x109   : > { %v469_v28 = vpop.f32.mrb[7].mxu1  ;;  %339 = vst [vmem:[%s690_s13 + $0x10] sm:$0xff] %v309_v23  ;;  %v458_v29 = vadd.f32 %v457_v27, %v456_v25 }
 0x10a   : > { %343 = vst [vmem:[%s690_s13 + $0x30] sm:$0xff] %v329_v24  ;;  %v470_v30 = vadd.f32 %v469_v28, %v468_v26 }
 0x10b   : > { %v314_v31 = vadd.f32 %v458_v29, %v411_v2 }
 0x10c   : > { %v334_v32 = vadd.f32 %v470_v30, %v411_v2 }
 0x10d   : > { %340 = vst [vmem:[%s690_s13 + $0x18] sm:$0xff] %v314_v31 }
 0x10e   : > { %344 = vst [vmem:[%s690_s13 + $0x38] sm:$0xff] %v334_v32 }
 0x10f PF: > { %s13_s12 = sadd.s32 1, %s533_s12  }
 0x110   : > { %p10_p4 = scmp.ge.s32.totalorder %s13_s12, 4  }
 0x112   :  { %12 = sbr.rel (!%p10_p4) target bundleno = 1 (0x1), region = 62 }

// kernel: net_forward.8
= control target key start
LH: loop header
LB: loop body
LE: loop exit
PB: predicated region body
PF: predicated region fallthrough
CT: control target
= control target key end

     0   :  { %s557_s0 = inlined_call_operand.vmem [shape: f32[2,4,2,4,256], index: 0, kind: input, shape index: {}, may-alias: {0,1,2,3}]   ;;  %s558_s1 = inlined_call_operand.vmem [shape: f32[2,4,2,4,256], index: 1, kind: input, shape index: {}, may-alias: {0,1,2,3}]   ;;  %s559_s2 = inlined_call_operand.vmem [shape: f32[2,4,2,4,256], index: 2, kind: input, shape index: {}, may-alias: {0,1,2,3}]   ;;  %s560_s3 = inlined_call_operand.vmem [shape: f32[2,4,2,4,256], index: 3, kind: input, shape index: {}, may-alias: {0,1,2,3}]   ;;  %s561_s4 = inlined_call_operand.vmem [shape: f32[2,4,4,128], index: 4, kind: output, shape index: {}]  }
   0x1   :  { %v26_v0 = vld [vmem:[%s557_s0] sm:$0xf]  ;;  %v28_v1 = vld [vmem:[%s557_s0 + $0x10] sm:$0xf]  ;;  %v388_v8 = vld [vmem:[%s558_s1 + $0x4] sm:$0xf] }
   0x2   :  { %v30_v2 = vld [vmem:[%s557_s0 + $0x20] sm:$0xf]  ;;  %27 = vst [vmem:[#allocation2] sm:$0xf] %v26_v0  ;;  %29 = vst [vmem:[#allocation2 + $0x4] sm:$0xf] %v28_v1 }
   0x3   :  { %31 = vst [vmem:[#allocation2 + $0x8] sm:$0xf] %v30_v2  ;;  %v32_v3 = vld [vmem:[%s557_s0 + $0x30] sm:$0xf]  ;;  %v34_v4 = vld [vmem:[%s557_s0 + $0x40] sm:$0xf] }
   0x4   :  { %v36_v5 = vld [vmem:[%s557_s0 + $0x50] sm:$0xf]  ;;  %33 = vst [vmem:[#allocation2 + $0xc] sm:$0xf] %v32_v3  ;;  %35 = vst [vmem:[#allocation2 + $0x10] sm:$0xf] %v34_v4 }
   0x5   :  { %37 = vst [vmem:[#allocation2 + $0x14] sm:$0xf] %v36_v5  ;;  %v38_v6 = vld [vmem:[%s557_s0 + $0x60] sm:$0xf]  ;;  %v40_v7 = vld [vmem:[%s557_s0 + $0x70] sm:$0xf] }
   0x6   :  { %39 = vst [vmem:[#allocation2 + $0x18] sm:$0xf] %v38_v6  ;;  %41 = vst [vmem:[#allocation2 + $0x1c] sm:$0xf] %v40_v7  ;;  %v389_v9 = vld [vmem:[%s558_s1 + $0x14] sm:$0xf] }
   0x7   :  { %97 = vst [vmem:[#allocation3] sm:$0xf] %v388_v8  ;;  %v390_v10 = vld [vmem:[%s558_s1 + $0x24] sm:$0xf]  ;;  %v391_v11 = vld [vmem:[%s558_s1 + $0x34] sm:$0xf] }
   0x8   :  { %99 = vst [vmem:[#allocation3 + $0x4] sm:$0xf] %v389_v9  ;;  %101 = vst [vmem:[#allocation3 + $0x8] sm:$0xf] %v390_v10  ;;  %v392_v12 = vld [vmem:[%s558_s1 + $0x44] sm:$0xf] }
   0x9   :  { %103 = vst [vmem:[#allocation3 + $0xc] sm:$0xf] %v391_v11  ;;  %v393_v13 = vld [vmem:[%s558_s1 + $0x54] sm:$0xf]  ;;  %v394_v14 = vld [vmem:[%s558_s1 + $0x64] sm:$0xf] }
   0xa   :  { %105 = vst [vmem:[#allocation3 + $0x10] sm:$0xf] %v392_v12  ;;  %107 = vst [vmem:[#allocation3 + $0x14] sm:$0xf] %v393_v13  ;;  %v395_v15 = vld [vmem:[%s558_s1 + $0x74] sm:$0xf] }
   0xb   :  { %109 = vst [vmem:[#allocation3 + $0x18] sm:$0xf] %v394_v14  ;;  %v396_v16 = vld [vmem:[%s559_s2 + $0x8] sm:$0xf]  ;;  %v397_v17 = vld [vmem:[%s559_s2 + $0x18] sm:$0xf] }
   0xc   :  { %111 = vst [vmem:[#allocation3 + $0x1c] sm:$0xf] %v395_v15  ;;  %167 = vst [vmem:[#allocation4] sm:$0xf] %v396_v16  ;;  %v398_v18 = vld [vmem:[%s559_s2 + $0x28] sm:$0xf] }
   0xd   :  { %169 = vst [vmem:[#allocation4 + $0x4] sm:$0xf] %v397_v17  ;;  %v399_v19 = vld [vmem:[%s559_s2 + $0x38] sm:$0xf]  ;;  %v400_v20 = vld [vmem:[%s559_s2 + $0x48] sm:$0xf] }
   0xe   :  { %171 = vst [vmem:[#allocation4 + $0x8] sm:$0xf] %v398_v18  ;;  %173 = vst [vmem:[#allocation4 + $0xc] sm:$0xf] %v399_v19  ;;  %v401_v21 = vld [vmem:[%s559_s2 + $0x58] sm:$0xf] }
   0xf   :  { %175 = vst [vmem:[#allocation4 + $0x10] sm:$0xf] %v400_v20  ;;  %v402_v22 = vld [vmem:[%s559_s2 + $0x68] sm:$0xf]  ;;  %v403_v23 = vld [vmem:[%s559_s2 + $0x78] sm:$0xf] }
  0x10   :  { %177 = vst [vmem:[#allocation4 + $0x14] sm:$0xf] %v401_v21  ;;  %179 = vst [vmem:[#allocation4 + $0x18] sm:$0xf] %v402_v22  ;;  %v404_v24 = vld [vmem:[%s560_s3 + $0xc] sm:$0xf] }
  0x11   :  { %181 = vst [vmem:[#allocation4 + $0x1c] sm:$0xf] %v403_v23  ;;  %v405_v25 = vld [vmem:[%s560_s3 + $0x1c] sm:$0xf]  ;;  %v406_v26 = vld [vmem:[%s560_s3 + $0x2c] sm:$0xf] }
  0x12   :  { %237 = vst [vmem:[#allocation5] sm:$0xf] %v404_v24  ;;  %239 = vst [vmem:[#allocation5 + $0x4] sm:$0xf] %v405_v25  ;;  %v407_v27 = vld [vmem:[%s560_s3 + $0x3c] sm:$0xf] }
  0x13   :  { %241 = vst [vmem:[#allocation5 + $0x8] sm:$0xf] %v406_v26  ;;  %v408_v28 = vld [vmem:[%s560_s3 + $0x4c] sm:$0xf]  ;;  %v409_v29 = vld [vmem:[%s560_s3 + $0x5c] sm:$0xf] }
  0x14   :  { %243 = vst [vmem:[#allocation5 + $0xc] sm:$0xf] %v407_v27  ;;  %245 = vst [vmem:[#allocation5 + $0x10] sm:$0xf] %v408_v28  ;;  %v410_v30 = vld [vmem:[%s560_s3 + $0x6c] sm:$0xf] }
  0x15   :  { %247 = vst [vmem:[#allocation5 + $0x14] sm:$0xf] %v409_v29  ;;  %v411_v31 = vld [vmem:[%s560_s3 + $0x7c] sm:$0xf]  ;;  %v296_v32 = vld [vmem:[#allocation2] sm:$0xf] }
  0x16   :  { %249 = vst [vmem:[#allocation5 + $0x18] sm:$0xf] %v410_v30  ;;  %251 = vst [vmem:[#allocation5 + $0x1c] sm:$0xf] %v411_v31  ;;  %v304_v33 = vld [vmem:[#allocation3] sm:$0xf] }
  0x17   :  { %v297_v34 = vld [vmem:[#allocation2 + $0x4] sm:$0xf]  ;;  %v298_v36 = vld [vmem:[#allocation2 + $0x8] sm:$0xf]  ;;  %v299_v38 = vld [vmem:[#allocation2 + $0xc] sm:$0xf]  ;;  %v312_v45 = vmax.f32 %v296_v32, %v304_v33 }
  0x18   :  { %v305_v35 = vld [vmem:[#allocation3 + $0x4] sm:$0xf]  ;;  %v306_v37 = vld [vmem:[#allocation3 + $0x8] sm:$0xf]  ;;  %v320_v39 = vld [vmem:[#allocation4] sm:$0xf] }
  0x19   :  { %v321_v40 = vld [vmem:[#allocation4 + $0x4] sm:$0xf]  ;;  %v307_v41 = vld [vmem:[#allocation3 + $0xc] sm:$0xf]  ;;  %v322_v42 = vld [vmem:[#allocation4 + $0x8] sm:$0xf]  ;;  %v313_v46 = vmax.f32 %v297_v34, %v305_v35  ;;  %v314_v47 = vmax.f32 %v298_v36, %v306_v37 }
  0x1a   :  { %v323_v43 = vld [vmem:[#allocation4 + $0xc] sm:$0xf]  ;;  %v300_v44 = vld [vmem:[#allocation2 + $0x10] sm:$0xf]  ;;  %v301_v50 = vld [vmem:[#allocation2 + $0x14] sm:$0xf]  ;;  %v315_v54 = vmax.f32 %v299_v38, %v307_v41 }
  0x1b   :  { %v308_v48 = vld [vmem:[#allocation3 + $0x10] sm:$0xf]  ;;  %v328_v51 = vld [vmem:[#allocation5] sm:$0xf]  ;;  %v329_v52 = vld [vmem:[#allocation5 + $0x4] sm:$0xf] }
  0x1c   :  { %v324_v49 = vld [vmem:[#allocation4 + $0x10] sm:$0xf]  ;;  %v330_v53 = vld [vmem:[#allocation5 + $0x8] sm:$0xf]  ;;  %v316_v55 = vmax.f32 %v300_v44, %v308_v48  ;;  %v336_v56 = vmax.f32 %v320_v39, %v328_v51  ;;  %v337_v57 = vmax.f32 %v321_v40, %v329_v52  ;;  %v331_v59 = vld [vmem:[#allocation5 + $0xc] sm:$0xf] }
  0x1d   :  { %v338_v58 = vmax.f32 %v322_v42, %v330_v53  ;;  %v332_v60 = vld [vmem:[#allocation5 + $0x10] sm:$0xf]  ;;  %v309_v61 = vld [vmem:[#allocation3 + $0x14] sm:$0xf]  ;;  %v339_v62 = vmax.f32 %v323_v43, %v331_v59  ;;  %v302_v3 = vld [vmem:[#allocation2 + $0x18] sm:$0xf] }
  0x1e   :  { %v340_v63 = vmax.f32 %v324_v49, %v332_v60  ;;  %v317_v0 = vmax.f32 %v301_v50, %v309_v61  ;;  %v325_v1 = vld [vmem:[#allocation4 + $0x14] sm:$0xf]  ;;  %v344_v4 = vmax.f32 %v312_v45, %v336_v56  ;;  %v345_v5 = vmax.f32 %v313_v46, %v337_v57  ;;  %v310_v8 = vld [vmem:[#allocation3 + $0x18] sm:$0xf]  ;;  %v303_v15 = vld [vmem:[#allocation2 + $0x1c] sm:$0xf] }
  0x1f   :  { %v333_v2 = vld [vmem:[#allocation5 + $0x14] sm:$0xf]  ;;  %v346_v6 = vmax.f32 %v314_v47, %v338_v58  ;;  %v326_v9 = vld [vmem:[#allocation4 + $0x18] sm:$0xf]  ;;  %v347_v11 = vmax.f32 %v315_v54, %v339_v62  ;;  %v318_v13 = vmax.f32 %v302_v3, %v310_v8  ;;  %v311_v16 = vld [vmem:[#allocation3 + $0x1c] sm:$0xf] }
  0x20   :  { %v341_v7 = vmax.f32 %v325_v1, %v333_v2  ;;  %v334_v10 = vld [vmem:[#allocation5 + $0x18] sm:$0xf]  ;;  %v348_v12 = vmax.f32 %v316_v55, %v340_v63  ;;  %v327_v17 = vld [vmem:[#allocation4 + $0x1c] sm:$0xf]  ;;  %v352_v18 = vmax.f32 %v344_v4, 0.0  ;;  %v353_v19 = vmax.f32 %v345_v5, 0.0 }
  0x21   :  { %v342_v14 = vmax.f32 %v326_v9, %v334_v10  ;;  %v354_v20 = vmax.f32 %v346_v6, 0.0  ;;  %v335_v22 = vld [vmem:[#allocation5 + $0x1c] sm:$0xf]  ;;  %v355_v23 = vmax.f32 %v347_v11, 0.0  ;;  %v319_v26 = vmax.f32 %v303_v15, %v311_v16 }
  0x22   :  { %v349_v21 = vmax.f32 %v317_v0, %v341_v7  ;;  %v356_v24 = vmax.f32 %v348_v12, 0.0  ;;  %360 = vst [vmem:[%s561_s4] sm:$0xf] %v352_v18  ;;  %361 = vst [vmem:[%s561_s4 + $0x4] sm:$0xf] %v353_v19  ;;  %v343_v28 = vmax.f32 %v327_v17, %v335_v22 }
  0x23   :  { %v350_v25 = vmax.f32 %v318_v13, %v342_v14  ;;  %362 = vst [vmem:[%s561_s4 + $0x8] sm:$0xf] %v354_v20  ;;  %363 = vst [vmem:[%s561_s4 + $0xc] sm:$0xf] %v355_v23 }
  0x24   :  { %v357_v27 = vmax.f32 %v349_v21, 0.0  ;;  %364 = vst [vmem:[%s561_s4 + $0x10] sm:$0xf] %v356_v24  ;;  %v351_v30 = vmax.f32 %v319_v26, %v343_v28 }
  0x25   :  { %v358_v29 = vmax.f32 %v350_v25, 0.0 }
  0x26   :  { %365 = vst [vmem:[%s561_s4 + $0x14] sm:$0xf] %v357_v27  ;;  %v359_v31 = vmax.f32 %v351_v30, 0.0 }
  0x27   :  { %366 = vst [vmem:[%s561_s4 + $0x18] sm:$0xf] %v358_v29 }
  0x28   :  { %367 = vst [vmem:[%s561_s4 + $0x1c] sm:$0xf] %v359_v31 }

// kernel: net_forward.9
= control target key start
LH: loop header
LB: loop body
LE: loop exit
PB: predicated region body
PF: predicated region fallthrough
CT: control target
= control target key end

     0   :  { %vm1608_vm0 = vmmov 0   ;;  %s2529_s1 = inlined_call_operand.vmem [shape: f32[2048,128], index: 1, kind: input, shape index: {}]   ;;  %s2530_s0 = inlined_call_operand.vmem [shape: f32[8,2048], index: 0, kind: input, shape index: {}]   ;;  %s2531_s3 = inlined_call_operand.vmem [shape: f32[128,128], index: 3, kind: input, shape index: {}]   ;;  %s2532_s2 = inlined_call_operand.vmem [shape: f32[1,128], index: 2, kind: input, shape index: {}]   ;;  %s2533_s5 = inlined_call_operand.vmem [shape: f32[8,128], index: 5, kind: output, shape index: {0}]   ;;  %s2534_s4 = inlined_call_operand.vmem [shape: f32[1,128], index: 4, kind: input, shape index: {}]   ;;  %s2535_s6 = inlined_call_operand.vmem [shape: f32[8,128], index: 6, kind: output, shape index: {1}]   ;;  %s2536_s7 = inlined_call_operand.vmem [shape: f32[8,128], index: 7, kind: output, shape index: {2}]  }
   0x1   :  { %v55_v0 = vld [vmem:[%s2529_s1 + $0x80] sm:$0xff]  ;;  %v56_v1 = vld [vmem:[%s2529_s1 + $0x88] sm:$0xff]  ;;  %v57_v11 = vld [vmem:[%s2529_s1 + $0x90] sm:$0xff] }
   0x2   :  { %v39_v2 = vld [vmem:[%s2529_s1] sm:$0xff]  ;;  %v1320_v3 = vpack.c.bf16 %v56_v1, %v55_v0  ;;  %v40_v4 = vld [vmem:[%s2529_s1 + $0x8] sm:$0xff]  ;;  %v58_v13 = vld [vmem:[%s2529_s1 + $0x98] sm:$0xff] }
   0x3   :  { %v87_v5 = vld [vmem:[%s2529_s1 + $0x180] sm:$0xff]  ;;  %v88_v6 = vld [vmem:[%s2529_s1 + $0x188] sm:$0xff]  ;;  %v1322_v7 = vpack.c.bf16 %v40_v4, %v39_v2  ;;  %v41_v14 = vld [vmem:[%s2529_s1 + $0x10] sm:$0xff]  ;;  %v1324_v16 = vpack.c.bf16 %v58_v13, %v57_v11 }
   0x4   :  { %v1352_v8 = vpack.c.bf16 %v88_v6, %v87_v5  ;;  %v71_v9 = vld [vmem:[%s2529_s1 + $0x100] sm:$0xff]  ;;  %v72_v10 = vld [vmem:[%s2529_s1 + $0x108] sm:$0xff]  ;;  %1321 = vmatprep.subr.bf16.mxu0 %v1320_v3  ;;  %v42_v15 = vld [vmem:[%s2529_s1 + $0x18] sm:$0xff] }
   0x5   :  { %v1354_v12 = vpack.c.bf16 %v72_v10, %v71_v9  ;;  %1323 = vmatpush3.bf16.msra.mxu0 %v1322_v7  ;;  %v1326_v17 = vpack.c.bf16 %v42_v15, %v41_v14  ;;  %v89_v18 = vld [vmem:[%s2529_s1 + $0x190] sm:$0xff]  ;;  %v90_v19 = vld [vmem:[%s2529_s1 + $0x198] sm:$0xff]  ;;  %v59_v23 = vld [vmem:[%s2529_s1 + $0xa0] sm:$0xff] }
   0x6   :  { %1353 = vmatprep.subr.bf16.mxu1 %v1352_v8  ;;  %v73_v20 = vld [vmem:[%s2529_s1 + $0x110] sm:$0xff]  ;;  %v1356_v21 = vpack.c.bf16 %v90_v19, %v89_v18  ;;  %v74_v22 = vld [vmem:[%s2529_s1 + $0x118] sm:$0xff]  ;;  %v60_v24 = vld [vmem:[%s2529_s1 + $0xa8] sm:$0xff]  ;;  %1325 = vmatprep.subr.bf16.mxu0 %v1324_v16 }
   0x7   :  { %1355 = vmatpush3.bf16.msra.mxu1 %v1354_v12  ;;  %v1358_v25 = vpack.c.bf16 %v74_v22, %v73_v20  ;;  %v1328_v26 = vpack.c.bf16 %v60_v24, %v59_v23  ;;  %v43_v27 = vld [vmem:[%s2529_s1 + $0x20] sm:$0xff]  ;;  %v44_v28 = vld [vmem:[%s2529_s1 + $0x28] sm:$0xff]  ;;  %v61_v35 = vld [vmem:[%s2529_s1 + $0xb0] sm:$0xff] }
   0x8   :  { %v91_v29 = vld [vmem:[%s2529_s1 + $0x1a0] sm:$0xff]  ;;  %1357 = vmatprep.subr.bf16.mxu1 %v1356_v21  ;;  %v92_v30 = vld [vmem:[%s2529_s1 + $0x1a8] sm:$0xff]  ;;  %v1330_v33 = vpack.c.bf16 %v44_v28, %v43_v27  ;;  %v62_v36 = vld [vmem:[%s2529_s1 + $0xb8] sm:$0xff] }
   0x9   :  { %v75_v31 = vld [vmem:[%s2529_s1 + $0x120] sm:$0xff]  ;;  %v76_v32 = vld [vmem:[%s2529_s1 + $0x128] sm:$0xff]  ;;  %1327 = vmatpush3.bf16.msra.mxu0 %v1326_v17  ;;  %v1360_v34 = vpack.c.bf16 %v92_v30, %v91_v29  ;;  %v45_v37 = vld [vmem:[%s2529_s1 + $0x30] sm:$0xff]  ;;  %v1332_v39 = vpack.c.bf16 %v62_v36, %v61_v35 }
   0xa   :  { %1329 = vmatprep.subr.bf16.mxu0 %v1328_v26  ;;  %v1362_v38 = vpack.c.bf16 %v76_v32, %v75_v31  ;;  %v46_v40 = vld [vmem:[%s2529_s1 + $0x38] sm:$0xff]  ;;  %v93_v41 = vld [vmem:[%s2529_s1 + $0x1b0] sm:$0xff]  ;;  %v63_v46 = vld [vmem:[%s2529_s1 + $0xc0] sm:$0xff] }
   0xb   :  { %1359 = vmatpush3.bf16.msra.mxu1 %v1358_v25  ;;  %v94_v42 = vld [vmem:[%s2529_s1 + $0x1b8] sm:$0xff]  ;;  %v77_v44 = vld [vmem:[%s2529_s1 + $0x130] sm:$0xff]  ;;  %v64_v47 = vld [vmem:[%s2529_s1 + $0xc8] sm:$0xff]  ;;  %v1334_v48 = vpack.c.bf16 %v46_v40, %v45_v37 }
   0xc   :  { %1361 = vmatprep.subr.bf16.mxu1 %v1360_v34  ;;  %v1364_v43 = vpack.c.bf16 %v94_v42, %v93_v41  ;;  %v78_v45 = vld [vmem:[%s2529_s1 + $0x138] sm:$0xff]  ;;  %v95_v49 = vld [vmem:[%s2529_s1 + $0x1c0] sm:$0xff]  ;;  %v96_v50 = vld [vmem:[%s2529_s1 + $0x1c8] sm:$0xff]  ;;  %v1336_v52 = vpack.c.bf16 %v64_v47, %v63_v46 }
   0xd   :  { %1331 = vmatpush3.bf16.msra.mxu0 %v1330_v33  ;;  %v1366_v51 = vpack.c.bf16 %v78_v45, %v77_v44  ;;  %v47_v53 = vld [vmem:[%s2529_s1 + $0x40] sm:$0xff]  ;;  %v48_v54 = vld [vmem:[%s2529_s1 + $0x48] sm:$0xff]  ;;  %v1368_v56 = vpack.c.bf16 %v96_v50, %v95_v49  ;;  %v65_v58 = vld [vmem:[%s2529_s1 + $0xd0] sm:$0xff] }
   0xe   :  { %1333 = vmatprep.subr.bf16.mxu0 %v1332_v39  ;;  %v79_v55 = vld [vmem:[%s2529_s1 + $0x140] sm:$0xff]  ;;  %v80_v57 = vld [vmem:[%s2529_s1 + $0x148] sm:$0xff]  ;;  %v66_v59 = vld [vmem:[%s2529_s1 + $0xd8] sm:$0xff]  ;;  %v1338_v62 = vpack.c.bf16 %v48_v54, %v47_v53 }
   0xf   :  { %1363 = vmatpush3.bf16.msra.mxu1 %v1362_v38  ;;  %v97_v60 = vld [vmem:[%s2529_s1 + $0x1d0] sm:$0xff]  ;;  %v98_v61 = vld [vmem:[%s2529_s1 + $0x1d8] sm:$0xff]  ;;  %v1370_v63 = vpack.c.bf16 %v80_v57, %v79_v55  ;;  %v1340_v0 = vpack.c.bf16 %v66_v59, %v65_v58  ;;  %v67_v6 = vld [vmem:[%s2529_s1 + $0xe0] sm:$0xff] }
  0x10   :  { %1365 = vmatprep.subr.bf16.mxu1 %v1364_v43  ;;  %v49_v1 = vld [vmem:[%s2529_s1 + $0x50] sm:$0xff]  ;;  %v50_v2 = vld [vmem:[%s2529_s1 + $0x58] sm:$0xff]  ;;  %v1372_v4 = vpack.c.bf16 %v98_v61, %v97_v60  ;;  %v68_v7 = vld [vmem:[%s2529_s1 + $0xe8] sm:$0xff] }
  0x11   :  { %1335 = vmatpush3.bf16.msra.mxu0 %v1334_v48  ;;  %v81_v3 = vld [vmem:[%s2529_s1 + $0x150] sm:$0xff]  ;;  %v82_v5 = vld [vmem:[%s2529_s1 + $0x158] sm:$0xff]  ;;  %v99_v8 = vld [vmem:[%s2529_s1 + $0x1e0] sm:$0xff]  ;;  %v1342_v10 = vpack.c.bf16 %v50_v2, %v49_v1  ;;  %v1344_v14 = vpack.c.bf16 %v68_v7, %v67_v6 }
  0x12   :  { %1337 = vmatprep.subr.bf16.mxu0 %v1336_v52  ;;  %v100_v9 = vld [vmem:[%s2529_s1 + $0x1e8] sm:$0xff]  ;;  %v51_v11 = vld [vmem:[%s2529_s1 + $0x60] sm:$0xff]  ;;  %v1374_v13 = vpack.c.bf16 %v82_v5, %v81_v3  ;;  %v69_v19 = vld [vmem:[%s2529_s1 + $0xf0] sm:$0xff] }
  0x13   :  { %1367 = vmatpush3.bf16.msra.mxu1 %v1366_v51  ;;  %v52_v12 = vld [vmem:[%s2529_s1 + $0x68] sm:$0xff]  ;;  %v83_v15 = vld [vmem:[%s2529_s1 + $0x160] sm:$0xff]  ;;  %v1376_v18 = vpack.c.bf16 %v100_v9, %v99_v8  ;;  %v70_v20 = vld [vmem:[%s2529_s1 + $0xf8] sm:$0xff] }
  0x14   :  { %1369 = vmatprep.subr.bf16.mxu1 %v1368_v56  ;;  %v84_v16 = vld [vmem:[%s2529_s1 + $0x168] sm:$0xff]  ;;  %v26_v21 = vld [vmem:[%s2530_s0 + $0x18] sm:$0xff]  ;;  %v101_v22 = vld [vmem:[%s2529_s1 + $0x1f0] sm:$0xff]  ;;  %v1346_v24 = vpack.c.bf16 %v52_v12, %v51_v11  ;;  %v1348_v26 = vpack.c.bf16 %v70_v20, %v69_v19 }
  0x15   :  { %1339 = vmatpush3.bf16.msra.mxu0 %v1338_v62  ;;  %v24_v17 = vld [vmem:[%s2530_s0 + $0x8] sm:$0xff]  ;;  %v102_v23 = vld [vmem:[%s2529_s1 + $0x1f8] sm:$0xff]  ;;  %436 = vmatprep.mubr.f32.mxu1 %v26_v21  ;;  %v1378_v25 = vpack.c.bf16 %v84_v16, %v83_v15  ;;  %v53_v27 = vld [vmem:[%s2529_s1 + $0x70] sm:$0xff] }
  0x16   :  { %1341 = vmatprep.subr.bf16.mxu0 %v1340_v0  ;;  %366 = vmatprep.mubr.f32.mxu0 %v24_v17  ;;  %v54_v28 = vld [vmem:[%s2529_s1 + $0x78] sm:$0xff]  ;;  %v85_v29 = vld [vmem:[%s2529_s1 + $0x170] sm:$0xff]  ;;  %v1380_v30 = vpack.c.bf16 %v102_v23, %v101_v22  ;;  %v119_v32 = vld [vmem:[%s2529_s1 + $0x280] sm:$0xff] }
  0x17   :  { %1371 = vmatpush3.bf16.msra.mxu1 %v1370_v63  ;;  %v86_v31 = vld [vmem:[%s2529_s1 + $0x178] sm:$0xff]  ;;  %v120_v33 = vld [vmem:[%s2529_s1 + $0x288] sm:$0xff]  ;;  %v151_v34 = vld [vmem:[%s2529_s1 + $0x380] sm:$0xff]  ;;  %v1350_v36 = vpack.c.bf16 %v54_v28, %v53_v27 }
  0x18   :  { %1373 = vmatprep.subr.bf16.mxu1 %v1372_v4  ;;  %v152_v35 = vld [vmem:[%s2529_s1 + $0x388] sm:$0xff]  ;;  %v1382_v37 = vpack.c.bf16 %v86_v31, %v85_v29  ;;  %v1384_v38 = vpack.c.bf16 %v120_v33, %v119_v32  ;;  %v103_v39 = vld [vmem:[%s2529_s1 + $0x200] sm:$0xff]  ;;  %v121_v44 = vld [vmem:[%s2529_s1 + $0x290] sm:$0xff] }
  0x19   :  { %1343 = vmatpush3.bf16.msra.mxu0 %v1342_v10  ;;  %v104_v40 = vld [vmem:[%s2529_s1 + $0x208] sm:$0xff]  ;;  %v135_v41 = vld [vmem:[%s2529_s1 + $0x300] sm:$0xff]  ;;  %v1416_v42 = vpack.c.bf16 %v152_v35, %v151_v34  ;;  %v122_v45 = vld [vmem:[%s2529_s1 + $0x298] sm:$0xff] }
  0x1a   :  { %1345 = vmatprep.subr.bf16.mxu0 %v1344_v14  ;;  %v136_v43 = vld [vmem:[%s2529_s1 + $0x308] sm:$0xff]  ;;  %v153_v46 = vld [vmem:[%s2529_s1 + $0x390] sm:$0xff]  ;;  %v154_v47 = vld [vmem:[%s2529_s1 + $0x398] sm:$0xff]  ;;  %v1386_v49 = vpack.c.bf16 %v104_v40, %v103_v39  ;;  %v1388_v52 = vpack.c.bf16 %v122_v45, %v121_v44 }
  0x1b   :  { %1375 = vmatpush3.bf16.msra.mxu1 %v1374_v13  ;;  %v23_v48 = vld [vmem:[%s2530_s0] sm:$0xff]  ;;  %v25_v50 = vld [vmem:[%s2530_s0 + $0x10] sm:$0xff]  ;;  %v1418_v51 = vpack.c.bf16 %v136_v43, %v135_v41  ;;  %v106_v54 = vld [vmem:[%s2529_s1 + $0x218] sm:$0xff]  ;;  %v1420_v56 = vpack.c.bf16 %v154_v47, %v153_v46 }
  0x1c   :  { %1377 = vmatprep.subr.bf16.mxu1 %v1376_v18  ;;  %v105_v53 = vld [vmem:[%s2529_s1 + $0x210] sm:$0xff]  ;;  %v138_v57 = vld [vmem:[%s2529_s1 + $0x318] sm:$0xff]  ;;  %v123_v58 = vld [vmem:[%s2529_s1 + $0x2a0] sm:$0xff] }
  0x1d   :  { %1347 = vmatpush3.bf16.msra.mxu0 %v1346_v24  ;;  %v137_v55 = vld [vmem:[%s2529_s1 + $0x310] sm:$0xff]  ;;  %v124_v59 = vld [vmem:[%s2529_s1 + $0x2a8] sm:$0xff]  ;;  %v155_v60 = vld [vmem:[%s2529_s1 + $0x3a0] sm:$0xff]  ;;  %v1390_v62 = vpack.c.bf16 %v106_v54, %v105_v53 }
  0x1e   :  { %1349 = vmatprep.subr.bf16.mxu0 %v1348_v26  ;;  %v156_v61 = vld [vmem:[%s2529_s1 + $0x3a8] sm:$0xff]  ;;  %v1422_v63 = vpack.c.bf16 %v138_v57, %v137_v55  ;;  %v1392_v0 = vpack.c.bf16 %v124_v59, %v123_v58  ;;  %v107_v1 = vld [vmem:[%s2529_s1 + $0x220] sm:$0xff]  ;;  %v125_v6 = vld [vmem:[%s2529_s1 + $0x2b0] sm:$0xff] }
  0x1f   :  { %1379 = vmatpush3.bf16.msra.mxu1 %v1378_v25  ;;  %v108_v2 = vld [vmem:[%s2529_s1 + $0x228] sm:$0xff]  ;;  %v139_v3 = vld [vmem:[%s2529_s1 + $0x320] sm:$0xff]  ;;  %v1424_v4 = vpack.c.bf16 %v156_v61, %v155_v60  ;;  %v126_v7 = vld [vmem:[%s2529_s1 + $0x2b8] sm:$0xff] }
  0x20   :  { %1381 = vmatprep.subr.bf16.mxu1 %v1380_v30  ;;  %v140_v5 = vld [vmem:[%s2529_s1 + $0x328] sm:$0xff]  ;;  %v157_v8 = vld [vmem:[%s2529_s1 + $0x3b0] sm:$0xff]  ;;  %v158_v9 = vld [vmem:[%s2529_s1 + $0x3b8] sm:$0xff]  ;;  %v1394_v10 = vpack.c.bf16 %v108_v2, %v107_v1  ;;  %v1396_v12 = vpack.c.bf16 %v126_v7, %v125_v6 }
  0x21   :  { %1351 = vmatpush3.bf16.msra.mxu0 %v1350_v36  ;;  %v1426_v11 = vpack.c.bf16 %v140_v5, %v139_v3  ;;  %v109_v13 = vld [vmem:[%s2529_s1 + $0x230] sm:$0xff]  ;;  %v110_v14 = vld [vmem:[%s2529_s1 + $0x238] sm:$0xff]  ;;  %v1428_v16 = vpack.c.bf16 %v158_v9, %v157_v8  ;;  %v127_v18 = vld [vmem:[%s2529_s1 + $0x2c0] sm:$0xff] }
  0x22   :  { %1385 = vmatprep.subr.bf16.mxu0 %v1384_v38  ;;  %v141_v15 = vld [vmem:[%s2529_s1 + $0x330] sm:$0xff]  ;;  %v142_v17 = vld [vmem:[%s2529_s1 + $0x338] sm:$0xff]  ;;  %v128_v19 = vld [vmem:[%s2529_s1 + $0x2c8] sm:$0xff]  ;;  %v1398_v22 = vpack.c.bf16 %v110_v14, %v109_v13 }
  0x23   :  { %1383 = vmatpush3.bf16.msra.mxu1 %v1382_v37  ;;  %v159_v20 = vld [vmem:[%s2529_s1 + $0x3c0] sm:$0xff]  ;;  %v160_v21 = vld [vmem:[%s2529_s1 + $0x3c8] sm:$0xff]  ;;  %v1430_v25 = vpack.c.bf16 %v142_v17, %v141_v15  ;;  %v1400_v26 = vpack.c.bf16 %v128_v19, %v127_v18  ;;  %v30_v29 = vld [vmem:[%s2530_s0 + $0x38] sm:$0xff] }
  0x24   :  { %1417 = vmatprep.subr.bf16.mxu1 %v1416_v42  ;;  %367 = vmatmul.mubr.f32.vlgmr.msra.gmra.mrb[0].mxu0 %v23_v48  ;;  %v111_v23 = vld [vmem:[%s2529_s1 + $0x240] sm:$0xff]  ;;  %v28_v24 = vld [vmem:[%s2530_s0 + $0x28] sm:$0xff]  ;;  %v1432_v30 = vpack.c.bf16 %v160_v21, %v159_v20  ;;  %v129_v32 = vld [vmem:[%s2529_s1 + $0x2d0] sm:$0xff] }
  0x25   :  { %1387 = vmatpush3.bf16.msra.mxu0 %v1386_v49  ;;  %v112_v27 = vld [vmem:[%s2529_s1 + $0x248] sm:$0xff]  ;;  %v143_v28 = vld [vmem:[%s2529_s1 + $0x340] sm:$0xff]  ;;  %v130_v33 = vld [vmem:[%s2529_s1 + $0x2d8] sm:$0xff]  ;;  %506 = vmatprep.mubr.f32.mxu0 %v28_v24 }
  0x26   :  { %437 = vmatmul.mubr.f32.vlgmr.msra.gmra.mrb[0].mxu1 %v25_v50  ;;  %1389 = vmatprep.subr.bf16.mxu0 %v1388_v52  ;;  %v144_v31 = vld [vmem:[%s2529_s1 + $0x348] sm:$0xff]  ;;  %v161_v34 = vld [vmem:[%s2529_s1 + $0x3d0] sm:$0xff]  ;;  %v162_v35 = vld [vmem:[%s2529_s1 + $0x3d8] sm:$0xff]  ;;  %v1402_v36 = vpack.c.bf16 %v112_v27, %v111_v23  ;;  %v1404_v38 = vpack.c.bf16 %v130_v33, %v129_v32 }
  0x27   :  { %1419 = vmatpush3.bf16.msra.mxu1 %v1418_v51  ;;  %576 = vmatprep.mubr.f32.mxu1 %v30_v29  ;;  %v1434_v37 = vpack.c.bf16 %v144_v31, %v143_v28  ;;  %v113_v39 = vld [vmem:[%s2529_s1 + $0x250] sm:$0xff]  ;;  %v114_v40 = vld [vmem:[%s2529_s1 + $0x258] sm:$0xff]  ;;  %v1436_v42 = vpack.c.bf16 %v162_v35, %v161_v34  ;;  %v131_v44 = vld [vmem:[%s2529_s1 + $0x2e0] sm:$0xff] }
  0x28   :  { %1421 = vmatprep.subr.bf16.mxu1 %v1420_v56  ;;  %v145_v41 = vld [vmem:[%s2529_s1 + $0x350] sm:$0xff]  ;;  %v146_v43 = vld [vmem:[%s2529_s1 + $0x358] sm:$0xff]  ;;  %v132_v45 = vld [vmem:[%s2529_s1 + $0x2e8] sm:$0xff]  ;;  %v1406_v48 = vpack.c.bf16 %v114_v40, %v113_v39 }
  0x29   :  { %1391 = vmatpush3.bf16.msra.mxu0 %v1390_v62  ;;  %v163_v46 = vld [vmem:[%s2529_s1 + $0x3e0] sm:$0xff]  ;;  %v164_v47 = vld [vmem:[%s2529_s1 + $0x3e8] sm:$0xff]  ;;  %v1438_v49 = vpack.c.bf16 %v146_v43, %v145_v41  ;;  %v1408_v50 = vpack.c.bf16 %v132_v45, %v131_v44  ;;  %v133_v56 = vld [vmem:[%s2529_s1 + $0x2f0] sm:$0xff] }
  0x2a   :  { %1393 = vmatprep.subr.bf16.mxu0 %v1392_v0  ;;  %v115_v51 = vld [vmem:[%s2529_s1 + $0x260] sm:$0xff]  ;;  %v116_v52 = vld [vmem:[%s2529_s1 + $0x268] sm:$0xff]  ;;  %v1440_v54 = vpack.c.bf16 %v164_v47, %v163_v46  ;;  %v134_v57 = vld [vmem:[%s2529_s1 + $0x2f8] sm:$0xff] }
  0x2b   :  { %1423 = vmatpush3.bf16.msra.mxu1 %v1422_v63  ;;  %v147_v53 = vld [vmem:[%s2529_s1 + $0x360] sm:$0xff]  ;;  %v148_v55 = vld [vmem:[%s2529_s1 + $0x368] sm:$0xff]  ;;  %v165_v58 = vld [vmem:[%s2529_s1 + $0x3f0] sm:$0xff]  ;;  %v1410_v60 = vpack.c.bf16 %v116_v52, %v115_v51  ;;  %v1412_v62 = vpack.c.bf16 %v134_v57, %v133_v56 }
  0x2c   :  { %1425 = vmatprep.subr.bf16.mxu1 %v1424_v4  ;;  %v166_v59 = vld [vmem:[%s2529_s1 + $0x3f8] sm:$0xff]  ;;  %v1442_v61 = vpack.c.bf16 %v148_v55, %v147_v53  ;;  %v117_v63 = vld [vmem:[%s2529_s1 + $0x270] sm:$0xff]  ;;  %v183_v4 = vld [vmem:[%s2529_s1 + $0x480] sm:$0xff] }
  0x2d   :  { %1395 = vmatpush3.bf16.msra.mxu0 %v1394_v10  ;;  %v118_v0 = vld [vmem:[%s2529_s1 + $0x278] sm:$0xff]  ;;  %v149_v1 = vld [vmem:[%s2529_s1 + $0x370] sm:$0xff]  ;;  %v1444_v2 = vpack.c.bf16 %v166_v59, %v165_v58  ;;  %v184_v5 = vld [vmem:[%s2529_s1 + $0x488] sm:$0xff] }
  0x2e   :  { %1397 = vmatprep.subr.bf16.mxu0 %v1396_v12  ;;  %v150_v3 = vld [vmem:[%s2529_s1 + $0x378] sm:$0xff]  ;;  %v215_v6 = vld [vmem:[%s2529_s1 + $0x580] sm:$0xff]  ;;  %v216_v7 = vld [vmem:[%s2529_s1 + $0x588] sm:$0xff]  ;;  %v1414_v8 = vpack.c.bf16 %v118_v0, %v117_v63  ;;  %v1448_v10 = vpack.c.bf16 %v184_v5, %v183_v4 }
  0x2f   :  { %1427 = vmatpush3.bf16.msra.mxu1 %v1426_v11  ;;  %v1446_v9 = vpack.c.bf16 %v150_v3, %v149_v1  ;;  %v167_v11 = vld [vmem:[%s2529_s1 + $0x400] sm:$0xff]  ;;  %v168_v12 = vld [vmem:[%s2529_s1 + $0x408] sm:$0xff]  ;;  %v1480_v14 = vpack.c.bf16 %v216_v7, %v215_v6  ;;  %v186_v17 = vld [vmem:[%s2529_s1 + $0x498] sm:$0xff] }
  0x30   :  { %1429 = vmatprep.subr.bf16.mxu1 %v1428_v16  ;;  %v199_v13 = vld [vmem:[%s2529_s1 + $0x500] sm:$0xff]  ;;  %v200_v15 = vld [vmem:[%s2529_s1 + $0x508] sm:$0xff]  ;;  %v185_v16 = vld [vmem:[%s2529_s1 + $0x490] sm:$0xff]  ;;  %v1450_v21 = vpack.c.bf16 %v168_v12, %v167_v11 }
  0x31   :  { %1399 = vmatpush3.bf16.msra.mxu0 %v1398_v22  ;;  %v217_v18 = vld [vmem:[%s2529_s1 + $0x590] sm:$0xff]  ;;  %v218_v19 = vld [vmem:[%s2529_s1 + $0x598] sm:$0xff]  ;;  %v27_v20 = vld [vmem:[%s2530_s0 + $0x20] sm:$0xff]  ;;  %v1482_v23 = vpack.c.bf16 %v200_v15, %v199_v13  ;;  %v1452_v24 = vpack.c.bf16 %v186_v17, %v185_v16 }
  0x32   :  { %1401 = vmatprep.subr.bf16.mxu0 %v1400_v26  ;;  %v29_v22 = vld [vmem:[%s2530_s0 + $0x30] sm:$0xff]  ;;  %v170_v26 = vld [vmem:[%s2529_s1 + $0x418] sm:$0xff]  ;;  %v1484_v28 = vpack.c.bf16 %v218_v19, %v217_v18  ;;  %v188_v31 = vld [vmem:[%s2529_s1 + $0x4a8] sm:$0xff] }
  0x33   :  { %1431 = vmatpush3.bf16.msra.mxu1 %v1430_v25  ;;  %v169_v25 = vld [vmem:[%s2529_s1 + $0x410] sm:$0xff]  ;;  %v202_v29 = vld [vmem:[%s2529_s1 + $0x518] sm:$0xff]  ;;  %v219_v32 = vld [vmem:[%s2529_s1 + $0x5a0] sm:$0xff] }
  0x34   :  { %1433 = vmatprep.subr.bf16.mxu1 %v1432_v30  ;;  %v201_v27 = vld [vmem:[%s2529_s1 + $0x510] sm:$0xff]  ;;  %v187_v30 = vld [vmem:[%s2529_s1 + $0x4a0] sm:$0xff]  ;;  %v220_v33 = vld [vmem:[%s2529_s1 + $0x5a8] sm:$0xff]  ;;  %v1454_v35 = vpack.c.bf16 %v170_v26, %v169_v25 }
  0x35   :  { %1403 = vmatpush3.bf16.msra.mxu0 %v1402_v36  ;;  %v32_v34 = vld [vmem:[%s2530_s0 + $0x48] sm:$0xff]  ;;  %v34_v36 = vld [vmem:[%s2530_s0 + $0x58] sm:$0xff]  ;;  %v171_v39 = vld [vmem:[%s2529_s1 + $0x420] sm:$0xff] }
  0x36   :  { %1405 = vmatprep.subr.bf16.mxu0 %v1404_v38  ;;  %v1456_v38 = vpack.c.bf16 %v188_v31, %v187_v30  ;;  %v172_v40 = vld [vmem:[%s2529_s1 + $0x428] sm:$0xff]  ;;  %v203_v41 = vld [vmem:[%s2529_s1 + $0x520] sm:$0xff]  ;;  %v189_v44 = vld [vmem:[%s2529_s1 + $0x4b0] sm:$0xff] }
  0x37   :  { %1435 = vmatpush3.bf16.msra.mxu1 %v1434_v37  ;;  %v1486_v37 = vpack.c.bf16 %v202_v29, %v201_v27  ;;  %v204_v43 = vld [vmem:[%s2529_s1 + $0x528] sm:$0xff]  ;;  %v190_v45 = vld [vmem:[%s2529_s1 + $0x4b8] sm:$0xff]  ;;  %v221_v46 = vld [vmem:[%s2529_s1 + $0x5b0] sm:$0xff] }
  0x38   :  { %1437 = vmatprep.subr.bf16.mxu1 %v1436_v42  ;;  %v1488_v42 = vpack.c.bf16 %v220_v33, %v219_v32  ;;  %v222_v47 = vld [vmem:[%s2529_s1 + $0x5b8] sm:$0xff]  ;;  %v173_v51 = vld [vmem:[%s2529_s1 + $0x430] sm:$0xff]  ;;  %v191_v56 = vld [vmem:[%s2529_s1 + $0x4c0] sm:$0xff] }
  0x39   :  { %1407 = vmatpush3.bf16.msra.mxu0 %v1406_v48  ;;  %v1458_v48 = vpack.c.bf16 %v172_v40, %v171_v39  ;;  %v174_v52 = vld [vmem:[%s2529_s1 + $0x438] sm:$0xff]  ;;  %v205_v53 = vld [vmem:[%s2529_s1 + $0x530] sm:$0xff]  ;;  %v192_v57 = vld [vmem:[%s2529_s1 + $0x4c8] sm:$0xff] }
  0x3a   :  { %1409 = vmatprep.subr.bf16.mxu0 %v1408_v50  ;;  %v1460_v50 = vpack.c.bf16 %v190_v45, %v189_v44  ;;  %v206_v55 = vld [vmem:[%s2529_s1 + $0x538] sm:$0xff]  ;;  %v223_v58 = vld [vmem:[%s2529_s1 + $0x5c0] sm:$0xff]  ;;  %v224_v59 = vld [vmem:[%s2529_s1 + $0x5c8] sm:$0xff] }
  0x3b   :  { %1439 = vmatpush3.bf16.msra.mxu1 %v1438_v49  ;;  %v1490_v49 = vpack.c.bf16 %v204_v43, %v203_v41  ;;  %v175_v63 = vld [vmem:[%s2529_s1 + $0x440] sm:$0xff]  ;;  %v176_v0 = vld [vmem:[%s2529_s1 + $0x448] sm:$0xff]  ;;  %v193_v4 = vld [vmem:[%s2529_s1 + $0x4d0] sm:$0xff] }
  0x3c   :  { %1441 = vmatprep.subr.bf16.mxu1 %v1440_v54  ;;  %v1492_v54 = vpack.c.bf16 %v222_v47, %v221_v46  ;;  %v207_v1 = vld [vmem:[%s2529_s1 + $0x540] sm:$0xff]  ;;  %v208_v3 = vld [vmem:[%s2529_s1 + $0x548] sm:$0xff]  ;;  %v194_v5 = vld [vmem:[%s2529_s1 + $0x4d8] sm:$0xff] }
  0x3d   :  { %1411 = vmatpush3.bf16.msra.mxu0 %v1410_v60  ;;  %v1462_v60 = vpack.c.bf16 %v174_v52, %v173_v51  ;;  %v225_v6 = vld [vmem:[%s2529_s1 + $0x5d0] sm:$0xff]  ;;  %v226_v7 = vld [vmem:[%s2529_s1 + $0x5d8] sm:$0xff]  ;;  %v195_v16 = vld [vmem:[%s2529_s1 + $0x4e0] sm:$0xff] }
  0x3e   :  { %1413 = vmatprep.subr.bf16.mxu0 %v1412_v62  ;;  %v1464_v62 = vpack.c.bf16 %v192_v57, %v191_v56  ;;  %v177_v11 = vld [vmem:[%s2529_s1 + $0x450] sm:$0xff]  ;;  %v178_v12 = vld [vmem:[%s2529_s1 + $0x458] sm:$0xff]  ;;  %v196_v17 = vld [vmem:[%s2529_s1 + $0x4e8] sm:$0xff] }
  0x3f   :  { %1443 = vmatpush3.bf16.msra.mxu1 %v1442_v61  ;;  %v1494_v61 = vpack.c.bf16 %v206_v55, %v205_v53  ;;  %v209_v13 = vld [vmem:[%s2529_s1 + $0x550] sm:$0xff]  ;;  %v210_v15 = vld [vmem:[%s2529_s1 + $0x558] sm:$0xff]  ;;  %v227_v18 = vld [vmem:[%s2529_s1 + $0x5e0] sm:$0xff] }
  0x40   :  { %1445 = vmatprep.subr.bf16.mxu1 %v1444_v2  ;;  %v1496_v2 = vpack.c.bf16 %v224_v59, %v223_v58  ;;  %v228_v19 = vld [vmem:[%s2529_s1 + $0x5e8] sm:$0xff]  ;;  %v211_v25 = vld [vmem:[%s2529_s1 + $0x560] sm:$0xff]  ;;  %v198_v29 = vld [vmem:[%s2529_s1 + $0x4f8] sm:$0xff] }
  0x41   :  { %1415 = vmatpush3.bf16.msra.mxu0 %v1414_v8  ;;  %v1466_v8 = vpack.c.bf16 %v176_v0, %v175_v63  ;;  %v1504_v26 = vpack.c.bf16 %v228_v19, %v227_v18  ;;  %v212_v27 = vld [vmem:[%s2529_s1 + $0x568] sm:$0xff]  ;;  %v229_v30 = vld [vmem:[%s2529_s1 + $0x5f0] sm:$0xff]  ;;  %v230_v31 = vld [vmem:[%s2529_s1 + $0x5f8] sm:$0xff] }
  0x42   :  { %1449 = vmatprep.subr.bf16.mxu0 %v1448_v10  ;;  %v1468_v10 = vpack.c.bf16 %v194_v5, %v193_v4  ;;  %v1506_v33 = vpack.c.bf16 %v212_v27, %v211_v25  ;;  %v214_v39 = vld [vmem:[%s2529_s1 + $0x578] sm:$0xff]  ;;  %v247_v40 = vld [vmem:[%s2529_s1 + $0x680] sm:$0xff]  ;;  %v248_v41 = vld [vmem:[%s2529_s1 + $0x688] sm:$0xff] }
  0x43   :  { %1447 = vmatpush3.bf16.msra.mxu1 %v1446_v9  ;;  %v1498_v9 = vpack.c.bf16 %v208_v3, %v207_v1  ;;  %v280_v43 = vld [vmem:[%s2529_s1 + $0x788] sm:$0xff]  ;;  %v1512_v46 = vpack.c.bf16 %v248_v41, %v247_v40  ;;  %v231_v47 = vld [vmem:[%s2529_s1 + $0x600] sm:$0xff]  ;;  %v249_v52 = vld [vmem:[%s2529_s1 + $0x690] sm:$0xff] }
  0x44   :  { %1481 = vmatprep.subr.bf16.mxu1 %v1480_v14  ;;  %507 = vmatmul.mubr.f32.vlgmr.msra.gmra.mrb[2].mxu0 %v27_v20  ;;  %v1500_v14 = vpack.c.bf16 %v226_v7, %v225_v6  ;;  %v1470_v20 = vpack.c.bf16 %v178_v12, %v177_v11  ;;  %v264_v51 = vld [vmem:[%s2529_s1 + $0x708] sm:$0xff]  ;;  %v250_v53 = vld [vmem:[%s2529_s1 + $0x698] sm:$0xff]  ;;  %v31_v56 = vld [vmem:[%s2530_s0 + $0x40] sm:$0xff] }
  0x45   :  { %1451 = vmatpush3.bf16.msra.mxu0 %v1450_v21  ;;  %646 = vmatprep.mubr.f32.mxu0 %v32_v34  ;;  %v1502_v21 = vpack.c.bf16 %v210_v15, %v209_v13  ;;  %v282_v55 = vld [vmem:[%s2529_s1 + $0x798] sm:$0xff]  ;;  %v33_v58 = vld [vmem:[%s2530_s0 + $0x50] sm:$0xff]  ;;  %v252_v3 = vld [vmem:[%s2529_s1 + $0x6a8] sm:$0xff] }
  0x46   :  { %577 = vmatmul.mubr.f32.vlgmr.msra.gmra.mrb[2].mxu1 %v29_v22  ;;  %1453 = vmatprep.subr.bf16.mxu0 %v1452_v24  ;;  %v1472_v22 = vpack.c.bf16 %v196_v17, %v195_v16  ;;  %v180_v24 = vld [vmem:[%s2529_s1 + $0x468] sm:$0xff]  ;;  %v265_v63 = vld [vmem:[%s2529_s1 + $0x710] sm:$0xff]  ;;  %v266_v1 = vld [vmem:[%s2529_s1 + $0x718] sm:$0xff] }
  0x47   :  { %1483 = vmatpush3.bf16.msra.mxu1 %v1482_v23  ;;  %716 = vmatprep.mubr.f32.mxu1 %v34_v36  ;;  %v179_v23 = vld [vmem:[%s2529_s1 + $0x460] sm:$0xff]  ;;  %v182_v36 = vld [vmem:[%s2529_s1 + $0x478] sm:$0xff]  ;;  %v284_v5 = vld [vmem:[%s2529_s1 + $0x7a8] sm:$0xff] }
  0x48   :  { %1485 = vmatprep.subr.bf16.mxu1 %v1484_v28  ;;  %v197_v28 = vld [vmem:[%s2529_s1 + $0x4f0] sm:$0xff]  ;;  %v1474_v32 = vpack.c.bf16 %v180_v24, %v179_v23  ;;  %v283_v4 = vld [vmem:[%s2529_s1 + $0x7a0] sm:$0xff]  ;;  %v36_v6 = vld [vmem:[%s2530_s0 + $0x68] sm:$0xff] }
  0x49   :  { %1455 = vmatpush3.bf16.msra.mxu0 %v1454_v35  ;;  %v1476_v34 = vpack.c.bf16 %v198_v29, %v197_v28  ;;  %v181_v35 = vld [vmem:[%s2529_s1 + $0x470] sm:$0xff]  ;;  %v235_v11 = vld [vmem:[%s2529_s1 + $0x620] sm:$0xff]  ;;  %v236_v12 = vld [vmem:[%s2529_s1 + $0x628] sm:$0xff] }
  0x4a   :  { %1457 = vmatprep.subr.bf16.mxu0 %v1456_v38  ;;  %v1508_v38 = vpack.c.bf16 %v230_v31, %v229_v30  ;;  %v1478_v44 = vpack.c.bf16 %v182_v36, %v181_v35  ;;  %v267_v13 = vld [vmem:[%s2529_s1 + $0x720] sm:$0xff]  ;;  %v268_v15 = vld [vmem:[%s2529_s1 + $0x728] sm:$0xff]  ;;  %v253_v16 = vld [vmem:[%s2529_s1 + $0x6b0] sm:$0xff] }
  0x4b   :  { %1487 = vmatpush3.bf16.msra.mxu1 %v1486_v37  ;;  %v213_v37 = vld [vmem:[%s2529_s1 + $0x570] sm:$0xff]  ;;  %v254_v17 = vld [vmem:[%s2529_s1 + $0x6b8] sm:$0xff]  ;;  %v255_v28 = vld [vmem:[%s2529_s1 + $0x6c0] sm:$0xff] }
  0x4c   :  { %1489 = vmatprep.subr.bf16.mxu1 %v1488_v42  ;;  %v279_v42 = vld [vmem:[%s2529_s1 + $0x780] sm:$0xff]  ;;  %v1510_v45 = vpack.c.bf16 %v214_v39, %v213_v37  ;;  %v285_v18 = vld [vmem:[%s2529_s1 + $0x7b0] sm:$0xff]  ;;  %v286_v19 = vld [vmem:[%s2529_s1 + $0x7b8] sm:$0xff] }
  0x4d   :  { %1459 = vmatpush3.bf16.msra.mxu0 %v1458_v48  ;;  %v232_v48 = vld [vmem:[%s2529_s1 + $0x608] sm:$0xff]  ;;  %v237_v23 = vld [vmem:[%s2529_s1 + $0x630] sm:$0xff]  ;;  %v238_v24 = vld [vmem:[%s2529_s1 + $0x638] sm:$0xff] }
  0x4e   :  { %1461 = vmatprep.subr.bf16.mxu0 %v1460_v50  ;;  %v1544_v50 = vpack.c.bf16 %v280_v43, %v279_v42  ;;  %v1514_v57 = vpack.c.bf16 %v232_v48, %v231_v47  ;;  %v269_v25 = vld [vmem:[%s2529_s1 + $0x730] sm:$0xff]  ;;  %v270_v27 = vld [vmem:[%s2529_s1 + $0x738] sm:$0xff]  ;;  %v256_v29 = vld [vmem:[%s2529_s1 + $0x6c8] sm:$0xff] }
  0x4f   :  { %1491 = vmatpush3.bf16.msra.mxu1 %v1490_v49  ;;  %v263_v49 = vld [vmem:[%s2529_s1 + $0x700] sm:$0xff]  ;;  %v288_v31 = vld [vmem:[%s2529_s1 + $0x7c8] sm:$0xff]  ;;  %v257_v40 = vld [vmem:[%s2529_s1 + $0x6d0] sm:$0xff] }
  0x50   :  { %1493 = vmatprep.subr.bf16.mxu1 %v1492_v54  ;;  %v281_v54 = vld [vmem:[%s2529_s1 + $0x790] sm:$0xff]  ;;  %v1546_v59 = vpack.c.bf16 %v264_v51, %v263_v49  ;;  %v287_v30 = vld [vmem:[%s2529_s1 + $0x7c0] sm:$0xff]  ;;  %v240_v36 = vld [vmem:[%s2529_s1 + $0x648] sm:$0xff] }
  0x51   :  { %1463 = vmatpush3.bf16.msra.mxu0 %v1462_v60  ;;  %v1516_v60 = vpack.c.bf16 %v250_v53, %v249_v52  ;;  %v1548_v0 = vpack.c.bf16 %v282_v55, %v281_v54  ;;  %v239_v35 = vld [vmem:[%s2529_s1 + $0x640] sm:$0xff]  ;;  %v272_v39 = vld [vmem:[%s2529_s1 + $0x748] sm:$0xff]  ;;  %v258_v41 = vld [vmem:[%s2529_s1 + $0x6d8] sm:$0xff] }
  0x52   :  { %1465 = vmatprep.subr.bf16.mxu0 %v1464_v62  ;;  %v234_v62 = vld [vmem:[%s2529_s1 + $0x618] sm:$0xff]  ;;  %v271_v37 = vld [vmem:[%s2529_s1 + $0x740] sm:$0xff]  ;;  %v289_v42 = vld [vmem:[%s2529_s1 + $0x7d0] sm:$0xff] }
  0x53   :  { %1495 = vmatpush3.bf16.msra.mxu1 %v1494_v61  ;;  %v233_v61 = vld [vmem:[%s2529_s1 + $0x610] sm:$0xff]  ;;  %v290_v43 = vld [vmem:[%s2529_s1 + $0x7d8] sm:$0xff]  ;;  %v259_v52 = vld [vmem:[%s2529_s1 + $0x6e0] sm:$0xff] }
  0x54   :  { %1497 = vmatprep.subr.bf16.mxu1 %v1496_v2  ;;  %v251_v2 = vld [vmem:[%s2529_s1 + $0x6a0] sm:$0xff]  ;;  %v1518_v7 = vpack.c.bf16 %v234_v62, %v233_v61  ;;  %v241_v47 = vld [vmem:[%s2529_s1 + $0x650] sm:$0xff]  ;;  %v242_v48 = vld [vmem:[%s2529_s1 + $0x658] sm:$0xff] }
  0x55   :  { %1467 = vmatpush3.bf16.msra.mxu0 %v1466_v8  ;;  %v38_v8 = vld [vmem:[%s2530_s0 + $0x78] sm:$0xff]  ;;  %v273_v49 = vld [vmem:[%s2529_s1 + $0x750] sm:$0xff]  ;;  %v260_v53 = vld [vmem:[%s2529_s1 + $0x6e8] sm:$0xff] }
  0x56   :  { %1469 = vmatprep.subr.bf16.mxu0 %v1468_v10  ;;  %v1520_v10 = vpack.c.bf16 %v252_v3, %v251_v2  ;;  %v274_v51 = vld [vmem:[%s2529_s1 + $0x758] sm:$0xff]  ;;  %v291_v54 = vld [vmem:[%s2529_s1 + $0x7e0] sm:$0xff]  ;;  %v292_v55 = vld [vmem:[%s2529_s1 + $0x7e8] sm:$0xff] }
  0x57   :  { %1499 = vmatpush3.bf16.msra.mxu1 %v1498_v9  ;;  %v1550_v9 = vpack.c.bf16 %v266_v1, %v265_v63  ;;  %v275_v61 = vld [vmem:[%s2529_s1 + $0x760] sm:$0xff]  ;;  %v1568_v62 = vpack.c.bf16 %v292_v55, %v291_v54  ;;  %v276_v63 = vld [vmem:[%s2529_s1 + $0x768] sm:$0xff]  ;;  %v262_v1 = vld [vmem:[%s2529_s1 + $0x6f8] sm:$0xff] }
  0x58   :  { %1501 = vmatprep.subr.bf16.mxu1 %v1500_v14  ;;  %v1552_v14 = vpack.c.bf16 %v284_v5, %v283_v4  ;;  %v293_v2 = vld [vmem:[%s2529_s1 + $0x7f0] sm:$0xff]  ;;  %v294_v3 = vld [vmem:[%s2529_s1 + $0x7f8] sm:$0xff]  ;;  %v1570_v5 = vpack.c.bf16 %v276_v63, %v275_v61 }
  0x59   :  { %1471 = vmatpush3.bf16.msra.mxu0 %v1470_v20  ;;  %v1522_v20 = vpack.c.bf16 %v236_v12, %v235_v11  ;;  %v278_v11 = vld [vmem:[%s2529_s1 + $0x778] sm:$0xff] }
  0x5a   :  { %1473 = vmatprep.subr.bf16.mxu0 %v1472_v22  ;;  %v1524_v22 = vpack.c.bf16 %v254_v17, %v253_v16  ;;  %v1607_v16 = vmov 0.0|0.0   ;;  %v864_v17 = vld [vmem:[%s2531_s3] sm:$0xff] }
  0x5b   :  { %1503 = vmatpush3.bf16.msra.mxu1 %v1502_v21  ;;  %v1554_v21 = vpack.c.bf16 %v268_v15, %v267_v13  ;;  %v37_v15 = vld [vmem:[%s2530_s0 + $0x70] sm:$0xff] }
  0x5c   :  { %1505 = vmatprep.subr.bf16.mxu1 %v1504_v26  ;;  %v1556_v26 = vpack.c.bf16 %v286_v19, %v285_v18  ;;  %v865_v18 = vld [vmem:[%s2531_s3 + $0x8] sm:$0xff]  ;;  %v866_v19 = vld [vmem:[%s2531_s3 + $0x10] sm:$0xff] }
  0x5d   :  { %1475 = vmatpush3.bf16.msra.mxu0 %v1474_v32  ;;  %v1526_v32 = vpack.c.bf16 %v238_v24, %v237_v23  ;;  %v868_v23 = vld [vmem:[%s2531_s3 + $0x20] sm:$0xff]  ;;  %v869_v24 = vld [vmem:[%s2531_s3 + $0x28] sm:$0xff] }
  0x5e   :  { %1477 = vmatprep.subr.bf16.mxu0 %v1476_v34  ;;  %v1528_v34 = vpack.c.bf16 %v256_v29, %v255_v28  ;;  %v872_v29 = vld [vmem:[%s2531_s3 + $0x40] sm:$0xff] }
  0x5f   :  { %1507 = vmatpush3.bf16.msra.mxu1 %v1506_v33  ;;  %v1558_v33 = vpack.c.bf16 %v270_v27, %v269_v25  ;;  %v1583_v25 = vpack.c.bf16 %v869_v24, %v868_v23  ;;  %v871_v27 = vld [vmem:[%s2531_s3 + $0x38] sm:$0xff] }
  0x60   :  { %1509 = vmatprep.subr.bf16.mxu1 %v1508_v38  ;;  %v1560_v38 = vpack.c.bf16 %v288_v31, %v287_v30  ;;  %v873_v30 = vld [vmem:[%s2531_s3 + $0x48] sm:$0xff] }
  0x61   :  { %1479 = vmatpush3.bf16.msra.mxu0 %v1478_v44  ;;  %v1530_v44 = vpack.c.bf16 %v240_v36, %v239_v35  ;;  %v1589_v31 = vpack.c.bf16 %v873_v30, %v872_v29  ;;  %v876_v35 = vld [vmem:[%s2531_s3 + $0x60] sm:$0xff]  ;;  %v877_v36 = vld [vmem:[%s2531_s3 + $0x68] sm:$0xff] }
  0x62   :  { %1513 = vmatprep.subr.bf16.mxu0 %v1512_v46  ;;  %v1532_v46 = vpack.c.bf16 %v258_v41, %v257_v40  ;;  %v1609_v41 = vmov 0.0  }
  0x63   :  { %1511 = vmatpush3.bf16.msra.mxu1 %v1510_v45  ;;  %v1562_v45 = vpack.c.bf16 %v272_v39, %v271_v37  ;;  %v1595_v37 = vpack.c.bf16 %v877_v36, %v876_v35  ;;  %v879_v39 = vld [vmem:[%s2531_s3 + $0x78] sm:$0xff] }
  0x64   :  { %1545 = vmatprep.subr.bf16.mxu1 %v1544_v50  ;;  %647 = vmatmul.mubr.f32.vlgmr.msra.gmra.mrb[4].mxu0 %v31_v56  ;;  %v1564_v50 = vpack.c.bf16 %v290_v43, %v289_v42  ;;  %v1534_v56 = vpack.c.bf16 %v242_v48, %v241_v47  ;;  %v986_v43 = vld [vmem:[%s2532_s2] ss:$0 sm:$0xff] }
  0x65   :  { %1515 = vmatpush3.bf16.msra.mxu0 %v1514_v57  ;;  %786 = vmatprep.mubr.f32.mxu0 %v36_v6  ;;  %v1566_v57 = vpack.c.bf16 %v274_v51, %v273_v49 }
  0x66   :  { %717 = vmatmul.mubr.f32.vlgmr.msra.gmra.mrb[4].mxu1 %v33_v58  ;;  %1517 = vmatprep.subr.bf16.mxu0 %v1516_v60  ;;  %v1536_v58 = vpack.c.bf16 %v260_v53, %v259_v52  ;;  %v244_v60 = vld [vmem:[%s2529_s1 + $0x668] sm:$0xff] }
  0x67   :  { %1547 = vmatpush3.bf16.msra.mxu1 %v1546_v59  ;;  %856 = vmatprep.mubr.f32.mxu1 %v38_v8  ;;  %v243_v59 = vld [vmem:[%s2529_s1 + $0x660] sm:$0xff]  ;;  %v246_v8 = vld [vmem:[%s2529_s1 + $0x678] sm:$0xff] }
  0x68   :  { %1549 = vmatprep.subr.bf16.mxu1 %v1548_v0  ;;  %v261_v0 = vld [vmem:[%s2529_s1 + $0x6f0] sm:$0xff]  ;;  %v1538_v4 = vpack.c.bf16 %v244_v60, %v243_v59 }
  0x69   :  { %1519 = vmatpush3.bf16.msra.mxu0 %v1518_v7  ;;  %v1540_v6 = vpack.c.bf16 %v262_v1, %v261_v0  ;;  %v245_v7 = vld [vmem:[%s2529_s1 + $0x670] sm:$0xff] }
  0x6a   :  { %1521 = vmatprep.subr.bf16.mxu0 %v1520_v10  ;;  %v277_v10 = vld [vmem:[%s2529_s1 + $0x770] sm:$0xff]  ;;  %v1542_v12 = vpack.c.bf16 %v246_v8, %v245_v7 }
  0x6b   :  { %1551 = vmatpush3.bf16.msra.mxu1 %v1550_v9  ;;  %v1572_v9 = vpack.c.bf16 %v294_v3, %v293_v2  ;;  %v1574_v13 = vpack.c.bf16 %v278_v11, %v277_v10 }
  0x6c   :  { %1553 = vmatprep.subr.bf16.mxu1 %v1552_v14  ;;  %v35_v14 = vld [vmem:[%s2530_s0 + $0x60] sm:$0xff] }
  0x6d   :  { %1523 = vmatpush3.bf16.msra.mxu0 %v1522_v20  ;;  %v1577_v20 = vpack.c.bf16 %v865_v18, %v864_v17 }
  0x6e   :  { %1525 = vmatprep.subr.bf16.mxu0 %v1524_v22 }
  0x6f   :  { %1555 = vmatpush3.bf16.msra.mxu1 %v1554_v21  ;;  %v867_v21 = vld [vmem:[%s2531_s3 + $0x18] sm:$0xff] }
  0x70   :  { %1557 = vmatprep.subr.bf16.mxu1 %v1556_v26  ;;  %v1580_v22 = vpack.c.bf16 %v867_v21, %v866_v19  ;;  %v870_v26 = vld [vmem:[%s2531_s3 + $0x30] sm:$0xff] }
  0x71   :  { %1527 = vmatpush3.bf16.msra.mxu0 %v1526_v32  ;;  %v1586_v28 = vpack.c.bf16 %v871_v27, %v870_v26  ;;  %v874_v32 = vld [vmem:[%s2531_s3 + $0x50] sm:$0xff] }
  0x72   :  { %1529 = vmatprep.subr.bf16.mxu0 %v1528_v34 }
  0x73   :  { %1559 = vmatpush3.bf16.msra.mxu1 %v1558_v33  ;;  %v875_v33 = vld [vmem:[%s2531_s3 + $0x58] sm:$0xff] }
  0x74   :  { %1561 = vmatprep.subr.bf16.mxu1 %v1560_v38  ;;  %v1592_v34 = vpack.c.bf16 %v875_v33, %v874_v32  ;;  %v878_v38 = vld [vmem:[%s2531_s3 + $0x70] sm:$0xff] }
  0x75   :  { %1531 = vmatpush3.bf16.msra.mxu0 %v1530_v44  ;;  %v1598_v40 = vpack.c.bf16 %v879_v39, %v878_v38 }
  0x76   :  { %1533 = vmatprep.subr.bf16.mxu0 %v1532_v46 }
  0x77   :  { %1563 = vmatpush3.bf16.msra.mxu1 %v1562_v45 }
  0x78   :  { %1565 = vmatprep.subr.bf16.mxu1 %v1564_v50 }
  0x79   :  { %1535 = vmatpush3.bf16.msra.mxu0 %v1534_v56 }
  0x7a   :  { %1537 = vmatprep.subr.bf16.mxu0 %v1536_v58 }
  0x7b   :  { %1567 = vmatpush3.bf16.msra.mxu1 %v1566_v57 }
  0x7c   :  { %1569 = vmatprep.subr.bf16.mxu1 %v1568_v62 }
  0x7d   :  { %1539 = vmatpush3.bf16.msra.mxu0 %v1538_v4 }
  0x7e   :  { %1541 = vmatprep.subr.bf16.mxu0 %v1540_v6 }
  0x7f   :  { %1571 = vmatpush3.bf16.msra.mxu1 %v1570_v5 }
  0x80   :  { %1573 = vmatprep.subr.bf16.mxu1 %v1572_v9 }
  0x81   :  { %1543 = vmatpush3.bf16.msra.mxu0 %v1542_v12  ;;  %v958_v12 = vlaneseq }
  0x82   :  { %1576 = vmatprep.subr.bf16.mxu0 %v1607_v16 }
  0x83   :  { %1575 = vmatpush3.bf16.msra.mxu1 %v1574_v13  ;;  %v959_v13 = vand.u32 127, %v958_v12 }
  0x84   :  { %787 = vmatmul.mubr.f32.vlgmr.msra.gmra.mrb[6].mxu0 %v35_v14  ;;  %v987_v14 = vld [vmem:[%s2534_s4] ss:$0 sm:$0xff] }
  0x85   :  { %1578 = vmatpush3.bf16.msra.mxu0 %v1577_v20  ;;  %1317 = vmatprep.mubr.msk.f32.mxu0 %vm1608_vm0, %v1609_v41  ;;  %vm960_vm1 = vcmp.lt.s32.totalorder %v959_v13, 10 }
  0x86   :  { %857 = vmatmul.mubr.f32.vlgmr.msra.gmra.mrb[6].mxu1 %v37_v15  ;;  %1579 = vmatprep.subr.bf16.mxu0 %v1607_v16 }
  0x89   :  { %1581 = vmatpush3.bf16.msra.mxu0 %v1580_v22 }
  0x8a   :  { %1582 = vmatprep.subr.bf16.mxu0 %v1607_v16 }
  0x8d   :  { %1584 = vmatpush3.bf16.msra.mxu0 %v1583_v25 }
  0x8e   :  { %1585 = vmatprep.subr.bf16.mxu0 %v1607_v16 }
  0x91   :  { %1587 = vmatpush3.bf16.msra.mxu0 %v1586_v28 }
  0x92   :  { %1588 = vmatprep.subr.bf16.mxu0 %v1607_v16 }
  0x95   :  { %1590 = vmatpush3.bf16.msra.mxu0 %v1589_v31 }
  0x96   :  { %1591 = vmatprep.subr.bf16.mxu0 %v1607_v16 }
  0x99   :  { %1593 = vmatpush3.bf16.msra.mxu0 %v1592_v34 }
  0x9a   :  { %1594 = vmatprep.subr.bf16.mxu0 %v1607_v16 }
  0x9d   :  { %1596 = vmatpush3.bf16.msra.mxu0 %v1595_v37 }
  0x9e   :  { %1597 = vmatprep.subr.bf16.mxu0 %v1607_v16 }
  0xa1   :  { %1599 = vmatpush3.bf16.msra.mxu0 %v1598_v40 }
  0xf7   :  { %v1020_v42 = vpop.f32.mrb[0].mxu0 }
  0xf8   :  { %v1021_v44 = vpop.f32.mrb[1].mxu0 }
  0xf9   :  { %v1055_v45 = vpop.f32.mrb[0].mxu1  ;;  %v1022_v46 = vadd.f32 %v1021_v44, %v1020_v42 }
  0xfa   :  { %v1056_v47 = vpop.f32.mrb[1].mxu1 }
  0xfb   :  { %v1057_v48 = vadd.f32 %v1056_v47, %v1055_v45  ;;  %v369_v49 = vadd.f32 %v1022_v46, %v986_v43 }
  0xfd   :  { %v439_v50 = vadd.f32 %v1057_v48, %v369_v49 }
 0x117   :  { %v1090_v51 = vpop.f32.mrb[2].mxu0 }
 0x118   :  { %v1091_v52 = vpop.f32.mrb[3].mxu0 }
 0x119   :  { %v1125_v53 = vpop.f32.mrb[2].mxu1  ;;  %v1092_v54 = vadd.f32 %v1091_v52, %v1090_v51 }
 0x11a   :  { %v1126_v55 = vpop.f32.mrb[3].mxu1 }
 0x11b   :  { %v1127_v56 = vadd.f32 %v1126_v55, %v1125_v53  ;;  %v509_v57 = vadd.f32 %v1092_v54, %v439_v50 }
 0x11d   :  { %v579_v58 = vadd.f32 %v1127_v56, %v509_v57 }
 0x137   :  { %v1160_v59 = vpop.f32.mrb[4].mxu0 }
 0x138   :  { %v1161_v60 = vpop.f32.mrb[5].mxu0 }
 0x139   :  { %v1195_v61 = vpop.f32.mrb[4].mxu1  ;;  %v1162_v62 = vadd.f32 %v1161_v60, %v1160_v59 }
 0x13a   :  { %v1196_v63 = vpop.f32.mrb[5].mxu1 }
 0x13b   :  { %v1197_v0 = vadd.f32 %v1196_v63, %v1195_v61  ;;  %v649_v1 = vadd.f32 %v1162_v62, %v579_v58 }
 0x13d   :  { %v719_v2 = vadd.f32 %v1197_v0, %v649_v1 }
 0x157   :  { %v1230_v3 = vpop.f32.mrb[6].mxu0 }
 0x158   :  { %v1231_v4 = vpop.f32.mrb[7].mxu0 }
 0x159   :  { %v1265_v5 = vpop.f32.mrb[6].mxu1  ;;  %v1232_v6 = vadd.f32 %v1231_v4, %v1230_v3 }
 0x15a   :  { %v1266_v7 = vpop.f32.mrb[7].mxu1 }
 0x15b   :  { %v1267_v8 = vadd.f32 %v1266_v7, %v1265_v5  ;;  %v789_v9 = vadd.f32 %v1232_v6, %v719_v2 }
 0x15d   :  { %v859_v10 = vadd.f32 %v1267_v8, %v789_v9 }
 0x15f   :  { %v862_v11 = vmax.f32 %v859_v10, 0.0 }
 0x161   :  { %863 = vst [vmem:[%s2533_s5] sm:$0xff] %v862_v11  ;;  %1318 = vmatmul.mubr.f32.vlgmr.msra.gmra.mrb[8].mxu0 %v862_v11 }
 0x234   :  { %v953_v15 = vpop.f32.mrb[8].mxu0 }
 0x235   :  { %v954_v16 = vadd.f32 %v987_v14, %v953_v15  ;;  %v1319_v17 = vpop.f32.mrb[9].mxu0 }
 0x237   :  { %957 = vst [vmem:[%s2535_s6] sm:$0xff] %v954_v16  ;;  %v961_v18 = vsel %vm960_vm1, %v954_v16, -1e+30 }
 0x238   :  { %962 = vmax.xlane.f32.xlu0 %v961_v18 }
 0x2c5   :  { %v963_v19 = vpop.xlane.xlu0 %962 }
 0x2c6   :  { %v964_v20 = vsub.f32 %v961_v18, %v963_v19 }
 0x2c8   :  { %v965_v21 = vmul.f32 1.442695, %v964_v20 }
 0x2ca   :  { %1603 = vpow2.f32 %v965_v21 }
 0x2d4   :  { %v1604_v22 = vpop.eup %1603 }
 0x2d5   :  { %967 = vadd.xlane.f32.xlu0 %v1604_v22 }
 0x362   :  { %v968_v23 = vpop.xlane.xlu0 %967 }
 0x363   :  { %1605 = vlog2.f32 %v968_v23 }
 0x36d   :  { %v1606_v24 = vpop.eup %1605 }
 0x36e   :  { %v970_v25 = vmul.f32 0.6931472, %v1606_v24 }
 0x370   :  { %v971_v26 = vadd.f32 %v970_v25, %v963_v19 }
 0x372   :  { %v972_v27 = vsub.f32 %v954_v16, %v971_v26 }
 0x374   :  { %973 = vst [vmem:[%s2536_s7] sm:$0xff] %v972_v27 }

</bundles_post_ra>
